<compile_context>
chip_gen: v7x
topology: tpu7x:2x2x1
jax: 0.10.0
libtpu: 0.0.40
codegen_flags: <defaults>
</compile_context>

<pallas_src>
import jax
import jax.numpy as jnp
import numpy as np
from jax import lax
from jax.experimental import pallas as pl
from jax.experimental.pallas import tpu as pltpu

H_IN = 16             # input spatial size
K1 = 5                # conv1 kernel
C1 = 6                # conv1 out channels
H1 = H_IN - K1 + 1    # 12  (conv1 output)
POOL = 2
HP = H1 // POOL       # 6   (avg-pool output)
K2 = 2                # deconv1 kernel == stride
C2 = 6                # deconv1 out channels
H2 = HP * K2          # 12  (deconv1 output)
K3 = 5                # deconv2 kernel
H_OUT = H2 + K3 - 1   # 16  (deconv2 output)

D_IN = H_IN * H_IN            # 256
D_MID = C1 * H1 * H1          # 864  (== C2 * H2 * H2)
D_MID_P = 896                 # 864 padded up to a multiple of 128
D_OUT = H_OUT * H_OUT         # 256

MAX_B_TILE = 256              # batch rows per grid step


def _round_up(x, m):
    return ((x + m - 1) // m) * m


# ----------------------------------------------------------------------------
# Host-side packing: fold im2col / pooling / transposed-conv scatter into three
# dense weight matrices so the kernel is matmul + bias + nonlinearity only.
# ----------------------------------------------------------------------------
def _pack_weights(w1, b1, w2, b2, w3, b3):
    f32 = jnp.float32

    # --- W1: Conv2d(1, 6, 5, stride=1) as (256, 896) ------------------------
    # rows: input pixel (pi, pj) -> pi*16 + pj
    # cols: output (c, oi, oj)   -> c*144 + oi*12 + oj
    c, oi, oj, ki, kj = np.meshgrid(
        np.arange(C1), np.arange(H1), np.arange(H1),
        np.arange(K1), np.arange(K1), indexing="ij")
    rows = ((oi + ki) * H_IN + (oj + kj)).ravel()
    cols = (c * H1 * H1 + oi * H1 + oj).ravel()
    vals = w1.astype(f32).reshape(C1, K1, K1)[c.ravel(), ki.ravel(), kj.ravel()]
    W1 = jnp.zeros((D_IN, D_MID_P), f32).at[rows, cols].set(vals)
    B1 = jnp.zeros((1, D_MID_P), f32).at[0, :D_MID].set(
        jnp.repeat(b1.astype(f32), H1 * H1))

    # --- W2: AvgPool2d(2) folded with ConvTranspose2d(6, 6, 2, stride=2) ----
    # y[oc, yi, yj] = b2[oc]
    #   + sum_cin 0.25 * w2[cin, oc, yi%2, yj%2] * sum_{a,b} h[cin, 2*(yi//2)+a, 2*(yj//2)+b]
    cin, oc, yi, yj, pa, pb = np.meshgrid(
        np.arange(C1), np.arange(C2), np.arange(H2), np.arange(H2),
        np.arange(POOL), np.arange(POOL), indexing="ij")
    hi = 2 * (yi // 2) + pa
    hj = 2 * (yj // 2) + pb
    rows = (cin * H1 * H1 + hi * H1 + hj).ravel()
    cols = (oc * H2 * H2 + yi * H2 + yj).ravel()
    vals = 0.25 * w2.astype(f32)[cin.ravel(), oc.ravel(),
                                 (yi % 2).ravel(), (yj % 2).ravel()]
    W2 = jnp.zeros((D_MID_P, D_MID_P), f32).at[rows, cols].set(vals)
    B2 = jnp.zeros((1, D_MID_P), f32).at[0, :D_MID].set(
        jnp.repeat(b2.astype(f32), H2 * H2))

    # --- W3: ConvTranspose2d(6, 1, 5, stride=1) as (896, 256) ---------------
    # out[oi, oj] += y[cin, yi, yj] * w3[cin, 0, oi-yi, oj-yj]
    cin, yi, yj, kh, kw = np.meshgrid(
        np.arange(C2), np.arange(H2), np.arange(H2),
        np.arange(K3), np.arange(K3), indexing="ij")
    rows = (cin * H2 * H2 + yi * H2 + yj).ravel()
    cols = ((yi + kh) * H_OUT + (yj + kw)).ravel()
    vals = w3.astype(f32).reshape(C2, K3, K3)[cin.ravel(), kh.ravel(), kw.ravel()]
    W3 = jnp.zeros((D_MID_P, D_OUT), f32).at[rows, cols].set(vals)
    B3 = jnp.full((1, D_OUT), b3.astype(f32)[0], f32)

    return W1, B1, W2, B2, W3, B3


# ----------------------------------------------------------------------------
# Kernel: one grid step = one batch tile of b_tile images (rows).
# ----------------------------------------------------------------------------
def _autoencoder_kernel(x_ref, w1_ref, b1_ref, w2_ref, b2_ref, w3_ref, b3_ref,
                        o_ref):
    x = x_ref[...]                                             # (bt, 256)
    # Conv2d(1,6,5) + Tanh
    h = jnp.dot(x, w1_ref[...], preferred_element_type=jnp.float32)
    h = jnp.tanh(h + b1_ref[...])                              # (bt, 896)
    # AvgPool2d(2) + ConvTranspose2d(6,6,2,stride=2) + Tanh (pool folded in W2)
    y = jnp.dot(h, w2_ref[...], preferred_element_type=jnp.float32)
    y = jnp.tanh(y + b2_ref[...])                              # (bt, 896)
    # ConvTranspose2d(6,1,5,stride=1) + ReLU
    o = jnp.dot(y, w3_ref[...], preferred_element_type=jnp.float32)
    o_ref[...] = jnp.maximum(o + b3_ref[...], 0.0).astype(o_ref.dtype)


# ----------------------------------------------------------------------------
# Wrapper: NCHW in / NCHW out; batch lives on the matmul M dimension.
# ----------------------------------------------------------------------------
def autoencoder_lenet_forward(x, epoch, params):
    del epoch  # unused, mirrors the PyTorch forward signature
    w1, b1, w2, b2, w3, b3 = params
    N = x.shape[0]

    W1, B1, W2, B2, W3, B3 = _pack_weights(w1, b1, w2, b2, w3, b3)

    # Batch tiling: tiles are multiples of 8 rows, capped at MAX_B_TILE, and
    # balanced so padding waste stays small while giving >=2 grid steps (and
    # hence both v7x TensorCores work) for larger batches.
    n8 = _round_up(max(N, 1), 8)
    n_steps = -(-n8 // MAX_B_TILE)
    b_tile = _round_up(-(-n8 // n_steps), 8)
    n_pad = n_steps * b_tile

    xf = x.astype(jnp.float32).reshape(N, D_IN)
    if n_pad != N:
        xf = jnp.pad(xf, ((0, n_pad - N), (0, 0)))

    full = lambda i: (0, 0)
    cost = pl.CostEstimate(
        flops=2 * n_pad * (D_IN * D_MID_P + D_MID_P * D_MID_P + D_MID_P * D_OUT),
        transcendentals=2 * n_pad * D_MID_P,
        bytes_accessed=4 * (n_pad * (D_IN + D_OUT)
                            + D_IN * D_MID_P + D_MID_P * D_MID_P
                            + D_MID_P * D_OUT + 2 * D_MID_P + D_OUT),
    )

    out = pl.pallas_call(
        _autoencoder_kernel,
        out_shape=jax.ShapeDtypeStruct((n_pad, D_OUT), jnp.float32),
        grid=(n_steps,),
        in_specs=[
            pl.BlockSpec((b_tile, D_IN), lambda i: (i, 0)),
            pl.BlockSpec((D_IN, D_MID_P), full),      # W1 (resident)
            pl.BlockSpec((1, D_MID_P), full),         # B1
            pl.BlockSpec((D_MID_P, D_MID_P), full),   # W2 (resident)
            pl.BlockSpec((1, D_MID_P), full),         # B2
            pl.BlockSpec((D_MID_P, D_OUT), full),     # W3 (resident)
            pl.BlockSpec((1, D_OUT), full),           # B3
        ],
        out_specs=pl.BlockSpec((b_tile, D_OUT), lambda i: (i, 0)),
        compiler_params=pltpu.CompilerParams(
            dimension_semantics=("parallel",),
            vmem_limit_bytes=48 * 1024 * 1024),
        cost_estimate=cost,
    )(xf, W1, B1, W2, B2, W3, B3)

    return out[:N].reshape(N, 1, H_OUT, H_OUT)


def reference_forward(x, params):
    """Pure-JAX reference matching the PyTorch semantics."""
    w1, b1, w2, b2, w3, b3 = params
    dn = ("NCHW", "OIHW", "NCHW")
    # Conv2d(1, 6, 5) + Tanh
    h = lax.conv_general_dilated(x, w1, (1, 1), "VALID", dimension_numbers=dn)
    h = jnp.tanh(h + b1.reshape(1, -1, 1, 1))
    # AvgPool2d(2)
    n, c, hh, ww = h.shape
    h = h.reshape(n, c, hh // 2, 2, ww // 2, 2).mean(axis=(3, 5))
    # ConvTranspose2d(6, 6, 2, stride=2): non-overlapping scatter
    z = jnp.einsum("ncij,cokl->noikjl", h, w2)
    nb, co, hi, kh, wi, kw = z.shape
    z = z.reshape(nb, co, hi * kh, wi * kw) + b2.reshape(1, -1, 1, 1)
    z = jnp.tanh(z)
    # ConvTranspose2d(6, 1, 5, stride=1): full conv with flipped kernel
    w3f = jnp.transpose(w3[:, :, ::-1, ::-1], (1, 0, 2, 3))
    out = lax.conv_general_dilated(z, w3f, (1, 1), ((4, 4), (4, 4)),
                                   dimension_numbers=dn)
    out = out + b3.reshape(1, -1, 1, 1)
    return jnp.maximum(out, 0.0)


if __name__ == "__main__":
    key = jax.random.PRNGKey(0)
    ks = jax.random.split(key, 7)
    w1 = jax.random.normal(ks[0], (6, 1, 5, 5), jnp.float32) * 0.2
    b1 = jax.random.normal(ks[1], (6,), jnp.float32) * 0.1
    w2 = jax.random.normal(ks[2], (6, 6, 2, 2), jnp.float32) * 0.2
    b2 = jax.random.normal(ks[3], (6,), jnp.float32) * 0.1
    w3 = jax.random.normal(ks[4], (6, 1, 5, 5), jnp.float32) * 0.2
    b3 = jax.random.normal(ks[5], (1,), jnp.float32) * 0.1
    params = (w1, b1, w2, b2, w3, b3)

    x = jax.random.normal(ks[6], (2, 1, H_IN, H_IN), jnp.float32)

    out = autoencoder_lenet_forward(x, epoch=0, params=params)
    out = jax.block_until_ready(out)

    ref = reference_forward(x, params)
    assert out.shape == (2, 1, H_OUT, H_OUT)
    if not np.allclose(np.asarray(out), np.asarray(ref), rtol=1e-4, atol=1e-4):
        raise AssertionError("Pallas kernel output does not match JAX reference")
    print("KERNEL_OK")
</pallas_src>

<mosaic_0001>
module attributes {stable_mosaic.version = 11 : i64} {
  func.func @_autoencoder_kernel(%arg0: i32, %arg1: memref<8x256xf32, #tpu.memory_space<vmem>>, %arg2: memref<256x896xf32, #tpu.memory_space<vmem>>, %arg3: memref<1x896xf32, #tpu.memory_space<vmem>>, %arg4: memref<896x896xf32, #tpu.memory_space<vmem>>, %arg5: memref<1x896xf32, #tpu.memory_space<vmem>>, %arg6: memref<896x256xf32, #tpu.memory_space<vmem>>, %arg7: memref<1x256xf32, #tpu.memory_space<vmem>>, %arg8: memref<8x256xf32, #tpu.memory_space<vmem>>) attributes {dimension_semantics = [#tpu.dimension_semantics<parallel>], iteration_bounds = array<i64: 1>, scalar_prefetch = 0 : i64, scratch_operands = 0 : i64, tpu.core_type = #tpu.core_type<tc>, window_params = [{transform_indices = @transform_0, window_bounds = array<i64: 8, 256>}, {pipeline_mode = #tpu.pipeline_mode<synchronous>, transform_indices = @transform_1, window_bounds = array<i64: 256, 896>}, {pipeline_mode = #tpu.pipeline_mode<synchronous>, transform_indices = @transform_2, window_bounds = array<i64: 1, 896>}, {pipeline_mode = #tpu.pipeline_mode<synchronous>, transform_indices = @transform_3, window_bounds = array<i64: 896, 896>}, {pipeline_mode = #tpu.pipeline_mode<synchronous>, transform_indices = @transform_4, window_bounds = array<i64: 1, 896>}, {pipeline_mode = #tpu.pipeline_mode<synchronous>, transform_indices = @transform_5, window_bounds = array<i64: 896, 256>}, {pipeline_mode = #tpu.pipeline_mode<synchronous>, transform_indices = @transform_6, window_bounds = array<i64: 1, 256>}, {transform_indices = @transform_7, window_bounds = array<i64: 8, 256>}]} {
    %c0 = arith.constant 0 : index
    %c0_0 = arith.constant 0 : index
    %0 = vector.load %arg1[%c0, %c0_0] : memref<8x256xf32, #tpu.memory_space<vmem>>, vector<8x256xf32>
    %c0_1 = arith.constant 0 : index
    %c0_2 = arith.constant 0 : index
    %1 = vector.load %arg2[%c0_1, %c0_2] : memref<256x896xf32, #tpu.memory_space<vmem>>, vector<256x896xf32>
    %cst = arith.constant dense<0.000000e+00> : vector<8x896xf32>
    %2 = tpu.matmul %0, %1, %cst {dimension_numbers = #tpu.dot_dimension_numbers<[1], [0], [0], [1], [0, 0, 1, 1], [], []>} : vector<8x256xf32>, vector<256x896xf32>, vector<8x896xf32> -> vector<8x896xf32>
    %c0_3 = arith.constant 0 : index
    %c0_4 = arith.constant 0 : index
    %3 = vector.load %arg3[%c0_3, %c0_4] : memref<1x896xf32, #tpu.memory_space<vmem>>, vector<1x896xf32>
    %4 = vector.broadcast %3 : vector<1x896xf32> to vector<8x896xf32>
    %5 = arith.addf %2, %4 : vector<8x896xf32>
    %6 = math.tanh %5 : vector<8x896xf32>
    %c0_5 = arith.constant 0 : index
    %c0_6 = arith.constant 0 : index
    %7 = vector.load %arg4[%c0_5, %c0_6] : memref<896x896xf32, #tpu.memory_space<vmem>>, vector<896x896xf32>
    %cst_7 = arith.constant dense<0.000000e+00> : vector<8x896xf32>
    %8 = tpu.matmul %6, %7, %cst_7 {dimension_numbers = #tpu.dot_dimension_numbers<[1], [0], [0], [1], [0, 0, 1, 1], [], []>} : vector<8x896xf32>, vector<896x896xf32>, vector<8x896xf32> -> vector<8x896xf32>
    %c0_8 = arith.constant 0 : index
    %c0_9 = arith.constant 0 : index
    %9 = vector.load %arg5[%c0_8, %c0_9] : memref<1x896xf32, #tpu.memory_space<vmem>>, vector<1x896xf32>
    %10 = vector.broadcast %9 : vector<1x896xf32> to vector<8x896xf32>
    %11 = arith.addf %8, %10 : vector<8x896xf32>
    %12 = math.tanh %11 : vector<8x896xf32>
    %c0_10 = arith.constant 0 : index
    %c0_11 = arith.constant 0 : index
    %13 = vector.load %arg6[%c0_10, %c0_11] : memref<896x256xf32, #tpu.memory_space<vmem>>, vector<896x256xf32>
    %cst_12 = arith.constant dense<0.000000e+00> : vector<8x256xf32>
    %14 = tpu.matmul %12, %13, %cst_12 {dimension_numbers = #tpu.dot_dimension_numbers<[1], [0], [0], [1], [0, 0, 1, 1], [], []>} : vector<8x896xf32>, vector<896x256xf32>, vector<8x256xf32> -> vector<8x256xf32>
    %c0_13 = arith.constant 0 : index
    %c0_14 = arith.constant 0 : index
    %15 = vector.load %arg7[%c0_13, %c0_14] : memref<1x256xf32, #tpu.memory_space<vmem>>, vector<1x256xf32>
    %16 = vector.broadcast %15 : vector<1x256xf32> to vector<8x256xf32>
    %17 = arith.addf %14, %16 : vector<8x256xf32>
    %cst_15 = arith.constant 0.000000e+00 : f32
    %18 = vector.broadcast %cst_15 : f32 to vector<8x256xf32>
    %19 = arith.maximumf %17, %18 : vector<8x256xf32>
    %c0_16 = arith.constant 0 : index
    %c0_17 = arith.constant 0 : index
    %20 = vector.load %arg8[%c0_16, %c0_17] : memref<8x256xf32, #tpu.memory_space<vmem>>, vector<8x256xf32>
    tpu.vector_store %arg8[%c0_16, %c0_17], %19 {strides = array<i32>} : memref<8x256xf32, #tpu.memory_space<vmem>>, vector<8x256xf32>,
    return
  }
  func.func @transform_0(%arg0: i32) -> (i32, i32) {
    %c0_i32 = arith.constant 0 : i32
    %c0_i32_0 = arith.constant 0 : i32
    return %arg0, %c0_i32 : i32, i32
  }
  func.func @transform_1(%arg0: i32) -> (i32, i32) {
    %c0_i32 = arith.constant 0 : i32
    %c0_i32_0 = arith.constant 0 : i32
    %c0_i32_1 = arith.constant 0 : i32
    return %c0_i32, %c0_i32_0 : i32, i32
  }
  func.func @transform_2(%arg0: i32) -> (i32, i32) {
    %c0_i32 = arith.constant 0 : i32
    %c0_i32_0 = arith.constant 0 : i32
    %c0_i32_1 = arith.constant 0 : i32
    return %c0_i32, %c0_i32_0 : i32, i32
  }
  func.func @transform_3(%arg0: i32) -> (i32, i32) {
    %c0_i32 = arith.constant 0 : i32
    %c0_i32_0 = arith.constant 0 : i32
    %c0_i32_1 = arith.constant 0 : i32
    return %c0_i32, %c0_i32_0 : i32, i32
  }
  func.func @transform_4(%arg0: i32) -> (i32, i32) {
    %c0_i32 = arith.constant 0 : i32
    %c0_i32_0 = arith.constant 0 : i32
    %c0_i32_1 = arith.constant 0 : i32
    return %c0_i32, %c0_i32_0 : i32, i32
  }
  func.func @transform_5(%arg0: i32) -> (i32, i32) {
    %c0_i32 = arith.constant 0 : i32
    %c0_i32_0 = arith.constant 0 : i32
    %c0_i32_1 = arith.constant 0 : i32
    return %c0_i32, %c0_i32_0 : i32, i32
  }
  func.func @transform_6(%arg0: i32) -> (i32, i32) {
    %c0_i32 = arith.constant 0 : i32
    %c0_i32_0 = arith.constant 0 : i32
    %c0_i32_1 = arith.constant 0 : i32
    return %c0_i32, %c0_i32_0 : i32, i32
  }
  func.func @transform_7(%arg0: i32) -> (i32, i32) {
    %c0_i32 = arith.constant 0 : i32
    %c0_i32_0 = arith.constant 0 : i32
    return %arg0, %c0_i32 : i32, i32
  }
}

</mosaic_0001>

<bundles_post_ra>
// kernel: tpu_custom_call.1
= control target key start
LH: loop header
LB: loop body
LE: loop exit
PB: predicated region body
PF: predicated region fallthrough
CT: control target
= control target key end

     0   :  { %12 = vsyncpa [#allocation3], 0  ;;  %s5158_s0 = inlined_call_operand.hbm [shape: f32[8,256], index: 0, kind: input, shape index: {}]   ;;  %s5159_s1 = inlined_call_operand.hbm [shape: f32[256,896], index: 1, kind: input, shape index: {}]   ;;  %s5160_s2 = inlined_call_operand.hbm [shape: f32[1,896], index: 2, kind: input, shape index: {}]   ;;  %s5161_s3 = inlined_call_operand.hbm [shape: f32[896,896], index: 3, kind: input, shape index: {}]   ;;  %s5162_s4 = inlined_call_operand.hbm [shape: f32[1,896], index: 4, kind: input, shape index: {}]   ;;  %s5163_s5 = inlined_call_operand.hbm [shape: f32[896,256], index: 5, kind: input, shape index: {}]   ;;  %s5164_s6 = inlined_call_operand.hbm [shape: f32[1,256], index: 6, kind: input, shape index: {}]   ;;  %s5165_s7 = inlined_call_operand.hbm [shape: f32[8,256], index: 7, kind: output, shape index: {}]  }
   0x1   :  { %13 = vsyncpa [#allocation6], 0 }
   0x2   :  { %14 = vsyncpa [#allocation9], 0 }
   0x3   :  { %15 = vsyncpa [#allocation12], 0 }
   0x4   :  { %16 = vsyncpa [#allocation4], 0  ;;  %s4863_s24 = smov [#allocation5]   ;;  %s4677_s28 = scalar_lea.hbm %s5159_s1, 28672 }
   0x5   :  { %s32_s25 = sshll.u32 %s4863_s24, 4  ;;  %p4678_p0 = scmp.ne.s32.totalorder %s5159_s1, %s4677_s28  ;;  %s33_s25 = int_to_ptr.vmem [resolvable:$true] %s32_s25 }
   0x6   :  { %p4681_p1 = scmp.lt.u32.totalorder %s4677_s28, %s5159_s1 }
   0x8   :  { %p4683_p2 = pnand %p4681_p1, %p4678_p0 }
   0xa   :  { %4686 = shalt.err (!%p4683_p2)
}
   0xb   :  { %s4687_s10 = scalar_lea.vmem %s33_s25, 28672  ;;  %p4692_p4 = scmp.lt.s32.totalorder %s33_s25, %s33_s25 }
   0xc   :  { %p4688_p3 = scmp.ne.s32.totalorder %s33_s25, %s4687_s10  ;;  %p4693_p5 = scmp.lt.s32.totalorder %s4687_s10, %s4687_s10 }
   0xe   :  { %p4694_p6 = por %p4693_p5, %p4692_p4 }
  0x10   :  { %p4695_p7 = pnand %p4694_p6, %p4688_p3 }
  0x12   :  { %4698 = shalt.err (!%p4695_p7)
}
  0x13   :  { %s4864_s11 = smov 896   ;;  %s4865_s12 = smov 56  }
  0x14   :  { %38 = dma.hbm_to_vmem [thread:$0]  %s5159_s1, 28672, %s33_s25, [#allocation6], %s4864_s11, %s4864_s11, %s4865_s12  }
  0x15   :  { %s4866_s15 = smov [#allocation8]   ;;  %s4867_s17 = smov [#allocation11]  }
  0x16   :  { %s54_s16 = sshll.u32 %s4866_s15, 4  ;;  %s76_s18 = sshll.u32 %s4867_s17, 4  ;;  %s55_s16 = int_to_ptr.vmem [resolvable:$true] %s54_s16  ;;  %s77_s18 = int_to_ptr.vmem [resolvable:$true] %s76_s18 }
  0x17   :  { %s4699_s21 = scalar_lea.hbm %s5161_s3, 100352 }
  0x18   :  { %p4700_p8 = scmp.ne.s32.totalorder %s5161_s3, %s4699_s21  ;;  %p4703_p9 = scmp.lt.u32.totalorder %s4699_s21, %s5161_s3 }
  0x1a   :  { %p4705_p10 = pnand %p4703_p9, %p4700_p8 }
  0x1c   :  { %4708 = shalt.err (!%p4705_p10)
}
  0x1d   :  { %s4709_s1 = scalar_lea.vmem %s55_s16, 100352  ;;  %p4714_p12 = scmp.lt.s32.totalorder %s55_s16, %s55_s16 }
  0x1e   :  { %p4710_p11 = scmp.ne.s32.totalorder %s55_s16, %s4709_s1  ;;  %p4715_p13 = scmp.lt.s32.totalorder %s4709_s1, %s4709_s1 }
  0x20   :  { %p4716_p0 = por %p4715_p13, %p4714_p12 }
  0x22   :  { %p4717_p1 = pnand %p4716_p0, %p4710_p11 }
  0x24   :  { %4720 = shalt.err (!%p4717_p1)
}
  0x25   :  { %60 = dma.hbm_to_vmem [thread:$0]  %s5161_s3, 100352, %s55_s16, [#allocation9], %s4864_s11, %s4864_s11, %s4865_s12  }
  0x26   :  { %s4721_s30 = scalar_lea.hbm %s5163_s5, 28672 }
  0x27   :  { %p4722_p2 = scmp.ne.s32.totalorder %s5163_s5, %s4721_s30  ;;  %p4725_p3 = scmp.lt.u32.totalorder %s4721_s30, %s5163_s5 }
  0x29   :  { %p4727_p4 = pnand %p4725_p3, %p4722_p2 }
  0x2b   :  { %4730 = shalt.err (!%p4727_p4)
}
  0x2c   :  { %s4731_s14 = scalar_lea.vmem %s77_s18, 28672  ;;  %p4736_p6 = scmp.lt.s32.totalorder %s77_s18, %s77_s18 }
  0x2d   :  { %p4732_p5 = scmp.ne.s32.totalorder %s77_s18, %s4731_s14  ;;  %p4737_p7 = scmp.lt.s32.totalorder %s4731_s14, %s4731_s14 }
  0x2f   :  { %p4738_p8 = por %p4737_p7, %p4736_p6 }
  0x31   :  { %p4739_p9 = pnand %p4738_p8, %p4732_p5 }
  0x33   :  { %4742 = shalt.err (!%p4739_p9)
}
  0x34   :  { %s4868_s3 = smov 256   ;;  %s4869_s11 = smov 16  }
  0x35   :  { %82 = dma.hbm_to_vmem [thread:$0]  %s5163_s5, 28672, %s77_s18, [#allocation12], %s4868_s3, %s4868_s3, %s4869_s11  }
  0x36   :  { %s4870_s16 = smov [#allocation2]   ;;  %s4871_s19 = smov [#allocation7]  }
  0x37   :  { %s23_s17 = sshll.u32 %s4870_s16, 4  ;;  %s45_s20 = sshll.u32 %s4871_s19, 4  ;;  %s24_s17 = int_to_ptr.vmem [resolvable:$true] %s23_s17  ;;  %s46_s20 = int_to_ptr.vmem [resolvable:$true] %s45_s20 }
  0x38   :  { %s4743_s23 = scalar_lea.hbm %s5158_s0, 256 }
  0x39   :  { %p4744_p10 = scmp.ne.s32.totalorder %s5158_s0, %s4743_s23  ;;  %p4747_p11 = scmp.lt.u32.totalorder %s4743_s23, %s5158_s0 }
  0x3b   :  { %p4749_p12 = pnand %p4747_p11, %p4744_p10 }
  0x3d   :  { %4752 = shalt.err (!%p4749_p12)
}
  0x3e   :  { %s4753_s5 = scalar_lea.vmem %s24_s17, 256  ;;  %p4758_p0 = scmp.lt.s32.totalorder %s24_s17, %s24_s17 }
  0x3f   :  { %p4754_p13 = scmp.ne.s32.totalorder %s24_s17, %s4753_s5  ;;  %p4759_p1 = scmp.lt.s32.totalorder %s4753_s5, %s4753_s5 }
  0x41   :  { %p4760_p2 = por %p4759_p1, %p4758_p0 }
  0x43   :  { %p4761_p3 = pnand %p4760_p2, %p4754_p13 }
  0x45   :  { %4764 = shalt.err (!%p4761_p3)
}
  0x46   :  { %26 = dma.hbm_to_vmem [thread:$0]  %s5158_s0, 256, %s24_s17, [#allocation3]  }
  0x47   :  { %s4765_s30 = scalar_lea.hbm %s5160_s2, 112 }
  0x48   :  { %p4766_p4 = scmp.ne.s32.totalorder %s5160_s2, %s4765_s30  ;;  %p4769_p5 = scmp.lt.u32.totalorder %s4765_s30, %s5160_s2 }
  0x4a   :  { %p4771_p6 = pnand %p4769_p5, %p4766_p4 }
  0x4c   :  { %4774 = shalt.err (!%p4771_p6)
}
  0x4d   :  { %s4775_s14 = scalar_lea.vmem %s46_s20, 112  ;;  %s4779_s3 = scalar_lea.vmem %s46_s20, 128 }
  0x4e   :  { %p4776_p7 = scmp.ne.s32.totalorder %s46_s20, %s4775_s14  ;;  %p4780_p8 = scmp.lt.s32.totalorder %s46_s20, %s46_s20 }
  0x4f   :  { %p4781_p9 = scmp.lt.s32.totalorder %s4779_s3, %s4775_s14 }
  0x51   :  { %p4782_p10 = por %p4781_p9, %p4780_p8 }
  0x53   :  { %p4783_p11 = pnand %p4782_p10, %p4776_p7 }
  0x55   :  { %4786 = shalt.err (!%p4783_p11)
}
  0x56   :  { %48 = dma.hbm_to_vmem [thread:$0]  %s5160_s2, 112, %s46_s20, [#allocation6]  }
  0x57   :  { %s4872_s12 = smov [#allocation10]   ;;  %s4873_s16 = smov [#allocation13]  }
  0x58   :  { %s67_s15 = sshll.u32 %s4872_s12, 4  ;;  %s89_s17 = sshll.u32 %s4873_s16, 4  ;;  %s68_s15 = int_to_ptr.vmem [resolvable:$true] %s67_s15  ;;  %s90_s17 = int_to_ptr.vmem [resolvable:$true] %s89_s17 }
  0x59   :  { %s4787_s22 = scalar_lea.hbm %s5162_s4, 112 }
  0x5a   :  { %p4788_p12 = scmp.ne.s32.totalorder %s5162_s4, %s4787_s22  ;;  %p4791_p13 = scmp.lt.u32.totalorder %s4787_s22, %s5162_s4 }
  0x5c   :  { %p4793_p0 = pnand %p4791_p13, %p4788_p12 }
  0x5e   :  { %4796 = shalt.err (!%p4793_p0)
}
  0x5f   :  { %s4797_s2 = scalar_lea.vmem %s68_s15, 112  ;;  %s4801_s20 = scalar_lea.vmem %s68_s15, 128 }
  0x60   :  { %p4798_p1 = scmp.ne.s32.totalorder %s68_s15, %s4797_s2  ;;  %p4802_p2 = scmp.lt.s32.totalorder %s68_s15, %s68_s15 }
  0x61   :  { %p4803_p3 = scmp.lt.s32.totalorder %s4801_s20, %s4797_s2 }
  0x63   :  { %p4804_p4 = por %p4803_p3, %p4802_p2 }
  0x65   :  { %p4805_p5 = pnand %p4804_p4, %p4798_p1 }
  0x67   :  { %4808 = shalt.err (!%p4805_p5)
}
  0x68   :  { %70 = dma.hbm_to_vmem [thread:$0]  %s5162_s4, 112, %s68_s15, [#allocation9]  }
  0x69   :  { %s4809_s28 = scalar_lea.hbm %s5164_s6, 32 }
  0x6a   :  { %p4810_p6 = scmp.ne.s32.totalorder %s5164_s6, %s4809_s28  ;;  %p4813_p7 = scmp.lt.u32.totalorder %s4809_s28, %s5164_s6 }
  0x6c   :  { %p4815_p8 = pnand %p4813_p7, %p4810_p6 }
  0x6e   :  { %4818 = shalt.err (!%p4815_p8)
}
  0x6f   :  { %s4819_s10 = scalar_lea.vmem %s90_s17, 32  ;;  %p4824_p10 = scmp.lt.s32.totalorder %s90_s17, %s90_s17 }
  0x70   :  { %p4820_p9 = scmp.ne.s32.totalorder %s90_s17, %s4819_s10  ;;  %p4825_p11 = scmp.lt.s32.totalorder %s4819_s10, %s4819_s10 }
  0x72   :  { %p4826_p12 = por %p4825_p11, %p4824_p10 }
  0x74   :  { %p4827_p13 = pnand %p4826_p12, %p4820_p9 }
  0x76   :  { %4830 = shalt.err (!%p4827_p13)
}
  0x77   :  { %92 = dma.hbm_to_vmem [thread:$0]  %s5164_s6, 32, %s90_s17, [#allocation12]  }
  0x78   :  { %4853 = dma.done.wait [#allocation3], 256  }
  0x79   :  { %4854 = vsyncadd [#allocation3], 4294967040 }
  0x7a   :  { %4855 = dma.done.wait [#allocation6], 28784  }
  0x7b   :  { %4856 = vsyncadd [#allocation6], 4294938512 }
  0x7c   :  { %4857 = dma.done.wait [#allocation9], 100464  }
  0x7d   :  { %4858 = vsyncadd [#allocation9], 4294866832 }
  0x7e   :  { %4859 = dma.done.wait [#allocation12], 28704  }
  0x7f   :  { %4860 = vsyncadd [#allocation12], 4294938592  ;;  %v117_v0 = vld [vmem:[#allocation5 + $0x8] sm:$0xff]  ;;  %v124_v1 = vld [vmem:[#allocation5 + $0x40] sm:$0xff]  ;;  %vm4876_vm0 = vmmov 0   ;;  %s4877_s6 = smov [#allocation14]  }
  0x80   :  { %v116_v2 = vld [vmem:[#allocation5] sm:$0xff]  ;;  %v3361_v3 = vpack.c.bf16 %v124_v1, %v117_v0  ;;  %v123_v4 = vld [vmem:[#allocation5 + $0x38] sm:$0xff]  ;;  %v138_v6 = vld [vmem:[#allocation5 + $0xb0] sm:$0xff]  ;;  %s3157_s14 = sshll.u32 %s4877_s6, 4  ;;  %s3158_s14 = int_to_ptr.vmem [resolvable:$true] %s3157_s14 }
  0x81   :  { %v131_v5 = vld [vmem:[#allocation5 + $0x78] sm:$0xff]  ;;  %v3363_v7 = vpack.c.bf16 %v123_v4, %v116_v2  ;;  %v130_v9 = vld [vmem:[#allocation5 + $0x70] sm:$0xff]  ;;  %v137_v10 = vld [vmem:[#allocation5 + $0xa8] sm:$0xff]  ;;  %s4831_s3 = scalar_lea.vmem %s3158_s14, 256  ;;  %p4836_p1 = scmp.lt.s32.totalorder %s3158_s14, %s3158_s14 }
  0x82   :  { %v3365_v8 = vpack.c.bf16 %v138_v6, %v131_v5  ;;  %v145_v11 = vld [vmem:[#allocation5 + $0xe8] sm:$0xff]  ;;  %3362 = vmatprep.subr.bf16.mxu1 %v3361_v3  ;;  %v152_v12 = vld [vmem:[#allocation5 + $0x120] sm:$0xff]  ;;  %v3367_v13 = vpack.c.bf16 %v137_v10, %v130_v9  ;;  %v151_v16 = vld [vmem:[#allocation5 + $0x118] sm:$0xff]  ;;  %p4832_p0 = scmp.ne.s32.totalorder %s3158_s14, %s4831_s3  ;;  %p4837_p2 = scmp.lt.s32.totalorder %s4831_s3, %s4831_s3 }
  0x83   :  { %3364 = vmatpush1.bf16.msra.mxu1 %v3363_v7  ;;  %v3369_v14 = vpack.c.bf16 %v152_v12, %v145_v11  ;;  %v144_v15 = vld [vmem:[#allocation5 + $0xe0] sm:$0xff]  ;;  %v159_v17 = vld [vmem:[#allocation5 + $0x158] sm:$0xff]  ;;  %v166_v18 = vld [vmem:[#allocation5 + $0x190] sm:$0xff] }
  0x84   :  { %3366 = vmatprep.subr.bf16.mxu1 %v3365_v8  ;;  %v3371_v19 = vpack.c.bf16 %v151_v16, %v144_v15  ;;  %v3373_v20 = vpack.c.bf16 %v166_v18, %v159_v17  ;;  %v158_v21 = vld [vmem:[#allocation5 + $0x150] sm:$0xff]  ;;  %v165_v22 = vld [vmem:[#allocation5 + $0x188] sm:$0xff]  ;;  %v180_v24 = vld [vmem:[#allocation5 + $0x200] sm:$0xff]  ;;  %p4838_p3 = por %p4837_p2, %p4836_p1 }
  0x85   :  { %v173_v23 = vld [vmem:[#allocation5 + $0x1c8] sm:$0xff]  ;;  %v3375_v25 = vpack.c.bf16 %v165_v22, %v158_v21  ;;  %v172_v27 = vld [vmem:[#allocation5 + $0x1c0] sm:$0xff]  ;;  %v179_v28 = vld [vmem:[#allocation5 + $0x1f8] sm:$0xff] }
  0x86   :  { %v3377_v26 = vpack.c.bf16 %v180_v24, %v173_v23  ;;  %v187_v29 = vld [vmem:[#allocation5 + $0x238] sm:$0xff]  ;;  %v194_v30 = vld [vmem:[#allocation5 + $0x270] sm:$0xff]  ;;  %v3379_v31 = vpack.c.bf16 %v179_v28, %v172_v27  ;;  %v193_v34 = vld [vmem:[#allocation5 + $0x268] sm:$0xff]  ;;  %p4839_p4 = pnand %p4838_p3, %p4832_p0 }
  0x87   :  { %3368 = vmatpush1.bf16.msra.mxu1 %v3367_v13  ;;  %v3381_v32 = vpack.c.bf16 %v194_v30, %v187_v29  ;;  %v186_v33 = vld [vmem:[#allocation5 + $0x230] sm:$0xff]  ;;  %v201_v35 = vld [vmem:[#allocation5 + $0x2a8] sm:$0xff]  ;;  %v208_v36 = vld [vmem:[#allocation5 + $0x2e0] sm:$0xff] }
  0x88   :  { %3370 = vmatprep.subr.bf16.mxu1 %v3369_v14  ;;  %v3383_v37 = vpack.c.bf16 %v193_v34, %v186_v33  ;;  %v3385_v38 = vpack.c.bf16 %v208_v36, %v201_v35  ;;  %v200_v39 = vld [vmem:[#allocation5 + $0x2a0] sm:$0xff]  ;;  %v207_v40 = vld [vmem:[#allocation5 + $0x2d8] sm:$0xff]  ;;  %v222_v43 = vld [vmem:[#allocation5 + $0x350] sm:$0xff] }
  0x89   :  { %v5002_v41 = vld [vmem:[#allocation2 + $0x8] sm:$0xff]  ;;  %v3387_v44 = vpack.c.bf16 %v207_v40, %v200_v39  ;;  %v214_v46 = vld [vmem:[#allocation5 + $0x310] sm:$0xff]  ;;  %v221_v47 = vld [vmem:[#allocation5 + $0x348] sm:$0xff] }
  0x8a   :  { %v215_v42 = vld [vmem:[#allocation5 + $0x318] sm:$0xff]  ;;  %441 = vmatprep.mubr.f32.mxu1 %v5002_v41  ;;  %583 = vmatprep.mubr.f32.mxu0 %v5002_v41  ;;  %v229_v48 = vld [vmem:[#allocation5 + $0x388] sm:$0xff]  ;;  %v236_v49 = vld [vmem:[#allocation5 + $0x3c0] sm:$0xff]  ;;  %v3391_v50 = vpack.c.bf16 %v221_v47, %v214_v46 }
  0x8b   :  { %3372 = vmatpush1.bf16.msra.mxu1 %v3371_v19  ;;  %v3389_v45 = vpack.c.bf16 %v222_v43, %v215_v42  ;;  %v3393_v51 = vpack.c.bf16 %v236_v49, %v229_v48  ;;  %v228_v52 = vld [vmem:[#allocation5 + $0x380] sm:$0xff]  ;;  %v235_v53 = vld [vmem:[#allocation5 + $0x3b8] sm:$0xff]  ;;  %v250_v55 = vld [vmem:[#allocation5 + $0x430] sm:$0xff] }
  0x8c   :  { %3374 = vmatprep.subr.bf16.mxu1 %v3373_v20  ;;  %v243_v54 = vld [vmem:[#allocation5 + $0x3f8] sm:$0xff]  ;;  %v3395_v56 = vpack.c.bf16 %v235_v53, %v228_v52  ;;  %v242_v58 = vld [vmem:[#allocation5 + $0x3f0] sm:$0xff]  ;;  %v249_v59 = vld [vmem:[#allocation5 + $0x428] sm:$0xff] }
  0x8d   :  { %v3397_v57 = vpack.c.bf16 %v250_v55, %v243_v54  ;;  %v257_v60 = vld [vmem:[#allocation5 + $0x468] sm:$0xff]  ;;  %v264_v61 = vld [vmem:[#allocation5 + $0x4a0] sm:$0xff]  ;;  %v3399_v62 = vpack.c.bf16 %v249_v59, %v242_v58  ;;  %v263_v1 = vld [vmem:[#allocation5 + $0x498] sm:$0xff] }
  0x8e   :  { %v3401_v63 = vpack.c.bf16 %v264_v61, %v257_v60  ;;  %v256_v0 = vld [vmem:[#allocation5 + $0x460] sm:$0xff]  ;;  %v271_v2 = vld [vmem:[#allocation5 + $0x4d8] sm:$0xff]  ;;  %v278_v3 = vld [vmem:[#allocation5 + $0x510] sm:$0xff] }
  0x8f   :  { %3376 = vmatpush1.bf16.msra.mxu1 %v3375_v25  ;;  %v3403_v4 = vpack.c.bf16 %v263_v1, %v256_v0  ;;  %v3405_v5 = vpack.c.bf16 %v278_v3, %v271_v2  ;;  %v270_v6 = vld [vmem:[#allocation5 + $0x4d0] sm:$0xff]  ;;  %v277_v7 = vld [vmem:[#allocation5 + $0x508] sm:$0xff]  ;;  %v292_v9 = vld [vmem:[#allocation5 + $0x580] sm:$0xff] }
  0x90   :  { %3378 = vmatprep.subr.bf16.mxu1 %v3377_v26  ;;  %v285_v8 = vld [vmem:[#allocation5 + $0x548] sm:$0xff]  ;;  %v284_v10 = vld [vmem:[#allocation5 + $0x540] sm:$0xff]  ;;  %v291_v11 = vld [vmem:[#allocation5 + $0x578] sm:$0xff]  ;;  %v3407_v14 = vpack.c.bf16 %v277_v7, %v270_v6 }
  0x91   :  { %v121_v12 = vld [vmem:[#allocation5 + $0x28] sm:$0xff]  ;;  %v128_v13 = vld [vmem:[#allocation5 + $0x60] sm:$0xff]  ;;  %v299_v15 = vld [vmem:[#allocation5 + $0x5b8] sm:$0xff]  ;;  %v3409_v20 = vpack.c.bf16 %v292_v9, %v285_v8  ;;  %v3411_v30 = vpack.c.bf16 %v291_v11, %v284_v10 }
  0x92   :  { %v3489_v16 = vpack.c.bf16 %v128_v13, %v121_v12  ;;  %v120_v17 = vld [vmem:[#allocation5 + $0x20] sm:$0xff]  ;;  %v127_v18 = vld [vmem:[#allocation5 + $0x58] sm:$0xff]  ;;  %v142_v22 = vld [vmem:[#allocation5 + $0xd0] sm:$0xff] }
  0x93   :  { %3380 = vmatpush1.bf16.msra.mxu1 %v3379_v31  ;;  %v135_v19 = vld [vmem:[#allocation5 + $0x98] sm:$0xff]  ;;  %v3491_v21 = vpack.c.bf16 %v127_v18, %v120_v17  ;;  %v134_v23 = vld [vmem:[#allocation5 + $0x90] sm:$0xff]  ;;  %v141_v24 = vld [vmem:[#allocation5 + $0xc8] sm:$0xff] }
  0x94   :  { %3382 = vmatprep.subr.bf16.mxu1 %v3381_v32  ;;  %v306_v25 = vld [vmem:[#allocation5 + $0x5f0] sm:$0xff]  ;;  %3490 = vmatprep.subr.bf16.mxu0 %v3489_v16  ;;  %v3493_v26 = vpack.c.bf16 %v142_v22, %v135_v19  ;;  %v149_v27 = vld [vmem:[#allocation5 + $0x108] sm:$0xff]  ;;  %v156_v28 = vld [vmem:[#allocation5 + $0x140] sm:$0xff]  ;;  %v3495_v29 = vpack.c.bf16 %v141_v24, %v134_v23 }
  0x95   :  { %3492 = vmatpush1.bf16.msra.mxu0 %v3491_v21  ;;  %v298_v31 = vld [vmem:[#allocation5 + $0x5b0] sm:$0xff]  ;;  %v3497_v32 = vpack.c.bf16 %v156_v28, %v149_v27  ;;  %v148_v33 = vld [vmem:[#allocation5 + $0x100] sm:$0xff]  ;;  %v155_v34 = vld [vmem:[#allocation5 + $0x138] sm:$0xff]  ;;  %v3413_v35 = vpack.c.bf16 %v306_v25, %v299_v15 }
  0x96   :  { %3494 = vmatprep.subr.bf16.mxu0 %v3493_v26  ;;  %v305_v36 = vld [vmem:[#allocation5 + $0x5e8] sm:$0xff]  ;;  %v320_v40 = vld [vmem:[#allocation5 + $0x660] sm:$0xff]  ;;  %v3499_v42 = vpack.c.bf16 %v155_v34, %v148_v33  ;;  %v162_v46 = vld [vmem:[#allocation5 + $0x170] sm:$0xff] }
  0x97   :  { %3384 = vmatpush1.bf16.msra.mxu1 %v3383_v37  ;;  %v163_v37 = vld [vmem:[#allocation5 + $0x178] sm:$0xff]  ;;  %v313_v39 = vld [vmem:[#allocation5 + $0x628] sm:$0xff]  ;;  %v3415_v43 = vpack.c.bf16 %v305_v36, %v298_v31  ;;  %v334_v53 = vld [vmem:[#allocation5 + $0x6d0] sm:$0xff] }
  0x98   :  { %3386 = vmatprep.subr.bf16.mxu1 %v3385_v38  ;;  %v170_v38 = vld [vmem:[#allocation5 + $0x1b0] sm:$0xff]  ;;  %v169_v47 = vld [vmem:[#allocation5 + $0x1a8] sm:$0xff]  ;;  %v3417_v48 = vpack.c.bf16 %v320_v40, %v313_v39  ;;  %v319_v49 = vld [vmem:[#allocation5 + $0x658] sm:$0xff] }
  0x99   :  { %3496 = vmatpush1.bf16.msra.mxu0 %v3495_v29  ;;  %v327_v52 = vld [vmem:[#allocation5 + $0x698] sm:$0xff]  ;;  %v3503_v54 = vpack.c.bf16 %v169_v47, %v162_v46  ;;  %v176_v58 = vld [vmem:[#allocation5 + $0x1e0] sm:$0xff]  ;;  %v333_v61 = vld [vmem:[#allocation5 + $0x6c8] sm:$0xff] }
  0x9a   :  { %3498 = vmatprep.subr.bf16.mxu0 %v3497_v32  ;;  %v183_v59 = vld [vmem:[#allocation5 + $0x218] sm:$0xff]  ;;  %v3421_v60 = vpack.c.bf16 %v334_v53, %v327_v52  ;;  %v126_v1 = vld [vmem:[#allocation5 + $0x50] sm:$0xff]  ;;  %v197_v6 = vld [vmem:[#allocation5 + $0x288] sm:$0xff] }
  0x9b   :  { %3388 = vmatpush1.bf16.msra.mxu1 %v3387_v44  ;;  %v312_v44 = vld [vmem:[#allocation5 + $0x620] sm:$0xff]  ;;  %v119_v0 = vld [vmem:[#allocation5 + $0x18] sm:$0xff]  ;;  %v3507_v2 = vpack.c.bf16 %v183_v59, %v176_v58  ;;  %v118_v8 = vld [vmem:[#allocation5 + $0x10] sm:$0xff] }
  0x9c   :  { %3390 = vmatprep.subr.bf16.mxu1 %v3389_v45  ;;  %v3501_v45 = vpack.c.bf16 %v170_v38, %v163_v37  ;;  %v3419_v55 = vpack.c.bf16 %v319_v49, %v312_v44  ;;  %v3425_v7 = vpack.c.bf16 %v126_v1, %v119_v0  ;;  %v125_v9 = vld [vmem:[#allocation5 + $0x48] sm:$0xff]  ;;  %v140_v11 = vld [vmem:[#allocation5 + $0xc0] sm:$0xff]  ;;  %v211_v19 = vld [vmem:[#allocation5 + $0x2f8] sm:$0xff] }
  0x9d   :  { %3500 = vmatpush1.bf16.msra.mxu0 %v3499_v42  ;;  %v133_v10 = vld [vmem:[#allocation5 + $0x88] sm:$0xff]  ;;  %v212_v13 = vld [vmem:[#allocation5 + $0x300] sm:$0xff]  ;;  %v3427_v16 = vpack.c.bf16 %v125_v9, %v118_v8  ;;  %v139_v21 = vld [vmem:[#allocation5 + $0xb8] sm:$0xff] }
  0x9e   :  { %3502 = vmatprep.subr.bf16.mxu0 %v3501_v45  ;;  %v205_v12 = vld [vmem:[#allocation5 + $0x2c8] sm:$0xff]  ;;  %v132_v17 = vld [vmem:[#allocation5 + $0x80] sm:$0xff]  ;;  %v219_v23 = vld [vmem:[#allocation5 + $0x338] sm:$0xff] }
  0x9f   :  { %3392 = vmatpush1.bf16.msra.mxu1 %v3391_v50  ;;  %v177_v50 = vld [vmem:[#allocation5 + $0x1e8] sm:$0xff]  ;;  %v204_v18 = vld [vmem:[#allocation5 + $0x2c0] sm:$0xff]  ;;  %v3513_v22 = vpack.c.bf16 %v212_v13, %v205_v12  ;;  %v226_v24 = vld [vmem:[#allocation5 + $0x370] sm:$0xff]  ;;  %v3431_v28 = vpack.c.bf16 %v139_v21, %v132_v17 }
  0xa0   :  { %3394 = vmatprep.subr.bf16.mxu1 %v3393_v51  ;;  %v184_v51 = vld [vmem:[#allocation5 + $0x220] sm:$0xff]  ;;  %v147_v25 = vld [vmem:[#allocation5 + $0xf8] sm:$0xff]  ;;  %v154_v26 = vld [vmem:[#allocation5 + $0x130] sm:$0xff]  ;;  %v3515_v27 = vpack.c.bf16 %v211_v19, %v204_v18 }
  0xa1   :  { %3504 = vmatpush1.bf16.msra.mxu0 %v3503_v54  ;;  %v146_v29 = vld [vmem:[#allocation5 + $0xf0] sm:$0xff]  ;;  %v225_v32 = vld [vmem:[#allocation5 + $0x368] sm:$0xff]  ;;  %v3433_v33 = vpack.c.bf16 %v154_v26, %v147_v25  ;;  %v240_v36 = vld [vmem:[#allocation5 + $0x3e0] sm:$0xff] }
  0xa2   :  { %v218_v31 = vld [vmem:[#allocation5 + $0x330] sm:$0xff]  ;;  %v153_v34 = vld [vmem:[#allocation5 + $0x128] sm:$0xff]  ;;  %v168_v38 = vld [vmem:[#allocation5 + $0x1a0] sm:$0xff] }
  0xa3   :  { %3396 = vmatpush1.bf16.msra.mxu1 %v3395_v56  ;;  %v326_v56 = vld [vmem:[#allocation5 + $0x690] sm:$0xff]  ;;  %v161_v37 = vld [vmem:[#allocation5 + $0x168] sm:$0xff]  ;;  %v3519_v39 = vpack.c.bf16 %v225_v32, %v218_v31  ;;  %v3435_v40 = vpack.c.bf16 %v153_v34, %v146_v29  ;;  %v160_v42 = vld [vmem:[#allocation5 + $0x160] sm:$0xff] }
  0xa4   :  { %3398 = vmatprep.subr.bf16.mxu1 %v3397_v57  ;;  %v3505_v57 = vpack.c.bf16 %v184_v51, %v177_v50  ;;  %v3423_v3 = vpack.c.bf16 %v333_v61, %v326_v56  ;;  %v232_v44 = vld [vmem:[#allocation5 + $0x3a0] sm:$0xff]  ;;  %v239_v45 = vld [vmem:[#allocation5 + $0x3d8] sm:$0xff]  ;;  %v3437_v46 = vpack.c.bf16 %v168_v38, %v161_v37  ;;  %v254_v49 = vld [vmem:[#allocation5 + $0x450] sm:$0xff] }
  0xa5   :  { %v167_v47 = vld [vmem:[#allocation5 + $0x198] sm:$0xff]  ;;  %v182_v51 = vld [vmem:[#allocation5 + $0x210] sm:$0xff]  ;;  %v3523_v52 = vpack.c.bf16 %v239_v45, %v232_v44  ;;  %v181_v59 = vld [vmem:[#allocation5 + $0x208] sm:$0xff] }
  0xa6   :  { %3506 = vmatprep.subr.bf16.mxu0 %v3505_v57  ;;  %v175_v50 = vld [vmem:[#allocation5 + $0x1d8] sm:$0xff]  ;;  %v3439_v53 = vpack.c.bf16 %v167_v47, %v160_v42  ;;  %v174_v54 = vld [vmem:[#allocation5 + $0x1d0] sm:$0xff]  ;;  %v253_v57 = vld [vmem:[#allocation5 + $0x448] sm:$0xff] }
  0xa7   :  { %3400 = vmatpush1.bf16.msra.mxu1 %v3399_v62  ;;  %v191_v62 = vld [vmem:[#allocation5 + $0x258] sm:$0xff]  ;;  %3508 = vmatpush1.bf16.msra.mxu0 %v3507_v2  ;;  %v246_v56 = vld [vmem:[#allocation5 + $0x410] sm:$0xff]  ;;  %v3441_v58 = vpack.c.bf16 %v182_v51, %v175_v50  ;;  %v268_v61 = vld [vmem:[#allocation5 + $0x4c0] sm:$0xff]  ;;  %v3443_v1 = vpack.c.bf16 %v181_v59, %v174_v54 }
  0xa8   :  { %3402 = vmatprep.subr.bf16.mxu1 %v3401_v63  ;;  %v198_v63 = vld [vmem:[#allocation5 + $0x290] sm:$0xff]  ;;  %v3527_v0 = vpack.c.bf16 %v253_v57, %v246_v56  ;;  %v188_v2 = vld [vmem:[#allocation5 + $0x240] sm:$0xff]  ;;  %v275_v8 = vld [vmem:[#allocation5 + $0x4f8] sm:$0xff] }
  0xa9   :  { %v282_v9 = vld [vmem:[#allocation5 + $0x530] sm:$0xff]  ;;  %v281_v18 = vld [vmem:[#allocation5 + $0x528] sm:$0xff]  ;;  %v288_v29 = vld [vmem:[#allocation5 + $0x560] sm:$0xff] }
  0xaa   :  { %v274_v17 = vld [vmem:[#allocation5 + $0x4f0] sm:$0xff]  ;;  %v289_v21 = vld [vmem:[#allocation5 + $0x568] sm:$0xff]  ;;  %v223_v32 = vld [vmem:[#allocation5 + $0x358] sm:$0xff] }
  0xab   :  { %3404 = vmatpush1.bf16.msra.mxu1 %v3403_v4  ;;  %v3509_v4 = vpack.c.bf16 %v198_v63, %v191_v62  ;;  %v189_v62 = vld [vmem:[#allocation5 + $0x248] sm:$0xff]  ;;  %v196_v63 = vld [vmem:[#allocation5 + $0x280] sm:$0xff]  ;;  %v3535_v25 = vpack.c.bf16 %v281_v18, %v274_v17  ;;  %v310_v34 = vld [vmem:[#allocation5 + $0x610] sm:$0xff] }
  0xac   :  { %3406 = vmatprep.subr.bf16.mxu1 %v3405_v5  ;;  %v190_v5 = vld [vmem:[#allocation5 + $0x250] sm:$0xff]  ;;  %v237_v45 = vld [vmem:[#allocation5 + $0x3c8] sm:$0xff]  ;;  %v324_v47 = vld [vmem:[#allocation5 + $0x680] sm:$0xff] }
  0xad   :  { %v3511_v15 = vpack.c.bf16 %v197_v6, %v190_v5  ;;  %3510 = vmatprep.subr.bf16.mxu0 %v3509_v4  ;;  %v260_v4 = vld [vmem:[#allocation5 + $0x480] sm:$0xff]  ;;  %v267_v5 = vld [vmem:[#allocation5 + $0x4b8] sm:$0xff]  ;;  %v3445_v6 = vpack.c.bf16 %v196_v63, %v189_v62  ;;  %v302_v42 = vld [vmem:[#allocation5 + $0x5d0] sm:$0xff] }
  0xae   :  { %v3531_v12 = vpack.c.bf16 %v267_v5, %v260_v4  ;;  %v316_v54 = vld [vmem:[#allocation5 + $0x640] sm:$0xff]  ;;  %v251_v57 = vld [vmem:[#allocation5 + $0x438] sm:$0xff]  ;;  %v338_v59 = vld [vmem:[#allocation5 + $0x6f0] sm:$0xff] }
  0xaf   :  { %3408 = vmatpush1.bf16.msra.mxu1 %v3407_v14  ;;  %v5006_v14 = vld [vmem:[#allocation2] sm:$0xff]  ;;  %3512 = vmatpush1.bf16.msra.mxu0 %v3511_v15  ;;  %v265_v5 = vld [vmem:[#allocation5 + $0x4a8] sm:$0xff]  ;;  %v279_v18 = vld [vmem:[#allocation5 + $0x518] sm:$0xff] }
  0xb0   :  { %3410 = vmatprep.subr.bf16.mxu1 %v3409_v20  ;;  %v3429_v20 = vpack.c.bf16 %v140_v11, %v133_v10  ;;  %3514 = vmatprep.subr.bf16.mxu0 %v3513_v22  ;;  %v203_v10 = vld [vmem:[#allocation5 + $0x2b8] sm:$0xff]  ;;  %v210_v11 = vld [vmem:[#allocation5 + $0x2f0] sm:$0xff]  ;;  %v296_v22 = vld [vmem:[#allocation5 + $0x5a0] sm:$0xff] }
  0xb1   :  { %v202_v15 = vld [vmem:[#allocation5 + $0x2b0] sm:$0xff]  ;;  %v3449_v19 = vpack.c.bf16 %v210_v11, %v203_v10 }
  0xb3   :  { %3412 = vmatpush1.bf16.msra.mxu1 %v3411_v30  ;;  %v3517_v30 = vpack.c.bf16 %v226_v24, %v219_v23  ;;  %3516 = vmatpush1.bf16.msra.mxu0 %v3515_v27  ;;  %v217_v23 = vld [vmem:[#allocation5 + $0x328] sm:$0xff]  ;;  %v224_v24 = vld [vmem:[#allocation5 + $0x360] sm:$0xff] }
  0xb4   :  { %3414 = vmatprep.subr.bf16.mxu1 %v3413_v35  ;;  %v233_v35 = vld [vmem:[#allocation5 + $0x3a8] sm:$0xff]  ;;  %v216_v27 = vld [vmem:[#allocation5 + $0x320] sm:$0xff]  ;;  %v3453_v31 = vpack.c.bf16 %v224_v24, %v217_v23 }
  0xb5   :  { %3518 = vmatprep.subr.bf16.mxu0 %v3517_v30  ;;  %v295_v30 = vld [vmem:[#allocation5 + $0x598] sm:$0xff]  ;;  %v3455_v38 = vpack.c.bf16 %v223_v32, %v216_v27  ;;  %v683_v27 = vld [vmem:[#allocation8 + $0x80] sm:$0xff] }
  0xb6   :  { %v3539_v37 = vpack.c.bf16 %v295_v30, %v288_v29  ;;  %v293_v30 = vld [vmem:[#allocation5 + $0x588] sm:$0xff]  ;;  %v705_v32 = vld [vmem:[#allocation8 + $0x130] sm:$0xff] }
  0xb7   :  { %3416 = vmatpush1.bf16.msra.mxu1 %v3415_v43  ;;  %v3521_v43 = vpack.c.bf16 %v240_v36, %v233_v35  ;;  %3520 = vmatpush1.bf16.msra.mxu0 %v3519_v39  ;;  %v231_v35 = vld [vmem:[#allocation5 + $0x398] sm:$0xff]  ;;  %v238_v36 = vld [vmem:[#allocation5 + $0x3d0] sm:$0xff] }
  0xb8   :  { %3418 = vmatprep.subr.bf16.mxu1 %v3417_v48  ;;  %v247_v48 = vld [vmem:[#allocation5 + $0x418] sm:$0xff]  ;;  %v230_v39 = vld [vmem:[#allocation5 + $0x390] sm:$0xff]  ;;  %v3457_v44 = vpack.c.bf16 %v238_v36, %v231_v35 }
  0xb9   :  { %3522 = vmatprep.subr.bf16.mxu0 %v3521_v43  ;;  %v309_v43 = vld [vmem:[#allocation5 + $0x608] sm:$0xff]  ;;  %v3459_v51 = vpack.c.bf16 %v237_v45, %v230_v39  ;;  %v697_v39 = vld [vmem:[#allocation8 + $0xf0] sm:$0xff] }
  0xba   :  { %v3543_v50 = vpack.c.bf16 %v309_v43, %v302_v42  ;;  %v307_v43 = vld [vmem:[#allocation5 + $0x5f8] sm:$0xff]  ;;  %v719_v45 = vld [vmem:[#allocation8 + $0x1a0] sm:$0xff] }
  0xbb   :  { %3420 = vmatpush1.bf16.msra.mxu1 %v3419_v55  ;;  %v3525_v55 = vpack.c.bf16 %v254_v49, %v247_v48  ;;  %3524 = vmatpush1.bf16.msra.mxu0 %v3523_v52  ;;  %v245_v48 = vld [vmem:[#allocation5 + $0x408] sm:$0xff]  ;;  %v252_v49 = vld [vmem:[#allocation5 + $0x440] sm:$0xff] }
  0xbc   :  { %3422 = vmatprep.subr.bf16.mxu1 %v3421_v60  ;;  %v261_v60 = vld [vmem:[#allocation5 + $0x488] sm:$0xff]  ;;  %v244_v52 = vld [vmem:[#allocation5 + $0x400] sm:$0xff]  ;;  %v3461_v56 = vpack.c.bf16 %v252_v49, %v245_v48 }
  0xbd   :  { %3526 = vmatprep.subr.bf16.mxu0 %v3525_v55  ;;  %v323_v55 = vld [vmem:[#allocation5 + $0x678] sm:$0xff]  ;;  %v3463_v63 = vpack.c.bf16 %v251_v57, %v244_v52  ;;  %v711_v52 = vld [vmem:[#allocation8 + $0x160] sm:$0xff] }
  0xbe   :  { %v3547_v62 = vpack.c.bf16 %v323_v55, %v316_v54  ;;  %v321_v55 = vld [vmem:[#allocation5 + $0x668] sm:$0xff]  ;;  %v733_v57 = vld [vmem:[#allocation8 + $0x210] sm:$0xff] }
  0xbf   :  { %3424 = vmatpush1.bf16.msra.mxu1 %v3423_v3  ;;  %v3529_v3 = vpack.c.bf16 %v268_v61, %v261_v60  ;;  %3528 = vmatpush1.bf16.msra.mxu0 %v3527_v0  ;;  %v259_v60 = vld [vmem:[#allocation5 + $0x478] sm:$0xff]  ;;  %v266_v61 = vld [vmem:[#allocation5 + $0x4b0] sm:$0xff] }
  0xc0   :  { %3426 = vmatprep.subr.bf16.mxu1 %v3425_v7  ;;  %v195_v7 = vld [vmem:[#allocation5 + $0x278] sm:$0xff]  ;;  %v258_v0 = vld [vmem:[#allocation5 + $0x470] sm:$0xff]  ;;  %v3465_v4 = vpack.c.bf16 %v266_v61, %v259_v60 }
  0xc1   :  { %v3447_v13 = vpack.c.bf16 %v195_v7, %v188_v2  ;;  %3530 = vmatprep.subr.bf16.mxu0 %v3529_v3  ;;  %v330_v2 = vld [vmem:[#allocation5 + $0x6b0] sm:$0xff]  ;;  %v337_v3 = vld [vmem:[#allocation5 + $0x6e8] sm:$0xff]  ;;  %v677_v7 = vld [vmem:[#allocation8 + $0x50] sm:$0xff]  ;;  %v3467_v11 = vpack.c.bf16 %v265_v5, %v258_v0 }
  0xc2   :  { %442 = vmatmul.mubr.f32.vlgmr.msra.gmra.mrb[0].mxu1 %v5006_v14  ;;  %v3551_v10 = vpack.c.bf16 %v337_v3, %v330_v2  ;;  %v725_v0 = vld [vmem:[#allocation8 + $0x1d0] sm:$0xff]  ;;  %v747_v5 = vld [vmem:[#allocation8 + $0x280] sm:$0xff] }
  0xc3   :  { %3428 = vmatpush1.bf16.msra.mxu1 %v3427_v16  ;;  %512 = vmatprep.mubr.f32.mxu1 %v5002_v41  ;;  %v3533_v16 = vpack.c.bf16 %v282_v9, %v275_v8  ;;  %v273_v8 = vld [vmem:[#allocation5 + $0x4e8] sm:$0xff]  ;;  %v280_v9 = vld [vmem:[#allocation5 + $0x520] sm:$0xff]  ;;  %v335_v3 = vld [vmem:[#allocation5 + $0x6d8] sm:$0xff] }
  0xc4   :  { %3430 = vmatprep.subr.bf16.mxu1 %v3429_v20  ;;  %v209_v20 = vld [vmem:[#allocation5 + $0x2e8] sm:$0xff]  ;;  %3532 = vmatpush1.bf16.msra.mxu0 %v3531_v12  ;;  %v272_v12 = vld [vmem:[#allocation5 + $0x4e0] sm:$0xff]  ;;  %v3469_v17 = vpack.c.bf16 %v280_v9, %v273_v8 }
  0xc5   :  { %v3451_v26 = vpack.c.bf16 %v209_v20, %v202_v15  ;;  %3534 = vmatprep.subr.bf16.mxu0 %v3533_v16  ;;  %v669_v15 = vld [vmem:[#allocation8 + $0x10] sm:$0xff]  ;;  %v676_v16 = vld [vmem:[#allocation8 + $0x48] sm:$0xff]  ;;  %v691_v20 = vld [vmem:[#allocation8 + $0xc0] sm:$0xff]  ;;  %v3471_v24 = vpack.c.bf16 %v279_v18, %v272_v12 }
  0xc6   :  { %v3811_v23 = vpack.c.bf16 %v676_v16, %v669_v15  ;;  %v746_v12 = vld [vmem:[#allocation8 + $0x278] sm:$0xff]  ;;  %v122_v15 = vld [vmem:[#allocation5 + $0x30] sm:$0xff]  ;;  %v129_v16 = vld [vmem:[#allocation5 + $0x68] sm:$0xff] }
  0xc7   :  { %3432 = vmatpush1.bf16.msra.mxu1 %v3431_v28  ;;  %v3537_v28 = vpack.c.bf16 %v296_v22, %v289_v21  ;;  %v287_v21 = vld [vmem:[#allocation5 + $0x558] sm:$0xff]  ;;  %v294_v22 = vld [vmem:[#allocation5 + $0x590] sm:$0xff] }
  0xc8   :  { %3434 = vmatprep.subr.bf16.mxu1 %v3433_v33  ;;  %v303_v33 = vld [vmem:[#allocation5 + $0x5d8] sm:$0xff]  ;;  %3536 = vmatpush1.bf16.msra.mxu0 %v3535_v25  ;;  %v286_v25 = vld [vmem:[#allocation5 + $0x550] sm:$0xff]  ;;  %v3473_v29 = vpack.c.bf16 %v294_v22, %v287_v21  ;;  %v3555_v22 = vpack.c.bf16 %v129_v16, %v122_v15  ;;  %v831_v15 = vld [vmem:[#allocation8 + $0x520] sm:$0xff] }
  0xc9   :  { %3538 = vmatprep.subr.bf16.mxu0 %v3537_v28  ;;  %v690_v28 = vld [vmem:[#allocation8 + $0xb8] sm:$0xff]  ;;  %v3475_v36 = vpack.c.bf16 %v293_v30, %v286_v25  ;;  %v255_v18 = vld [vmem:[#allocation5 + $0x458] sm:$0xff]  ;;  %v760_v25 = vld [vmem:[#allocation8 + $0x2e8] sm:$0xff] }
  0xca   :  { %v3815_v35 = vpack.c.bf16 %v690_v28, %v683_v27  ;;  %v143_v27 = vld [vmem:[#allocation5 + $0xd8] sm:$0xff]  ;;  %v775_v30 = vld [vmem:[#allocation8 + $0x360] sm:$0xff]  ;;  %v318_v16 = vld [vmem:[#allocation5 + $0x650] sm:$0xff] }
  0xcb   :  { %3436 = vmatpush1.bf16.msra.mxu1 %v3435_v40  ;;  %v3541_v40 = vpack.c.bf16 %v310_v34, %v303_v33  ;;  %v301_v33 = vld [vmem:[#allocation5 + $0x5c8] sm:$0xff]  ;;  %v308_v34 = vld [vmem:[#allocation5 + $0x600] sm:$0xff] }
  0xcc   :  { %3438 = vmatprep.subr.bf16.mxu1 %v3437_v46  ;;  %v317_v46 = vld [vmem:[#allocation5 + $0x648] sm:$0xff]  ;;  %3540 = vmatpush1.bf16.msra.mxu0 %v3539_v37  ;;  %v300_v37 = vld [vmem:[#allocation5 + $0x5c0] sm:$0xff]  ;;  %v3477_v42 = vpack.c.bf16 %v308_v34, %v301_v33 }
  0xcd   :  { %3542 = vmatprep.subr.bf16.mxu0 %v3541_v40  ;;  %v704_v40 = vld [vmem:[#allocation8 + $0x128] sm:$0xff]  ;;  %v3479_v49 = vpack.c.bf16 %v307_v43, %v300_v37  ;;  %v767_v37 = vld [vmem:[#allocation8 + $0x320] sm:$0xff]  ;;  %v789_v43 = vld [vmem:[#allocation8 + $0x3d0] sm:$0xff] }
  0xce   :  { %v3819_v48 = vpack.c.bf16 %v704_v40, %v697_v39  ;;  %v157_v40 = vld [vmem:[#allocation5 + $0x148] sm:$0xff] }
  0xcf   :  { %3440 = vmatpush1.bf16.msra.mxu1 %v3439_v53  ;;  %v3545_v53 = vpack.c.bf16 %v324_v47, %v317_v46  ;;  %v315_v46 = vld [vmem:[#allocation5 + $0x638] sm:$0xff]  ;;  %v322_v47 = vld [vmem:[#allocation5 + $0x670] sm:$0xff] }
  0xd0   :  { %3442 = vmatprep.subr.bf16.mxu1 %v3441_v58  ;;  %v331_v58 = vld [vmem:[#allocation5 + $0x6b8] sm:$0xff]  ;;  %3544 = vmatpush1.bf16.msra.mxu0 %v3543_v50  ;;  %v314_v50 = vld [vmem:[#allocation5 + $0x630] sm:$0xff]  ;;  %v3481_v54 = vpack.c.bf16 %v322_v47, %v315_v46 }
  0xd1   :  { %3546 = vmatprep.subr.bf16.mxu0 %v3545_v53  ;;  %v718_v53 = vld [vmem:[#allocation8 + $0x198] sm:$0xff]  ;;  %v3483_v61 = vpack.c.bf16 %v321_v55, %v314_v50  ;;  %v781_v50 = vld [vmem:[#allocation8 + $0x390] sm:$0xff]  ;;  %v290_v55 = vld [vmem:[#allocation5 + $0x570] sm:$0xff] }
  0xd2   :  { %v3823_v60 = vpack.c.bf16 %v718_v53, %v711_v52  ;;  %v171_v52 = vld [vmem:[#allocation5 + $0x1b8] sm:$0xff]  ;;  %v796_v53 = vld [vmem:[#allocation8 + $0x408] sm:$0xff] }
  0xd3   :  { %3444 = vmatpush1.bf16.msra.mxu1 %v3443_v1  ;;  %v3549_v1 = vpack.c.bf16 %v338_v59, %v331_v58  ;;  %v329_v58 = vld [vmem:[#allocation5 + $0x6a8] sm:$0xff]  ;;  %v336_v59 = vld [vmem:[#allocation5 + $0x6e0] sm:$0xff] }
  0xd4   :  { %3446 = vmatprep.subr.bf16.mxu1 %v3445_v6  ;;  %v670_v6 = vld [vmem:[#allocation8 + $0x18] sm:$0xff]  ;;  %3548 = vmatpush1.bf16.msra.mxu0 %v3547_v62  ;;  %v3485_v2 = vpack.c.bf16 %v336_v59, %v329_v58  ;;  %v178_v59 = vld [vmem:[#allocation5 + $0x1f0] sm:$0xff] }
  0xd5   :  { %3550 = vmatprep.subr.bf16.mxu0 %v3549_v1  ;;  %v328_v62 = vld [vmem:[#allocation5 + $0x6a0] sm:$0xff]  ;;  %v732_v1 = vld [vmem:[#allocation8 + $0x208] sm:$0xff] }
  0xd6   :  { %v3827_v8 = vpack.c.bf16 %v732_v1, %v725_v0  ;;  %v3487_v9 = vpack.c.bf16 %v335_v3, %v328_v62  ;;  %v802_v62 = vld [vmem:[#allocation8 + $0x438] sm:$0xff]  ;;  %v185_v0 = vld [vmem:[#allocation5 + $0x228] sm:$0xff] }
  0xd7   :  { %3448 = vmatpush1.bf16.msra.mxu1 %v3447_v13  ;;  %v3809_v13 = vpack.c.bf16 %v677_v7, %v670_v6  ;;  %v234_v6 = vld [vmem:[#allocation5 + $0x3b0] sm:$0xff]  ;;  %v241_v7 = vld [vmem:[#allocation5 + $0x3e8] sm:$0xff]  ;;  %v810_v1 = vld [vmem:[#allocation8 + $0x478] sm:$0xff] }
  0xd8   :  { %3450 = vmatprep.subr.bf16.mxu1 %v3449_v19  ;;  %v684_v19 = vld [vmem:[#allocation8 + $0x88] sm:$0xff]  ;;  %3552 = vmatpush1.bf16.msra.mxu0 %v3551_v10  ;;  %v304_v3 = vld [vmem:[#allocation5 + $0x5e0] sm:$0xff] }
  0xd9   :  { %3810 = vmatprep.subr.bf16.mxu0 %v3809_v13  ;;  %v3553_v13 = vpack.c.bf16 %v241_v7, %v234_v6  ;;  %v3571_v6 = vpack.c.bf16 %v185_v0, %v178_v59  ;;  %v192_v7 = vld [vmem:[#allocation5 + $0x260] sm:$0xff]  ;;  %v872_v59 = vld [vmem:[#allocation8 + $0x668] sm:$0xff] }
  0xda   :  { %v696_v0 = vld [vmem:[#allocation8 + $0xe8] sm:$0xff] }
  0xdb   :  { %3452 = vmatpush1.bf16.msra.mxu1 %v3451_v26  ;;  %v3813_v26 = vpack.c.bf16 %v691_v20, %v684_v19  ;;  %584 = vmatmul.mubr.f32.vlgmr.msra.gmra.mrb[0].mxu0 %v5006_v14  ;;  %v754_v19 = vld [vmem:[#allocation8 + $0x2b8] sm:$0xff]  ;;  %v761_v20 = vld [vmem:[#allocation8 + $0x2f0] sm:$0xff] }
  0xdc   :  { %3454 = vmatprep.subr.bf16.mxu1 %v3453_v31  ;;  %v698_v31 = vld [vmem:[#allocation8 + $0xf8] sm:$0xff]  ;;  %3812 = vmatpush1.bf16.msra.mxu0 %v3811_v23  ;;  %v3833_v28 = vpack.c.bf16 %v761_v20, %v754_v19  ;;  %v206_v20 = vld [vmem:[#allocation5 + $0x2d0] sm:$0xff] }
  0xdd   :  { %3814 = vmatprep.subr.bf16.mxu0 %v3813_v26  ;;  %v136_v23 = vld [vmem:[#allocation5 + $0xa0] sm:$0xff] }
  0xde   :  { %v3559_v34 = vpack.c.bf16 %v143_v27, %v136_v23  ;;  %v830_v23 = vld [vmem:[#allocation8 + $0x518] sm:$0xff]  ;;  %v845_v27 = vld [vmem:[#allocation8 + $0x590] sm:$0xff] }
  0xdf   :  { %3456 = vmatpush1.bf16.msra.mxu1 %v3455_v38  ;;  %v3817_v38 = vpack.c.bf16 %v705_v32, %v698_v31  ;;  %v262_v31 = vld [vmem:[#allocation5 + $0x490] sm:$0xff]  ;;  %v269_v32 = vld [vmem:[#allocation5 + $0x4c8] sm:$0xff] }
  0xe0   :  { %3458 = vmatprep.subr.bf16.mxu1 %v3457_v44  ;;  %v712_v44 = vld [vmem:[#allocation8 + $0x168] sm:$0xff]  ;;  %3816 = vmatpush1.bf16.msra.mxu0 %v3815_v35  ;;  %v3561_v39 = vpack.c.bf16 %v269_v32, %v262_v31  ;;  %v220_v32 = vld [vmem:[#allocation5 + $0x340] sm:$0xff] }
  0xe1   :  { %3818 = vmatprep.subr.bf16.mxu0 %v3817_v38  ;;  %v150_v35 = vld [vmem:[#allocation5 + $0x110] sm:$0xff]  ;;  %v774_v38 = vld [vmem:[#allocation8 + $0x358] sm:$0xff] }
  0xe2   :  { %v3839_v46 = vpack.c.bf16 %v774_v38, %v767_v37  ;;  %v3563_v47 = vpack.c.bf16 %v157_v40, %v150_v35  ;;  %v844_v35 = vld [vmem:[#allocation8 + $0x588] sm:$0xff]  ;;  %v227_v37 = vld [vmem:[#allocation5 + $0x378] sm:$0xff] }
  0xe3   :  { %3460 = vmatpush1.bf16.msra.mxu1 %v3459_v51  ;;  %v3821_v51 = vpack.c.bf16 %v719_v45, %v712_v44  ;;  %v276_v44 = vld [vmem:[#allocation5 + $0x500] sm:$0xff]  ;;  %v283_v45 = vld [vmem:[#allocation5 + $0x538] sm:$0xff]  ;;  %v852_v38 = vld [vmem:[#allocation8 + $0x5c8] sm:$0xff] }
  0xe4   :  { %3462 = vmatprep.subr.bf16.mxu1 %v3461_v56  ;;  %v726_v56 = vld [vmem:[#allocation8 + $0x1d8] sm:$0xff]  ;;  %3820 = vmatpush1.bf16.msra.mxu0 %v3819_v48  ;;  %v668_v40 = vld [vmem:[#allocation8 + $0x8] sm:$0xff] }
  0xe5   :  { %3822 = vmatprep.subr.bf16.mxu0 %v3821_v51  ;;  %v164_v48 = vld [vmem:[#allocation5 + $0x180] sm:$0xff]  ;;  %v3565_v51 = vpack.c.bf16 %v283_v45, %v276_v44  ;;  %v3583_v44 = vpack.c.bf16 %v227_v37, %v220_v32  ;;  %v667_v45 = vld [vmem:[#allocation8] sm:$0xff]  ;;  %v752_v32 = vld [vmem:[#allocation8 + $0x2a8] sm:$0xff] }
  0xe6   :  { %v3567_v58 = vpack.c.bf16 %v171_v52, %v164_v48  ;;  %v858_v48 = vld [vmem:[#allocation8 + $0x5f8] sm:$0xff] }
  0xe7   :  { %3464 = vmatpush1.bf16.msra.mxu1 %v3463_v63  ;;  %v3825_v63 = vpack.c.bf16 %v733_v57, %v726_v56  ;;  %v297_v56 = vld [vmem:[#allocation5 + $0x5a8] sm:$0xff]  ;;  %v682_v52 = vld [vmem:[#allocation8 + $0x78] sm:$0xff] }
  0xe8   :  { %3466 = vmatprep.subr.bf16.mxu1 %v3465_v4  ;;  %v740_v4 = vld [vmem:[#allocation8 + $0x248] sm:$0xff]  ;;  %3824 = vmatpush1.bf16.msra.mxu0 %v3823_v60  ;;  %v758_v37 = vld [vmem:[#allocation8 + $0x2d8] sm:$0xff] }
  0xe9   :  { %3826 = vmatprep.subr.bf16.mxu0 %v3825_v63  ;;  %v3829_v10 = vpack.c.bf16 %v747_v5, %v740_v4  ;;  %v3569_v63 = vpack.c.bf16 %v297_v56, %v290_v55  ;;  %v311_v4 = vld [vmem:[#allocation5 + $0x618] sm:$0xff] }
  0xea   :  { %v681_v56 = vld [vmem:[#allocation8 + $0x70] sm:$0xff] }
  0xeb   :  { %3468 = vmatpush1.bf16.msra.mxu1 %v3467_v11  ;;  %v739_v11 = vld [vmem:[#allocation8 + $0x240] sm:$0xff] }
  0xec   :  { %3470 = vmatprep.subr.bf16.mxu1 %v3469_v17  ;;  %v248_v17 = vld [vmem:[#allocation5 + $0x420] sm:$0xff]  ;;  %3828 = vmatpush1.bf16.msra.mxu0 %v3827_v8  ;;  %v3831_v21 = vpack.c.bf16 %v746_v12, %v739_v11  ;;  %v3573_v11 = vpack.c.bf16 %v311_v4, %v304_v3  ;;  %v199_v12 = vld [vmem:[#allocation5 + $0x298] sm:$0xff]  ;;  %v695_v4 = vld [vmem:[#allocation8 + $0xe0] sm:$0xff] }
  0xed   :  { %3830 = vmatprep.subr.bf16.mxu0 %v3829_v10  ;;  %v3557_v26 = vpack.c.bf16 %v255_v18, %v248_v17  ;;  %v816_v10 = vld [vmem:[#allocation8 + $0x4a8] sm:$0xff]  ;;  %v325_v17 = vld [vmem:[#allocation5 + $0x688] sm:$0xff]  ;;  %v3575_v19 = vpack.c.bf16 %v199_v12, %v192_v7  ;;  %v886_v7 = vld [vmem:[#allocation8 + $0x6d8] sm:$0xff] }
  0xee   :  { %v710_v12 = vld [vmem:[#allocation8 + $0x158] sm:$0xff] }
  0xef   :  { %3472 = vmatpush1.bf16.msra.mxu1 %v3471_v24  ;;  %v753_v24 = vld [vmem:[#allocation8 + $0x2b0] sm:$0xff] }
  0xf0   :  { %3474 = vmatprep.subr.bf16.mxu1 %v3473_v29  ;;  %v768_v29 = vld [vmem:[#allocation8 + $0x328] sm:$0xff]  ;;  %3832 = vmatpush1.bf16.msra.mxu0 %v3831_v21  ;;  %v3835_v33 = vpack.c.bf16 %v760_v25, %v753_v24  ;;  %v3577_v24 = vpack.c.bf16 %v325_v17, %v318_v16  ;;  %v213_v25 = vld [vmem:[#allocation5 + $0x308] sm:$0xff] }
  0xf1   :  { %3834 = vmatprep.subr.bf16.mxu0 %v3833_v28  ;;  %v332_v28 = vld [vmem:[#allocation5 + $0x6c0] sm:$0xff]  ;;  %v3579_v31 = vpack.c.bf16 %v213_v25, %v206_v20  ;;  %v724_v20 = vld [vmem:[#allocation8 + $0x1c8] sm:$0xff] }
  0xf2   :  { %v730_v25 = vld [vmem:[#allocation8 + $0x1f8] sm:$0xff] }
  0xf3   :  { %3476 = vmatpush1.bf16.msra.mxu1 %v3475_v36  ;;  %v3837_v36 = vpack.c.bf16 %v775_v30, %v768_v29  ;;  %v339_v29 = vld [vmem:[#allocation5 + $0x6f8] sm:$0xff] }
  0xf4   :  { %3478 = vmatprep.subr.bf16.mxu1 %v3477_v42  ;;  %v782_v42 = vld [vmem:[#allocation8 + $0x398] sm:$0xff]  ;;  %3836 = vmatpush1.bf16.msra.mxu0 %v3835_v33 }
  0xf5   :  { %3838 = vmatprep.subr.bf16.mxu0 %v3837_v36  ;;  %v3581_v36 = vpack.c.bf16 %v339_v29, %v332_v28 }
  0xf7   :  { %3480 = vmatpush1.bf16.msra.mxu1 %v3479_v49  ;;  %v3841_v49 = vpack.c.bf16 %v789_v43, %v782_v42  ;;  %v675_v42 = vld [vmem:[#allocation8 + $0x40] sm:$0xff] }
  0xf8   :  { %3482 = vmatprep.subr.bf16.mxu1 %v3481_v54  ;;  %v803_v54 = vld [vmem:[#allocation8 + $0x440] sm:$0xff]  ;;  %3840 = vmatpush1.bf16.msra.mxu0 %v3839_v46 }
  0xf9   :  { %3842 = vmatprep.subr.bf16.mxu0 %v3841_v49  ;;  %v3845_v60 = vpack.c.bf16 %v803_v54, %v796_v53  ;;  %v3585_v49 = vpack.c.bf16 %v675_v42, %v668_v40  ;;  %v689_v53 = vld [vmem:[#allocation8 + $0xb0] sm:$0xff] }
  0xfb   :  { %3484 = vmatpush1.bf16.msra.mxu1 %v3483_v61  ;;  %v795_v61 = vld [vmem:[#allocation8 + $0x400] sm:$0xff] }
  0xfc   :  { %3486 = vmatprep.subr.bf16.mxu1 %v3485_v2  ;;  %v817_v2 = vld [vmem:[#allocation8 + $0x4b0] sm:$0xff]  ;;  %v3847_v5 = vpack.c.bf16 %v802_v62, %v795_v61  ;;  %v688_v61 = vld [vmem:[#allocation8 + $0xa8] sm:$0xff] }
  0xfd   :  { %v3849_v8 = vpack.c.bf16 %v817_v2, %v810_v1  ;;  %v880_v62 = vld [vmem:[#allocation8 + $0x6a8] sm:$0xff]  ;;  %v703_v1 = vld [vmem:[#allocation8 + $0x120] sm:$0xff]  ;;  %v3591_v3 = vpack.c.bf16 %v688_v61, %v681_v56  ;;  %v814_v61 = vld [vmem:[#allocation8 + $0x498] sm:$0xff] }
  0xfe   :  { %v808_v56 = vld [vmem:[#allocation8 + $0x468] sm:$0xff] }
  0xff   :  { %3488 = vmatpush1.bf16.msra.mxu1 %v3487_v9  ;;  %v809_v9 = vld [vmem:[#allocation8 + $0x470] sm:$0xff] }
 0x100   :  { %3554 = vmatprep.subr.bf16.mxu1 %v3553_v13  ;;  %v824_v13 = vld [vmem:[#allocation8 + $0x4e8] sm:$0xff]  ;;  %v3851_v18 = vpack.c.bf16 %v816_v10, %v809_v9  ;;  %v702_v9 = vld [vmem:[#allocation8 + $0x118] sm:$0xff] }
 0x101   :  { %v3853_v21 = vpack.c.bf16 %v831_v15, %v824_v13  ;;  %v894_v10 = vld [vmem:[#allocation8 + $0x718] sm:$0xff]  ;;  %v717_v13 = vld [vmem:[#allocation8 + $0x190] sm:$0xff] }
 0x102   :  { %513 = vmatmul.mubr.f32.vlgmr.msra.gmra.mrb[2].mxu1 %v5006_v14  ;;  %v3597_v17 = vpack.c.bf16 %v717_v13, %v710_v12 }
 0x103   :  { %3556 = vmatpush3.bf16.msra.mxu1 %v3555_v22  ;;  %654 = vmatprep.mubr.f32.mxu1 %v5002_v41  ;;  %v788_v41 = vld [vmem:[#allocation8 + $0x3c8] sm:$0xff]  ;;  %v823_v22 = vld [vmem:[#allocation8 + $0x4e0] sm:$0xff] }
 0x104   :  { %3558 = vmatprep.subr.bf16.mxu1 %v3557_v26  ;;  %v3843_v57 = vpack.c.bf16 %v788_v41, %v781_v50  ;;  %v838_v26 = vld [vmem:[#allocation8 + $0x558] sm:$0xff]  ;;  %v3855_v30 = vpack.c.bf16 %v830_v23, %v823_v22 }
 0x105   :  { %v3857_v33 = vpack.c.bf16 %v845_v27, %v838_v26  ;;  %v674_v50 = vld [vmem:[#allocation8 + $0x38] sm:$0xff]  ;;  %v745_v27 = vld [vmem:[#allocation8 + $0x270] sm:$0xff] }
 0x106   :  { %3844 = vmatpush1.bf16.msra.mxu0 %v3843_v57  ;;  %v866_v41 = vld [vmem:[#allocation8 + $0x638] sm:$0xff]  ;;  %v3587_v55 = vpack.c.bf16 %v674_v50, %v667_v45  ;;  %v780_v45 = vld [vmem:[#allocation8 + $0x388] sm:$0xff] }
 0x107   :  { %3560 = vmatpush3.bf16.msra.mxu1 %v3559_v34  ;;  %3846 = vmatprep.subr.bf16.mxu0 %v3845_v60  ;;  %v837_v34 = vld [vmem:[#allocation8 + $0x550] sm:$0xff]  ;;  %v3589_v60 = vpack.c.bf16 %v689_v53, %v682_v52  ;;  %v738_v26 = vld [vmem:[#allocation8 + $0x238] sm:$0xff] }
 0x108   :  { %3562 = vmatprep.subr.bf16.mxu1 %v3561_v39  ;;  %v859_v39 = vld [vmem:[#allocation8 + $0x600] sm:$0xff]  ;;  %v3859_v43 = vpack.c.bf16 %v844_v35, %v837_v34  ;;  %v3605_v29 = vpack.c.bf16 %v745_v27, %v738_v26  ;;  %v786_v50 = vld [vmem:[#allocation8 + $0x3b8] sm:$0xff]  ;;  %v877_v26 = vld [vmem:[#allocation8 + $0x690] sm:$0xff] }
 0x109   :  { %v3861_v46 = vpack.c.bf16 %v859_v39, %v852_v38  ;;  %v766_v38 = vld [vmem:[#allocation8 + $0x318] sm:$0xff]  ;;  %v773_v39 = vld [vmem:[#allocation8 + $0x350] sm:$0xff]  ;;  %v884_v27 = vld [vmem:[#allocation8 + $0x6c8] sm:$0xff] }
 0x10a   :  { %3848 = vmatpush1.bf16.msra.mxu0 %v3847_v5  ;;  %v3613_v42 = vpack.c.bf16 %v773_v39, %v766_v38 }
 0x10b   :  { %3564 = vmatpush3.bf16.msra.mxu1 %v3563_v47  ;;  %3850 = vmatprep.subr.bf16.mxu0 %v3849_v8  ;;  %v851_v47 = vld [vmem:[#allocation8 + $0x5c0] sm:$0xff]  ;;  %v3593_v8 = vpack.c.bf16 %v703_v1, %v696_v0 }
 0x10c   :  { %3566 = vmatprep.subr.bf16.mxu1 %v3565_v51  ;;  %v873_v51 = vld [vmem:[#allocation8 + $0x670] sm:$0xff]  ;;  %v3863_v54 = vpack.c.bf16 %v858_v48, %v851_v47 }
 0x10d   :  { %v3865_v57 = vpack.c.bf16 %v873_v51, %v866_v41  ;;  %v794_v41 = vld [vmem:[#allocation8 + $0x3f8] sm:$0xff]  ;;  %v801_v51 = vld [vmem:[#allocation8 + $0x430] sm:$0xff] }
 0x10e   :  { %3852 = vmatpush1.bf16.msra.mxu0 %v3851_v18  ;;  %v709_v18 = vld [vmem:[#allocation8 + $0x150] sm:$0xff]  ;;  %v3621_v53 = vpack.c.bf16 %v801_v51, %v794_v41  ;;  %v915_v41 = vld [vmem:[#allocation8 + $0x7c0] sm:$0xff] }
 0x10f   :  { %3568 = vmatpush3.bf16.msra.mxu1 %v3567_v58  ;;  %3854 = vmatprep.subr.bf16.mxu0 %v3853_v21  ;;  %v865_v58 = vld [vmem:[#allocation8 + $0x630] sm:$0xff]  ;;  %v731_v21 = vld [vmem:[#allocation8 + $0x200] sm:$0xff] }
 0x110   :  { %3570 = vmatprep.subr.bf16.mxu1 %v3569_v63  ;;  %v887_v63 = vld [vmem:[#allocation8 + $0x6e0] sm:$0xff]  ;;  %v3867_v2 = vpack.c.bf16 %v872_v59, %v865_v58  ;;  %v3601_v23 = vpack.c.bf16 %v731_v21, %v724_v20  ;;  %v870_v21 = vld [vmem:[#allocation8 + $0x658] sm:$0xff] }
 0x111   :  { %v3869_v5 = vpack.c.bf16 %v887_v63, %v880_v62  ;;  %v822_v62 = vld [vmem:[#allocation8 + $0x4d8] sm:$0xff]  ;;  %v829_v63 = vld [vmem:[#allocation8 + $0x510] sm:$0xff]  ;;  %v863_v20 = vld [vmem:[#allocation8 + $0x620] sm:$0xff] }
 0x112   :  { %3856 = vmatpush1.bf16.msra.mxu0 %v3855_v30  ;;  %v737_v30 = vld [vmem:[#allocation8 + $0x230] sm:$0xff]  ;;  %v3629_v1 = vpack.c.bf16 %v829_v63, %v822_v62  ;;  %v927_v62 = vld [vmem:[#allocation8 + $0x820] sm:$0xff]  ;;  %v922_v63 = vld [vmem:[#allocation8 + $0x7f8] sm:$0xff] }
 0x113   :  { %3572 = vmatpush3.bf16.msra.mxu1 %v3571_v6  ;;  %3858 = vmatprep.subr.bf16.mxu0 %v3857_v33  ;;  %v879_v6 = vld [vmem:[#allocation8 + $0x6a0] sm:$0xff] }
 0x114   :  { %3574 = vmatprep.subr.bf16.mxu1 %v3573_v11  ;;  %v901_v11 = vld [vmem:[#allocation8 + $0x750] sm:$0xff]  ;;  %v3871_v15 = vpack.c.bf16 %v886_v7, %v879_v6  ;;  %v759_v33 = vld [vmem:[#allocation8 + $0x2e0] sm:$0xff] }
 0x115   :  { %v3873_v16 = vpack.c.bf16 %v901_v11, %v894_v10  ;;  %v3609_v35 = vpack.c.bf16 %v759_v33, %v752_v32  ;;  %v850_v10 = vld [vmem:[#allocation8 + $0x5b8] sm:$0xff]  ;;  %v857_v11 = vld [vmem:[#allocation8 + $0x5f0] sm:$0xff]  ;;  %v342_v32 = vlaneseq }
 0x116   :  { %3860 = vmatpush1.bf16.msra.mxu0 %v3859_v43  ;;  %v765_v43 = vld [vmem:[#allocation8 + $0x310] sm:$0xff]  ;;  %v3637_v13 = vpack.c.bf16 %v857_v11, %v850_v10  ;;  %v936_v11 = vld [vmem:[#allocation8 + $0x868] sm:$0xff] }
 0x117   :  { %3576 = vmatpush3.bf16.msra.mxu1 %v3575_v19  ;;  %3862 = vmatprep.subr.bf16.mxu0 %v3861_v46  ;;  %v716_v19 = vld [vmem:[#allocation8 + $0x188] sm:$0xff]  ;;  %v787_v46 = vld [vmem:[#allocation8 + $0x3c0] sm:$0xff]  ;;  %v5014_v33 = vshrl.u32 %v342_v32, 7  ;;  %v941_v10 = vld [vmem:[#allocation8 + $0x890] sm:$0xff] }
 0x118   :  { %3578 = vmatprep.subr.bf16.mxu1 %v3577_v24  ;;  %v3599_v22 = vpack.c.bf16 %v716_v19, %v709_v18  ;;  %v723_v24 = vld [vmem:[#allocation8 + $0x1c0] sm:$0xff]  ;;  %v3617_v48 = vpack.c.bf16 %v787_v46, %v780_v45  ;;  %v898_v45 = vld [vmem:[#allocation8 + $0x738] sm:$0xff]  ;;  %v893_v46 = vld [vmem:[#allocation8 + $0x710] sm:$0xff] }
 0x119   :  { %v3603_v28 = vpack.c.bf16 %v730_v25, %v723_v24  ;;  %v3643_v24 = vpack.c.bf16 %v870_v21, %v863_v20  ;;  %v942_v20 = vld [vmem:[#allocation8 + $0x898] sm:$0xff]  ;;  %v948_v21 = vld [vmem:[#allocation8 + $0x8c8] sm:$0xff] }
 0x11a   :  { %3864 = vmatpush1.bf16.msra.mxu0 %v3863_v54  ;;  %v793_v54 = vld [vmem:[#allocation8 + $0x3f0] sm:$0xff]  ;;  %v956_v32 = vld [vmem:[#allocation8 + $0x908] sm:$0xff] }
 0x11b   :  { %3580 = vmatpush3.bf16.msra.mxu1 %v3579_v31  ;;  %3866 = vmatprep.subr.bf16.mxu0 %v3865_v57  ;;  %v744_v31 = vld [vmem:[#allocation8 + $0x268] sm:$0xff]  ;;  %v815_v57 = vld [vmem:[#allocation8 + $0x4a0] sm:$0xff] }
 0x11c   :  { %3582 = vmatprep.subr.bf16.mxu1 %v3581_v36  ;;  %v3607_v34 = vpack.c.bf16 %v744_v31, %v737_v30  ;;  %v751_v36 = vld [vmem:[#allocation8 + $0x2a0] sm:$0xff]  ;;  %v3625_v59 = vpack.c.bf16 %v815_v57, %v808_v56  ;;  %v3647_v30 = vpack.c.bf16 %v884_v27, %v877_v26 }
 0x11d   :  { %v3611_v40 = vpack.c.bf16 %v758_v37, %v751_v36  ;;  %v5022_v36 = vsub.s32 1, %v5014_v33  ;;  %v947_v27 = vld [vmem:[#allocation8 + $0x8c0] sm:$0xff] }
 0x11e   :  { %3868 = vmatpush1.bf16.msra.mxu0 %v3867_v2  ;;  %v821_v2 = vld [vmem:[#allocation8 + $0x4d0] sm:$0xff] }
 0x11f   :  { %3584 = vmatpush3.bf16.msra.mxu1 %v3583_v44  ;;  %3870 = vmatprep.subr.bf16.mxu0 %v3869_v5  ;;  %v772_v44 = vld [vmem:[#allocation8 + $0x348] sm:$0xff]  ;;  %v843_v5 = vld [vmem:[#allocation8 + $0x580] sm:$0xff] }
 0x120   :  { %3586 = vmatprep.subr.bf16.mxu1 %v3585_v49  ;;  %v3615_v47 = vpack.c.bf16 %v772_v44, %v765_v43  ;;  %v779_v49 = vld [vmem:[#allocation8 + $0x380] sm:$0xff] }
 0x121   :  { %v3619_v52 = vpack.c.bf16 %v786_v50, %v779_v49  ;;  %v891_v44 = vld [vmem:[#allocation8 + $0x700] sm:$0xff]  ;;  %v913_v49 = vld [vmem:[#allocation8 + $0x7b0] sm:$0xff]  ;;  %v908_v50 = vld [vmem:[#allocation8 + $0x788] sm:$0xff] }
 0x122   :  { %655 = vmatmul.mubr.f32.vlgmr.msra.gmra.mrb[4].mxu1 %v5006_v14  ;;  %v3595_v14 = vpack.c.bf16 %v702_v9, %v695_v4  ;;  %3872 = vmatpush1.bf16.msra.mxu0 %v3871_v15  ;;  %v836_v4 = vld [vmem:[#allocation8 + $0x548] sm:$0xff]  ;;  %v842_v9 = vld [vmem:[#allocation8 + $0x578] sm:$0xff]  ;;  %v849_v15 = vld [vmem:[#allocation8 + $0x5b0] sm:$0xff]  ;;  %v3651_v51 = vpack.c.bf16 %v898_v45, %v891_v44  ;;  %v3877_v57 = vpack.c.bf16 %v915_v41, %v908_v50 }
 0x123   :  { %3588 = vmatpush1.bf16.msra.mxu1 %v3587_v55  ;;  %3874 = vmatprep.subr.bf16.mxu0 %v3873_v16  ;;  %v800_v55 = vld [vmem:[#allocation8 + $0x428] sm:$0xff]  ;;  %v3633_v7 = vpack.c.bf16 %v843_v5, %v836_v4  ;;  %v926_v4 = vld [vmem:[#allocation8 + $0x818] sm:$0xff]  ;;  %v961_v44 = vld [vmem:[#allocation8 + $0x930] sm:$0xff] }
 0x124   :  { %3590 = vmatprep.subr.bf16.mxu1 %v3589_v60  ;;  %v3623_v58 = vpack.c.bf16 %v800_v55, %v793_v54  ;;  %v807_v60 = vld [vmem:[#allocation8 + $0x460] sm:$0xff]  ;;  %v864_v16 = vld [vmem:[#allocation8 + $0x628] sm:$0xff] }
 0x125   :  { %v3627_v0 = vpack.c.bf16 %v814_v61, %v807_v60  ;;  %v912_v54 = vld [vmem:[#allocation8 + $0x7a8] sm:$0xff]  ;;  %v983_v41 = vld [vmem:[#allocation8 + $0x9e0] sm:$0xff] }
 0x126   :  { %v920_v60 = vld [vmem:[#allocation8 + $0x7e8] sm:$0xff] }
 0x127   :  { %3592 = vmatpush1.bf16.msra.mxu1 %v3591_v3  ;;  %v828_v3 = vld [vmem:[#allocation8 + $0x508] sm:$0xff]  ;;  %v3657_v5 = vpack.c.bf16 %v927_v62, %v920_v60  ;;  %v977_v60 = vld [vmem:[#allocation8 + $0x9b0] sm:$0xff] }
 0x128   :  { %3594 = vmatprep.subr.bf16.mxu1 %v3593_v8  ;;  %v3631_v6 = vpack.c.bf16 %v828_v3, %v821_v2  ;;  %v835_v8 = vld [vmem:[#allocation8 + $0x540] sm:$0xff]  ;;  %v968_v45 = vld [vmem:[#allocation8 + $0x968] sm:$0xff] }
 0x129   :  { %v3635_v12 = vpack.c.bf16 %v842_v9, %v835_v8  ;;  %v919_v3 = vld [vmem:[#allocation8 + $0x7e0] sm:$0xff]  ;;  %v928_v8 = vld [vmem:[#allocation8 + $0x828] sm:$0xff]  ;;  %v934_v9 = vld [vmem:[#allocation8 + $0x858] sm:$0xff] }
 0x12a   :  { %v976_v50 = vld [vmem:[#allocation8 + $0x9a8] sm:$0xff] }
 0x12b   :  { %3596 = vmatpush1.bf16.msra.mxu1 %v3595_v14  ;;  %v856_v14 = vld [vmem:[#allocation8 + $0x5e8] sm:$0xff] }
 0x12c   :  { %3598 = vmatprep.subr.bf16.mxu1 %v3597_v17  ;;  %v871_v17 = vld [vmem:[#allocation8 + $0x660] sm:$0xff]  ;;  %v3639_v18 = vpack.c.bf16 %v856_v14, %v849_v15  ;;  %v933_v14 = vld [vmem:[#allocation8 + $0x850] sm:$0xff]  ;;  %v984_v62 = vld [vmem:[#allocation8 + $0x9e8] sm:$0xff] }
 0x12d   :  { %v3641_v19 = vpack.c.bf16 %v871_v17, %v864_v16  ;;  %v940_v16 = vld [vmem:[#allocation8 + $0x888] sm:$0xff]  ;;  %v3661_v17 = vpack.c.bf16 %v941_v10, %v934_v9  ;;  %v991_v9 = vld [vmem:[#allocation8 + $0xa20] sm:$0xff]  ;;  %v998_v10 = vld [vmem:[#allocation8 + $0xa58] sm:$0xff] }
 0x12f   :  { %3600 = vmatpush1.bf16.msra.mxu1 %v3599_v22  ;;  %v878_v22 = vld [vmem:[#allocation8 + $0x698] sm:$0xff] }
 0x130   :  { %3602 = vmatprep.subr.bf16.mxu1 %v3601_v23  ;;  %v885_v23 = vld [vmem:[#allocation8 + $0x6d0] sm:$0xff] }
 0x131   :  { %v3645_v25 = vpack.c.bf16 %v885_v23, %v878_v22  ;;  %v955_v22 = vld [vmem:[#allocation8 + $0x900] sm:$0xff]  ;;  %v950_v23 = vld [vmem:[#allocation8 + $0x8d8] sm:$0xff] }
 0x133   :  { %3604 = vmatpush1.bf16.msra.mxu1 %v3603_v28  ;;  %v892_v28 = vld [vmem:[#allocation8 + $0x708] sm:$0xff] }
 0x134   :  { %3606 = vmatprep.subr.bf16.mxu1 %v3605_v29  ;;  %v899_v29 = vld [vmem:[#allocation8 + $0x740] sm:$0xff] }
 0x135   :  { %v3649_v31 = vpack.c.bf16 %v899_v29, %v892_v28  ;;  %v954_v28 = vld [vmem:[#allocation8 + $0x8f8] sm:$0xff]  ;;  %v3665_v29 = vpack.c.bf16 %v955_v22, %v948_v21  ;;  %v1005_v21 = vld [vmem:[#allocation8 + $0xa90] sm:$0xff]  ;;  %v1012_v22 = vld [vmem:[#allocation8 + $0xac8] sm:$0xff] }
 0x137   :  { %3608 = vmatpush1.bf16.msra.mxu1 %v3607_v34  ;;  %v5017_v34 = vsub.s32 0, %v5014_v33 }
 0x138   :  { %3610 = vmatprep.subr.bf16.mxu1 %v3609_v35  ;;  %v5019_v35 = vld [vmem:[#allocation7] sm:$0xff] }
 0x139   :  { %v345_v37 = vrot.slane %v5019_v35, %v5017_v34  ;;  %v349_v38 = vrot.slane %v5019_v35, %v5022_v36 }
 0x13b   :  { %3612 = vmatpush1.bf16.msra.mxu1 %v3611_v40 }
 0x13c   :  { %3614 = vmatprep.subr.bf16.mxu1 %v3613_v42 }
 0x13f   :  { %3616 = vmatpush1.bf16.msra.mxu1 %v3615_v47  ;;  %v900_v47 = vld [vmem:[#allocation8 + $0x748] sm:$0xff] }
 0x140   :  { %3618 = vmatprep.subr.bf16.mxu1 %v3617_v48  ;;  %v906_v48 = vld [vmem:[#allocation8 + $0x778] sm:$0xff] }
 0x141   :  { %v3653_v56 = vpack.c.bf16 %v913_v49, %v906_v48  ;;  %v963_v48 = vld [vmem:[#allocation8 + $0x940] sm:$0xff]  ;;  %v970_v49 = vld [vmem:[#allocation8 + $0x978] sm:$0xff] }
 0x143   :  { %3620 = vmatpush1.bf16.msra.mxu1 %v3619_v52  ;;  %v3875_v52 = vpack.c.bf16 %v900_v47, %v893_v46 }
 0x144   :  { %3622 = vmatprep.subr.bf16.mxu1 %v3621_v53  ;;  %v905_v53 = vld [vmem:[#allocation8 + $0x770] sm:$0xff] }
 0x147   :  { %3624 = vmatpush1.bf16.msra.mxu1 %v3623_v58  ;;  %v907_v58 = vld [vmem:[#allocation8 + $0x780] sm:$0xff] }
 0x148   :  { %3626 = vmatprep.subr.bf16.mxu1 %v3625_v59  ;;  %v914_v59 = vld [vmem:[#allocation8 + $0x7b8] sm:$0xff] }
 0x149   :  { %v3879_v2 = vpack.c.bf16 %v914_v59, %v907_v58  ;;  %v3673_v58 = vpack.c.bf16 %v983_v41, %v976_v50 }
 0x14b   :  { %3628 = vmatpush1.bf16.msra.mxu1 %v3627_v0  ;;  %v929_v0 = vld [vmem:[#allocation8 + $0x830] sm:$0xff] }
 0x14c   :  { %3630 = vmatprep.subr.bf16.mxu1 %v3629_v1  ;;  %v3655_v1 = vpack.c.bf16 %v912_v54, %v905_v53  ;;  %v3671_v53 = vpack.c.bf16 %v968_v45, %v961_v44  ;;  %v3895_v54 = vpack.c.bf16 %v970_v49, %v963_v48  ;;  %v1034_v44 = vld [vmem:[#allocation8 + $0xb78] sm:$0xff]  ;;  %v1041_v45 = vld [vmem:[#allocation8 + $0xbb0] sm:$0xff]  ;;  %v1031_v48 = vld [vmem:[#allocation8 + $0xb60] sm:$0xff] }
 0x14d   :  { %v1038_v49 = vld [vmem:[#allocation8 + $0xb98] sm:$0xff]  ;;  %v3913_v41 = vpack.c.bf16 %v1041_v45, %v1034_v44 }
 0x14f   :  { %3632 = vmatpush1.bf16.msra.mxu1 %v3631_v6  ;;  %v3881_v6 = vpack.c.bf16 %v929_v0, %v922_v63  ;;  %v990_v63 = vld [vmem:[#allocation8 + $0xa18] sm:$0xff]  ;;  %v997_v0 = vld [vmem:[#allocation8 + $0xa50] sm:$0xff] }
 0x150   :  { %3634 = vmatprep.subr.bf16.mxu1 %v3633_v7  ;;  %v921_v7 = vld [vmem:[#allocation8 + $0x7f0] sm:$0xff] }
 0x151   :  { %v3883_v15 = vpack.c.bf16 %v928_v8, %v921_v7  ;;  %v3677_v7 = vpack.c.bf16 %v997_v0, %v990_v63 }
 0x153   :  { %3636 = vmatpush1.bf16.msra.mxu1 %v3635_v12  ;;  %v943_v12 = vld [vmem:[#allocation8 + $0x8a0] sm:$0xff] }
 0x154   :  { %3638 = vmatprep.subr.bf16.mxu1 %v3637_v13  ;;  %v3659_v13 = vpack.c.bf16 %v926_v4, %v919_v3  ;;  %v3899_v4 = vpack.c.bf16 %v984_v62, %v977_v60  ;;  %v1045_v60 = vld [vmem:[#allocation8 + $0xbd0] sm:$0xff]  ;;  %v1052_v62 = vld [vmem:[#allocation8 + $0xc08] sm:$0xff] }
 0x157   :  { %3640 = vmatpush1.bf16.msra.mxu1 %v3639_v18  ;;  %v3885_v18 = vpack.c.bf16 %v943_v12, %v936_v11  ;;  %v1004_v11 = vld [vmem:[#allocation8 + $0xa88] sm:$0xff]  ;;  %v1011_v12 = vld [vmem:[#allocation8 + $0xac0] sm:$0xff] }
 0x158   :  { %3642 = vmatprep.subr.bf16.mxu1 %v3641_v19  ;;  %v935_v19 = vld [vmem:[#allocation8 + $0x860] sm:$0xff] }
 0x159   :  { %v3887_v26 = vpack.c.bf16 %v942_v20, %v935_v19  ;;  %v3681_v19 = vpack.c.bf16 %v1011_v12, %v1004_v11  ;;  %v1066_v11 = vld [vmem:[#allocation8 + $0xc78] sm:$0xff]  ;;  %v356_v12 = vsub.s32 3, %v5014_v33 }
 0x15b   :  { %3644 = vmatpush1.bf16.msra.mxu1 %v3643_v24  ;;  %v957_v24 = vld [vmem:[#allocation8 + $0x910] sm:$0xff] }
 0x15c   :  { %3646 = vmatprep.subr.bf16.mxu1 %v3645_v25  ;;  %v3663_v25 = vpack.c.bf16 %v940_v16, %v933_v14  ;;  %v3903_v16 = vpack.c.bf16 %v998_v10, %v991_v9  ;;  %v352_v9 = vsub.s32 2, %v5014_v33  ;;  %v1059_v10 = vld [vmem:[#allocation8 + $0xc40] sm:$0xff] }
 0x15f   :  { %3648 = vmatpush1.bf16.msra.mxu1 %v3647_v30  ;;  %v3889_v30 = vpack.c.bf16 %v957_v24, %v950_v23  ;;  %v1018_v23 = vld [vmem:[#allocation8 + $0xaf8] sm:$0xff]  ;;  %v1025_v24 = vld [vmem:[#allocation8 + $0xb30] sm:$0xff] }
 0x160   :  { %3650 = vmatprep.subr.bf16.mxu1 %v3649_v31  ;;  %v949_v31 = vld [vmem:[#allocation8 + $0x8d0] sm:$0xff] }
 0x195   :  { %v443_v39 = vpop.f32.mrb[0].mxu1 }
 0x196   :  { %v444_v40 = vadd.f32 %v443_v39, %v345_v37  ;;  %v445_v42 = vpop.f32.mrb[1].mxu1  ;;  %v962_v37 = vld [vmem:[#allocation8 + $0x938] sm:$0xff]  ;;  %v964_v39 = vld [vmem:[#allocation8 + $0x948] sm:$0xff] }
 0x197   :  { %v446_v43 = vadd.f32 %v445_v42, %v349_v38  ;;  %v969_v38 = vld [vmem:[#allocation8 + $0x970] sm:$0xff]  ;;  %v3667_v42 = vpack.c.bf16 %v954_v28, %v947_v27 }
 0x198   :  { %v3669_v46 = vpack.c.bf16 %v969_v38, %v962_v37  ;;  %v3685_v37 = vpack.c.bf16 %v1025_v24, %v1018_v23  ;;  %v353_v23 = vrot.slane %v5019_v35, %v352_v9 }
 0x199   :  { %4648 = vtanh.f32 %v446_v43  ;;  %v3891_v43 = vpack.c.bf16 %v956_v32, %v949_v31  ;;  %v1017_v31 = vld [vmem:[#allocation8 + $0xaf0] sm:$0xff]  ;;  %v1024_v32 = vld [vmem:[#allocation8 + $0xb28] sm:$0xff] }
 0x19a   :  { %4650 = vtanh.f32 %v444_v40  ;;  %v971_v40 = vld [vmem:[#allocation8 + $0x980] sm:$0xff] }
 0x19b   :  { %v3893_v47 = vpack.c.bf16 %v971_v40, %v964_v39  ;;  %v1019_v39 = vld [vmem:[#allocation8 + $0xb00] sm:$0xff]  ;;  %v1026_v40 = vld [vmem:[#allocation8 + $0xb38] sm:$0xff] }
 0x1a3   :  { %v5028_v55 = vpop.eup %4648 }
 0x1a4   :  { %v5030_v61 = vpop.eup %4650  ;;  %1552 = vmatprep.mubr.f32.mxu1 %v5028_v55  ;;  %1836 = vmatprep.mubr.f32.mxu0 %v5028_v55 }
 0x1a5   :  { %1553 = vmatmul.mubr.f32.vlgmr.msra.gmra.mrb[6].mxu1 %v5030_v61  ;;  %1837 = vmatmul.mubr.f32.vlgmr.msra.gmra.mrb[2].mxu0 %v5030_v61 }
 0x1a6   :  { %3652 = vmatpush1.bf16.msra.mxu1 %v3651_v51  ;;  %3876 = vmatpush1.bf16.msra.mxu0 %v3875_v52  ;;  %v978_v51 = vld [vmem:[#allocation8 + $0x9b8] sm:$0xff]  ;;  %v985_v52 = vld [vmem:[#allocation8 + $0x9f0] sm:$0xff] }
 0x1a7   :  { %3654 = vmatprep.subr.bf16.mxu1 %v3653_v56  ;;  %3878 = vmatprep.subr.bf16.mxu0 %v3877_v57  ;;  %v975_v56 = vld [vmem:[#allocation8 + $0x9a0] sm:$0xff]  ;;  %v982_v57 = vld [vmem:[#allocation8 + $0x9d8] sm:$0xff]  ;;  %v3897_v59 = vpack.c.bf16 %v985_v52, %v978_v51  ;;  %v1033_v51 = vld [vmem:[#allocation8 + $0xb70] sm:$0xff] }
 0x1a8   :  { %v3675_v3 = vpack.c.bf16 %v982_v57, %v975_v56  ;;  %v1040_v52 = vld [vmem:[#allocation8 + $0xba8] sm:$0xff]  ;;  %v1055_v57 = vld [vmem:[#allocation8 + $0xc20] sm:$0xff] }
 0x1a9   :  { %v1048_v56 = vld [vmem:[#allocation8 + $0xbe8] sm:$0xff] }
 0x1aa   :  { %3656 = vmatpush1.bf16.msra.mxu1 %v3655_v1  ;;  %3880 = vmatpush1.bf16.msra.mxu0 %v3879_v2  ;;  %v992_v1 = vld [vmem:[#allocation8 + $0xa28] sm:$0xff]  ;;  %v999_v2 = vld [vmem:[#allocation8 + $0xa60] sm:$0xff]  ;;  %v3917_v0 = vpack.c.bf16 %v1055_v57, %v1048_v56  ;;  %v1102_v56 = vld [vmem:[#allocation8 + $0xd98] sm:$0xff] }
 0x1ab   :  { %3658 = vmatprep.subr.bf16.mxu1 %v3657_v5  ;;  %3882 = vmatprep.subr.bf16.mxu0 %v3881_v6  ;;  %v989_v5 = vld [vmem:[#allocation8 + $0xa10] sm:$0xff]  ;;  %v996_v6 = vld [vmem:[#allocation8 + $0xa48] sm:$0xff]  ;;  %v3901_v8 = vpack.c.bf16 %v999_v2, %v992_v1  ;;  %v1047_v1 = vld [vmem:[#allocation8 + $0xbe0] sm:$0xff] }
 0x1ac   :  { %v3679_v14 = vpack.c.bf16 %v996_v6, %v989_v5  ;;  %v1054_v2 = vld [vmem:[#allocation8 + $0xc18] sm:$0xff]  ;;  %v1069_v6 = vld [vmem:[#allocation8 + $0xc90] sm:$0xff] }
 0x1ad   :  { %v1062_v5 = vld [vmem:[#allocation8 + $0xc58] sm:$0xff] }
 0x1ae   :  { %3660 = vmatpush1.bf16.msra.mxu1 %v3659_v13  ;;  %3884 = vmatpush1.bf16.msra.mxu0 %v3883_v15  ;;  %v1006_v13 = vld [vmem:[#allocation8 + $0xa98] sm:$0xff]  ;;  %v1013_v15 = vld [vmem:[#allocation8 + $0xad0] sm:$0xff]  ;;  %v5036_v27 = vpop.f32.mrb[0].mxu0 }
 0x1af   :  { %3662 = vmatprep.subr.bf16.mxu1 %v3661_v17  ;;  %3886 = vmatprep.subr.bf16.mxu0 %v3885_v18  ;;  %v1003_v17 = vld [vmem:[#allocation8 + $0xa80] sm:$0xff]  ;;  %v1010_v18 = vld [vmem:[#allocation8 + $0xab8] sm:$0xff]  ;;  %v3905_v20 = vpack.c.bf16 %v1013_v15, %v1006_v13  ;;  %v5038_v28 = vpop.f32.mrb[1].mxu0  ;;  %v3921_v15 = vpack.c.bf16 %v1069_v6, %v1062_v5  ;;  %v1116_v6 = vld [vmem:[#allocation8 + $0xe08] sm:$0xff] }
 0x1b0   :  { %v1110_v5 = vld [vmem:[#allocation8 + $0xdd8] sm:$0xff] }
 0x1b2   :  { %3664 = vmatpush1.bf16.msra.mxu1 %v3663_v25  ;;  %3888 = vmatpush1.bf16.msra.mxu0 %v3887_v26  ;;  %v1020_v25 = vld [vmem:[#allocation8 + $0xb08] sm:$0xff]  ;;  %v1027_v26 = vld [vmem:[#allocation8 + $0xb40] sm:$0xff] }
 0x1b3   :  { %3666 = vmatprep.subr.bf16.mxu1 %v3665_v29  ;;  %3890 = vmatprep.subr.bf16.mxu0 %v3889_v30  ;;  %v3683_v29 = vpack.c.bf16 %v1010_v18, %v1003_v17  ;;  %v3907_v30 = vpack.c.bf16 %v1012_v22, %v1005_v21  ;;  %v3909_v38 = vpack.c.bf16 %v1027_v26, %v1020_v25  ;;  %v1074_v17 = vld [vmem:[#allocation8 + $0xcb8] sm:$0xff]  ;;  %v364_v18 = vsub.s32 5, %v5014_v33  ;;  %v1083_v21 = vld [vmem:[#allocation8 + $0xd00] sm:$0xff]  ;;  %v1073_v26 = vld [vmem:[#allocation8 + $0xcb0] sm:$0xff] }
 0x1b4   :  { %v3699_v22 = vpack.c.bf16 %v1066_v11, %v1059_v10  ;;  %v357_v25 = vrot.slane %v5019_v35, %v356_v12 }
 0x1b6   :  { %3668 = vmatpush1.bf16.msra.mxu1 %v3667_v42  ;;  %3892 = vmatpush1.bf16.msra.mxu0 %v3891_v43  ;;  %v1032_v42 = vld [vmem:[#allocation8 + $0xb68] sm:$0xff]  ;;  %v1039_v43 = vld [vmem:[#allocation8 + $0xba0] sm:$0xff] }
 0x1b7   :  { %3670 = vmatprep.subr.bf16.mxu1 %v3669_v46  ;;  %3894 = vmatprep.subr.bf16.mxu0 %v3893_v47  ;;  %v3687_v46 = vpack.c.bf16 %v1024_v32, %v1017_v31  ;;  %v3911_v47 = vpack.c.bf16 %v1026_v40, %v1019_v39  ;;  %v3689_v50 = vpack.c.bf16 %v1039_v43, %v1032_v42  ;;  %v1095_v39 = vld [vmem:[#allocation8 + $0xd60] sm:$0xff]  ;;  %v1090_v42 = vld [vmem:[#allocation8 + $0xd38] sm:$0xff]  ;;  %v1097_v43 = vld [vmem:[#allocation8 + $0xd70] sm:$0xff] }
 0x1b8   :  { %v365_v40 = vrot.slane %v5019_v35, %v364_v18 }
 0x1ba   :  { %3672 = vmatpush1.bf16.msra.mxu1 %v3671_v53  ;;  %3896 = vmatpush1.bf16.msra.mxu0 %v3895_v54  ;;  %v1046_v53 = vld [vmem:[#allocation8 + $0xbd8] sm:$0xff]  ;;  %v1053_v54 = vld [vmem:[#allocation8 + $0xc10] sm:$0xff]  ;;  %v588_v57 = vadd.f32 %v5038_v28, %v365_v40  ;;  %v1123_v28 = vld [vmem:[#allocation8 + $0xe40] sm:$0xff] }
 0x1bb   :  { %3674 = vmatprep.subr.bf16.mxu1 %v3673_v58  ;;  %3898 = vmatprep.subr.bf16.mxu0 %v3897_v59  ;;  %v3691_v58 = vpack.c.bf16 %v1038_v49, %v1031_v48  ;;  %v3915_v59 = vpack.c.bf16 %v1040_v52, %v1033_v51  ;;  %v3693_v63 = vpack.c.bf16 %v1053_v54, %v1046_v53  ;;  %v1089_v53 = vld [vmem:[#allocation8 + $0xd30] sm:$0xff]  ;;  %v1096_v54 = vld [vmem:[#allocation8 + $0xd68] sm:$0xff] }
 0x1bc   :  { %v3929_v52 = vpack.c.bf16 %v1097_v43, %v1090_v42  ;;  %v1151_v42 = vld [vmem:[#allocation8 + $0xf20] sm:$0xff]  ;;  %v1146_v43 = vld [vmem:[#allocation8 + $0xef8] sm:$0xff] }
 0x1be   :  { %3676 = vmatpush1.bf16.msra.mxu1 %v3675_v3  ;;  %3900 = vmatpush1.bf16.msra.mxu0 %v3899_v4  ;;  %v1060_v3 = vld [vmem:[#allocation8 + $0xc48] sm:$0xff]  ;;  %v1067_v4 = vld [vmem:[#allocation8 + $0xc80] sm:$0xff] }
 0x1bf   :  { %3678 = vmatprep.subr.bf16.mxu1 %v3677_v7  ;;  %3902 = vmatprep.subr.bf16.mxu0 %v3901_v8  ;;  %v3695_v7 = vpack.c.bf16 %v1052_v62, %v1045_v60  ;;  %v3919_v8 = vpack.c.bf16 %v1054_v2, %v1047_v1  ;;  %v3697_v13 = vpack.c.bf16 %v1067_v4, %v1060_v3  ;;  %v1111_v60 = vld [vmem:[#allocation8 + $0xde0] sm:$0xff]  ;;  %v1108_v1 = vld [vmem:[#allocation8 + $0xdc8] sm:$0xff] }
 0x1c0   :  { %v1103_v4 = vld [vmem:[#allocation8 + $0xda0] sm:$0xff] }
 0x1c1   :  { %v3935_v11 = vpack.c.bf16 %v1110_v5, %v1103_v4  ;;  %v1179_v4 = vld [vmem:[#allocation8 + $0x1000] sm:$0xff]  ;;  %v1174_v5 = vld [vmem:[#allocation8 + $0xfd8] sm:$0xff] }
 0x1c2   :  { %3680 = vmatpush1.bf16.msra.mxu1 %v3679_v14  ;;  %3904 = vmatpush1.bf16.msra.mxu0 %v3903_v16  ;;  %v1061_v14 = vld [vmem:[#allocation8 + $0xc50] sm:$0xff]  ;;  %v1068_v16 = vld [vmem:[#allocation8 + $0xc88] sm:$0xff] }
 0x1c3   :  { %3682 = vmatprep.subr.bf16.mxu1 %v3681_v19  ;;  %3906 = vmatprep.subr.bf16.mxu0 %v3905_v20  ;;  %v1081_v19 = vld [vmem:[#allocation8 + $0xcf0] sm:$0xff]  ;;  %v1076_v20 = vld [vmem:[#allocation8 + $0xcc8] sm:$0xff]  ;;  %v3923_v24 = vpack.c.bf16 %v1068_v16, %v1061_v14  ;;  %v3713_v14 = vpack.c.bf16 %v1123_v28, %v1116_v6 }
 0x1c4   :  { %v3701_v31 = vpack.c.bf16 %v1081_v19, %v1074_v17  ;;  %v3925_v32 = vpack.c.bf16 %v1083_v21, %v1076_v20  ;;  %v1117_v17 = vld [vmem:[#allocation8 + $0xe10] sm:$0xff]  ;;  %v1124_v19 = vld [vmem:[#allocation8 + $0xe48] sm:$0xff]  ;;  %v1130_v20 = vld [vmem:[#allocation8 + $0xe78] sm:$0xff] }
 0x1c5   :  { %v1137_v21 = vld [vmem:[#allocation8 + $0xeb0] sm:$0xff] }
 0x1c6   :  { %3684 = vmatpush1.bf16.msra.mxu1 %v3683_v29  ;;  %3908 = vmatpush1.bf16.msra.mxu0 %v3907_v30  ;;  %v1080_v29 = vld [vmem:[#allocation8 + $0xce8] sm:$0xff]  ;;  %v1075_v30 = vld [vmem:[#allocation8 + $0xcc0] sm:$0xff]  ;;  %v1181_v6 = vld [vmem:[#allocation8 + $0x1010] sm:$0xff] }
 0x1c7   :  { %3686 = vmatprep.subr.bf16.mxu1 %v3685_v37  ;;  %3910 = vmatprep.subr.bf16.mxu0 %v3909_v38  ;;  %v1082_v37 = vld [vmem:[#allocation8 + $0xcf8] sm:$0xff]  ;;  %v1088_v38 = vld [vmem:[#allocation8 + $0xd28] sm:$0xff]  ;;  %v3703_v45 = vpack.c.bf16 %v1080_v29, %v1073_v26  ;;  %v1129_v26 = vld [vmem:[#allocation8 + $0xe70] sm:$0xff] }
 0x1c8   :  { %v3927_v48 = vpack.c.bf16 %v1082_v37, %v1075_v30  ;;  %v3705_v49 = vpack.c.bf16 %v1095_v39, %v1088_v38  ;;  %v1136_v29 = vld [vmem:[#allocation8 + $0xea8] sm:$0xff]  ;;  %v1131_v37 = vld [vmem:[#allocation8 + $0xe80] sm:$0xff]  ;;  %v1138_v38 = vld [vmem:[#allocation8 + $0xeb8] sm:$0xff] }
 0x1c9   :  { %v1144_v39 = vld [vmem:[#allocation8 + $0xee8] sm:$0xff] }
 0x1ca   :  { %3688 = vmatpush1.bf16.msra.mxu1 %v3687_v46  ;;  %3912 = vmatpush1.bf16.msra.mxu0 %v3911_v47 }
 0x1cb   :  { %3690 = vmatprep.subr.bf16.mxu1 %v3689_v50  ;;  %3914 = vmatprep.subr.bf16.mxu0 %v3913_v41  ;;  %v1087_v50 = vld [vmem:[#allocation8 + $0xd20] sm:$0xff]  ;;  %v1094_v41 = vld [vmem:[#allocation8 + $0xd58] sm:$0xff] }
 0x1cc   :  { %v3707_v62 = vpack.c.bf16 %v1094_v41, %v1087_v50  ;;  %v3721_v50 = vpack.c.bf16 %v1151_v42, %v1144_v39  ;;  %v1209_v39 = vld [vmem:[#allocation8 + $0x10f0] sm:$0xff] }
 0x1ce   :  { %3692 = vmatpush1.bf16.msra.mxu1 %v3691_v58  ;;  %3916 = vmatpush1.bf16.msra.mxu0 %v3915_v59  ;;  %v1109_v58 = vld [vmem:[#allocation8 + $0xdd0] sm:$0xff]  ;;  %v1104_v59 = vld [vmem:[#allocation8 + $0xda8] sm:$0xff] }
 0x1cf   :  { %3694 = vmatprep.subr.bf16.mxu1 %v3693_v63  ;;  %3918 = vmatprep.subr.bf16.mxu0 %v3917_v0  ;;  %v3931_v63 = vpack.c.bf16 %v1096_v54, %v1089_v53  ;;  %v1101_v0 = vld [vmem:[#allocation8 + $0xd90] sm:$0xff]  ;;  %v3709_v2 = vpack.c.bf16 %v1109_v58, %v1102_v56  ;;  %v3933_v3 = vpack.c.bf16 %v1111_v60, %v1104_v59  ;;  %v1158_v53 = vld [vmem:[#allocation8 + $0xf58] sm:$0xff]  ;;  %v1160_v56 = vld [vmem:[#allocation8 + $0xf68] sm:$0xff] }
 0x1d0   :  { %v3711_v10 = vpack.c.bf16 %v1108_v1, %v1101_v0  ;;  %v1165_v54 = vld [vmem:[#allocation8 + $0xf90] sm:$0xff]  ;;  %v1159_v1 = vld [vmem:[#allocation8 + $0xf60] sm:$0xff] }
 0x1d1   :  { %v1157_v60 = vld [vmem:[#allocation8 + $0xf50] sm:$0xff] }
 0x1d2   :  { %3696 = vmatpush1.bf16.msra.mxu1 %v3695_v7  ;;  %3920 = vmatpush1.bf16.msra.mxu0 %v3919_v8  ;;  %v1118_v7 = vld [vmem:[#allocation8 + $0xe18] sm:$0xff]  ;;  %v1125_v8 = vld [vmem:[#allocation8 + $0xe50] sm:$0xff] }
 0x1d3   :  { %3698 = vmatprep.subr.bf16.mxu1 %v3697_v13  ;;  %3922 = vmatprep.subr.bf16.mxu0 %v3921_v15  ;;  %v1115_v13 = vld [vmem:[#allocation8 + $0xe00] sm:$0xff]  ;;  %v1122_v15 = vld [vmem:[#allocation8 + $0xe38] sm:$0xff]  ;;  %v3937_v16 = vpack.c.bf16 %v1125_v8, %v1118_v7 }
 0x1d4   :  { %v1171_v8 = vld [vmem:[#allocation8 + $0xfc0] sm:$0xff] }
 0x1d5   :  { %v514_v44 = vpop.f32.mrb[2].mxu1 }
 0x1d6   :  { %v515_v46 = vadd.f32 %v514_v44, %v353_v23  ;;  %3700 = vmatpush1.bf16.msra.mxu1 %v3699_v22  ;;  %3924 = vmatpush1.bf16.msra.mxu0 %v3923_v24  ;;  %v516_v47 = vpop.f32.mrb[3].mxu1  ;;  %v1132_v22 = vld [vmem:[#allocation8 + $0xe88] sm:$0xff]  ;;  %v1139_v23 = vld [vmem:[#allocation8 + $0xec0] sm:$0xff]  ;;  %v3715_v24 = vpack.c.bf16 %v1122_v15, %v1115_v13  ;;  %v1153_v44 = vld [vmem:[#allocation8 + $0xf30] sm:$0xff]  ;;  %v3953_v13 = vpack.c.bf16 %v1181_v6, %v1174_v5 }
 0x1d7   :  { %v517_v51 = vadd.f32 %v516_v47, %v357_v25  ;;  %3702 = vmatprep.subr.bf16.mxu1 %v3701_v31  ;;  %3926 = vmatprep.subr.bf16.mxu0 %v3925_v32  ;;  %v3939_v25 = vpack.c.bf16 %v1124_v19, %v1117_v17  ;;  %v3717_v31 = vpack.c.bf16 %v1137_v21, %v1130_v20  ;;  %v1173_v15 = vld [vmem:[#allocation8 + $0xfd0] sm:$0xff]  ;;  %v1188_v19 = vld [vmem:[#allocation8 + $0x1048] sm:$0xff]  ;;  %v1195_v20 = vld [vmem:[#allocation8 + $0x1080] sm:$0xff] }
 0x1d8   :  { %v3941_v32 = vpack.c.bf16 %v1139_v23, %v1132_v22  ;;  %v3943_v47 = vpack.c.bf16 %v1138_v38, %v1131_v37  ;;  %v3945_v41 = vpack.c.bf16 %v1153_v44, %v1146_v43  ;;  %v1193_v17 = vld [vmem:[#allocation8 + $0x1070] sm:$0xff]  ;;  %v1207_v37 = vld [vmem:[#allocation8 + $0x10e0] sm:$0xff]  ;;  %v1202_v38 = vld [vmem:[#allocation8 + $0x10b8] sm:$0xff] }
 0x1d9   :  { %4652 = vtanh.f32 %v517_v51  ;;  %v1145_v51 = vld [vmem:[#allocation8 + $0xef0] sm:$0xff]  ;;  %v1230_v5 = vld [vmem:[#allocation8 + $0x1198] sm:$0xff] }
 0x1da   :  { %4654 = vtanh.f32 %v515_v46  ;;  %3704 = vmatpush1.bf16.msra.mxu1 %v3703_v45  ;;  %3928 = vmatpush1.bf16.msra.mxu0 %v3927_v48  ;;  %v3719_v46 = vpack.c.bf16 %v1136_v29, %v1129_v26  ;;  %v1143_v48 = vld [vmem:[#allocation8 + $0xee0] sm:$0xff]  ;;  %v1185_v23 = vld [vmem:[#allocation8 + $0x1030] sm:$0xff]  ;;  %v3957_v26 = vpack.c.bf16 %v1195_v20, %v1188_v19  ;;  %v1244_v19 = vld [vmem:[#allocation8 + $0x1208] sm:$0xff] }
 0x1db   :  { %3706 = vmatprep.subr.bf16.mxu1 %v3705_v49  ;;  %3930 = vmatprep.subr.bf16.mxu0 %v3929_v52  ;;  %4656 = vtanh.f32 %v588_v57  ;;  %v1150_v49 = vld [vmem:[#allocation8 + $0xf18] sm:$0xff]  ;;  %v1152_v52 = vld [vmem:[#allocation8 + $0xf28] sm:$0xff]  ;;  %v1167_v57 = vld [vmem:[#allocation8 + $0xfa0] sm:$0xff] }
 0x1dc   :  { %v3723_v58 = vpack.c.bf16 %v1150_v49, %v1143_v48  ;;  %v3947_v59 = vpack.c.bf16 %v1152_v52, %v1145_v51  ;;  %v3949_v0 = vpack.c.bf16 %v1167_v57, %v1160_v56  ;;  %v1187_v29 = vld [vmem:[#allocation8 + $0x1040] sm:$0xff]  ;;  %v1208_v51 = vld [vmem:[#allocation8 + $0x10e8] sm:$0xff]  ;;  %v1214_v52 = vld [vmem:[#allocation8 + $0x1118] sm:$0xff] }
 0x1dd   :  { %v1216_v56 = vld [vmem:[#allocation8 + $0x1128] sm:$0xff]  ;;  %v1223_v57 = vld [vmem:[#allocation8 + $0x1160] sm:$0xff]  ;;  %v1237_v6 = vld [vmem:[#allocation8 + $0x11d0] sm:$0xff] }
 0x1de   :  { %3708 = vmatpush1.bf16.msra.mxu1 %v3707_v62  ;;  %3932 = vmatpush1.bf16.msra.mxu0 %v3931_v63  ;;  %v1164_v62 = vld [vmem:[#allocation8 + $0xf88] sm:$0xff]  ;;  %v3725_v63 = vpack.c.bf16 %v1165_v54, %v1158_v53  ;;  %v1221_v54 = vld [vmem:[#allocation8 + $0x1150] sm:$0xff]  ;;  %v1251_v20 = vld [vmem:[#allocation8 + $0x1240] sm:$0xff] }
 0x1df   :  { %3710 = vmatprep.subr.bf16.mxu1 %v3709_v2  ;;  %3934 = vmatprep.subr.bf16.mxu0 %v3933_v3  ;;  %v1166_v2 = vld [vmem:[#allocation8 + $0xf98] sm:$0xff]  ;;  %v1172_v3 = vld [vmem:[#allocation8 + $0xfc8] sm:$0xff]  ;;  %v3727_v28 = vpack.c.bf16 %v1164_v62, %v1157_v60  ;;  %v1213_v60 = vld [vmem:[#allocation8 + $0x1110] sm:$0xff] }
 0x1e0   :  { %v3951_v7 = vpack.c.bf16 %v1166_v2, %v1159_v1  ;;  %v1220_v62 = vld [vmem:[#allocation8 + $0x1148] sm:$0xff]  ;;  %v1215_v1 = vld [vmem:[#allocation8 + $0x1120] sm:$0xff]  ;;  %v1222_v2 = vld [vmem:[#allocation8 + $0x1158] sm:$0xff] }
 0x1e2   :  { %3712 = vmatpush1.bf16.msra.mxu1 %v3711_v10  ;;  %3936 = vmatpush1.bf16.msra.mxu0 %v3935_v11  ;;  %v1178_v10 = vld [vmem:[#allocation8 + $0xff8] sm:$0xff]  ;;  %v3729_v11 = vpack.c.bf16 %v1179_v4, %v1172_v3  ;;  %v1228_v3 = vld [vmem:[#allocation8 + $0x1188] sm:$0xff]  ;;  %v1235_v4 = vld [vmem:[#allocation8 + $0x11c0] sm:$0xff] }
 0x1e3   :  { %v5053_v30 = vpop.eup %4652  ;;  %3714 = vmatprep.subr.bf16.mxu1 %v3713_v14  ;;  %3938 = vmatprep.subr.bf16.mxu0 %v3937_v16  ;;  %v1180_v14 = vld [vmem:[#allocation8 + $0x1008] sm:$0xff]  ;;  %v1186_v16 = vld [vmem:[#allocation8 + $0x1038] sm:$0xff]  ;;  %v3731_v21 = vpack.c.bf16 %v1178_v10, %v1171_v8  ;;  %v1227_v8 = vld [vmem:[#allocation8 + $0x1180] sm:$0xff] }
 0x1e4   :  { %v5055_v40 = vpop.eup %4654  ;;  %1623 = vmatprep.mubr.f32.mxu1 %v5053_v30  ;;  %1907 = vmatprep.mubr.f32.mxu0 %v5053_v30  ;;  %v3955_v22 = vpack.c.bf16 %v1180_v14, %v1173_v15  ;;  %v1234_v10 = vld [vmem:[#allocation8 + $0x11b8] sm:$0xff]  ;;  %v1229_v15 = vld [vmem:[#allocation8 + $0x1190] sm:$0xff]  ;;  %v1236_v14 = vld [vmem:[#allocation8 + $0x11c8] sm:$0xff] }
 0x1e5   :  { %v5059_v45 = vpop.eup %4656  ;;  %1624 = vmatmul.mubr.f32.vlgmr.msra.gmra.mrb[6].mxu1 %v5055_v40  ;;  %1908 = vmatmul.mubr.f32.vlgmr.msra.gmra.mrb[2].mxu0 %v5055_v40 }
 0x1e6   :  { %3716 = vmatpush1.bf16.msra.mxu1 %v3715_v24  ;;  %3940 = vmatpush1.bf16.msra.mxu0 %v3939_v25  ;;  %v1192_v24 = vld [vmem:[#allocation8 + $0x1068] sm:$0xff]  ;;  %v3733_v25 = vpack.c.bf16 %v1193_v17, %v1186_v16  ;;  %v1242_v16 = vld [vmem:[#allocation8 + $0x11f8] sm:$0xff]  ;;  %v1249_v17 = vld [vmem:[#allocation8 + $0x1230] sm:$0xff] }
 0x1e7   :  { %3718 = vmatprep.subr.bf16.mxu1 %v3717_v31  ;;  %3942 = vmatprep.subr.bf16.mxu0 %v3941_v32  ;;  %v1194_v31 = vld [vmem:[#allocation8 + $0x1078] sm:$0xff]  ;;  %v1200_v32 = vld [vmem:[#allocation8 + $0x10a8] sm:$0xff]  ;;  %v3735_v43 = vpack.c.bf16 %v1192_v24, %v1185_v23  ;;  %v1241_v23 = vld [vmem:[#allocation8 + $0x11f0] sm:$0xff] }
 0x1e8   :  { %1694 = vmatprep.mubr.f32.mxu1 %v5059_v45  ;;  %1978 = vmatprep.mubr.f32.mxu0 %v5059_v45  ;;  %v3959_v44 = vpack.c.bf16 %v1194_v31, %v1187_v29  ;;  %v3737_v49 = vpack.c.bf16 %v1207_v37, %v1200_v32  ;;  %v1248_v24 = vld [vmem:[#allocation8 + $0x1228] sm:$0xff]  ;;  %v1243_v29 = vld [vmem:[#allocation8 + $0x1200] sm:$0xff]  ;;  %v1250_v31 = vld [vmem:[#allocation8 + $0x1238] sm:$0xff] }
 0x1e9   :  { %v1256_v32 = vld [vmem:[#allocation8 + $0x1268] sm:$0xff]  ;;  %v1263_v37 = vld [vmem:[#allocation8 + $0x12a0] sm:$0xff] }
 0x1ea   :  { %3720 = vmatpush1.bf16.msra.mxu1 %v3719_v46  ;;  %3944 = vmatpush1.bf16.msra.mxu0 %v3943_v47  ;;  %v1199_v46 = vld [vmem:[#allocation8 + $0x10a0] sm:$0xff]  ;;  %v1206_v47 = vld [vmem:[#allocation8 + $0x10d8] sm:$0xff] }
 0x1eb   :  { %3722 = vmatprep.subr.bf16.mxu1 %v3721_v50  ;;  %3946 = vmatprep.subr.bf16.mxu0 %v3945_v41  ;;  %v3961_v50 = vpack.c.bf16 %v1209_v39, %v1202_v38  ;;  %v1201_v41 = vld [vmem:[#allocation8 + $0x10b0] sm:$0xff]  ;;  %v1258_v38 = vld [vmem:[#allocation8 + $0x1278] sm:$0xff] }
 0x1ec   :  { %v1265_v39 = vld [vmem:[#allocation8 + $0x12b0] sm:$0xff] }
 0x1ee   :  { %3724 = vmatpush1.bf16.msra.mxu1 %v3723_v58  ;;  %3948 = vmatpush1.bf16.msra.mxu0 %v3947_v59  ;;  %v3739_v58 = vpack.c.bf16 %v1206_v47, %v1199_v46  ;;  %v3963_v59 = vpack.c.bf16 %v1208_v51, %v1201_v41  ;;  %v1262_v46 = vld [vmem:[#allocation8 + $0x1298] sm:$0xff]  ;;  %v3753_v47 = vpack.c.bf16 %v1263_v37, %v1256_v32  ;;  %v1277_v51 = vld [vmem:[#allocation8 + $0x1310] sm:$0xff]  ;;  %v1312_v32 = vld [vmem:[#allocation8 + $0x1428] sm:$0xff] }
 0x1ef   :  { %3726 = vmatprep.subr.bf16.mxu1 %v3725_v63  ;;  %3950 = vmatprep.subr.bf16.mxu0 %v3949_v0  ;;  %v3741_v63 = vpack.c.bf16 %v1221_v54, %v1214_v52  ;;  %v3965_v0 = vpack.c.bf16 %v1223_v57, %v1216_v56  ;;  %v1270_v41 = vld [vmem:[#allocation8 + $0x12d8] sm:$0xff]  ;;  %v1272_v52 = vld [vmem:[#allocation8 + $0x12e8] sm:$0xff]  ;;  %v1279_v54 = vld [vmem:[#allocation8 + $0x1320] sm:$0xff] }
 0x1f2   :  { %3728 = vmatpush1.bf16.msra.mxu1 %v3727_v28  ;;  %3952 = vmatpush1.bf16.msra.mxu0 %v3951_v7  ;;  %v3743_v28 = vpack.c.bf16 %v1220_v62, %v1213_v60  ;;  %v3967_v7 = vpack.c.bf16 %v1222_v2, %v1215_v1  ;;  %v3757_v60 = vpack.c.bf16 %v1277_v51, %v1270_v41  ;;  %v1284_v1 = vld [vmem:[#allocation8 + $0x1348] sm:$0xff]  ;;  %v360_v2 = vsub.s32 4, %v5014_v33  ;;  %v1326_v41 = vld [vmem:[#allocation8 + $0x1498] sm:$0xff]  ;;  %v1333_v51 = vld [vmem:[#allocation8 + $0x14d0] sm:$0xff] }
 0x1f3   :  { %3730 = vmatprep.subr.bf16.mxu1 %v3729_v11  ;;  %3954 = vmatprep.subr.bf16.mxu0 %v3953_v13  ;;  %v3745_v11 = vpack.c.bf16 %v1235_v4, %v1228_v3  ;;  %v3969_v13 = vpack.c.bf16 %v1237_v6, %v1230_v5  ;;  %v3981_v62 = vpack.c.bf16 %v1279_v54, %v1272_v52  ;;  %v1291_v3 = vld [vmem:[#allocation8 + $0x1380] sm:$0xff]  ;;  %v1286_v4 = vld [vmem:[#allocation8 + $0x1358] sm:$0xff]  ;;  %v1293_v5 = vld [vmem:[#allocation8 + $0x1390] sm:$0xff] }
 0x1f4   :  { %v1328_v52 = vld [vmem:[#allocation8 + $0x14a8] sm:$0xff] }
 0x1f5   :  { %v3201_v42 = vpop.f32.mrb[4].mxu1 }
 0x1f6   :  { %3732 = vmatpush1.bf16.msra.mxu1 %v3731_v21  ;;  %3956 = vmatpush1.bf16.msra.mxu0 %v3955_v22  ;;  %v3202_v48 = vpop.f32.mrb[5].mxu1  ;;  %v3747_v21 = vpack.c.bf16 %v1234_v10, %v1227_v8  ;;  %v3971_v22 = vpack.c.bf16 %v1236_v14, %v1229_v15  ;;  %v1290_v8 = vld [vmem:[#allocation8 + $0x1378] sm:$0xff]  ;;  %v3761_v10 = vpack.c.bf16 %v1291_v3, %v1284_v1  ;;  %v1292_v15 = vld [vmem:[#allocation8 + $0x1388] sm:$0xff]  ;;  %v1347_v1 = vld [vmem:[#allocation8 + $0x1540] sm:$0xff] }
 0x1f7   :  { %3734 = vmatprep.subr.bf16.mxu1 %v3733_v25  ;;  %3958 = vmatprep.subr.bf16.mxu0 %v3957_v26  ;;  %v5065_v53 = vadd.f32 %v3202_v48, %v3201_v42  ;;  %v3749_v25 = vpack.c.bf16 %v1249_v17, %v1242_v16  ;;  %v3973_v26 = vpack.c.bf16 %v1251_v20, %v1244_v19  ;;  %v1298_v14 = vld [vmem:[#allocation8 + $0x13b8] sm:$0xff]  ;;  %v1305_v17 = vld [vmem:[#allocation8 + $0x13f0] sm:$0xff]  ;;  %v1300_v19 = vld [vmem:[#allocation8 + $0x13c8] sm:$0xff] }
 0x1f8   :  { %v3751_v42 = vpack.c.bf16 %v1248_v24, %v1241_v23  ;;  %v3977_v48 = vpack.c.bf16 %v1265_v39, %v1258_v38  ;;  %v361_v16 = vrot.slane %v5019_v35, %v360_v2  ;;  %v1307_v20 = vld [vmem:[#allocation8 + $0x1400] sm:$0xff]  ;;  %v1297_v23 = vld [vmem:[#allocation8 + $0x13b0] sm:$0xff]  ;;  %v1304_v24 = vld [vmem:[#allocation8 + $0x13e8] sm:$0xff] }
 0x1f9   :  { %v1319_v38 = vld [vmem:[#allocation8 + $0x1460] sm:$0xff]  ;;  %v1314_v35 = vld [vmem:[#allocation8 + $0x1438] sm:$0xff]  ;;  %v1321_v39 = vld [vmem:[#allocation8 + $0x1470] sm:$0xff] }
 0x1fa   :  { %3736 = vmatpush1.bf16.msra.mxu1 %v3735_v43  ;;  %3960 = vmatpush1.bf16.msra.mxu0 %v3959_v44  ;;  %v3975_v43 = vpack.c.bf16 %v1250_v31, %v1243_v29  ;;  %v1255_v44 = vld [vmem:[#allocation8 + $0x1260] sm:$0xff]  ;;  %v1306_v31 = vld [vmem:[#allocation8 + $0x13f8] sm:$0xff]  ;;  %v586_v37 = vadd.f32 %v5036_v27, %v361_v16  ;;  %v1356_v16 = vld [vmem:[#allocation8 + $0x1588] sm:$0xff] }
 0x1fb   :  { %3738 = vmatprep.subr.bf16.mxu1 %v3737_v49  ;;  %3962 = vmatprep.subr.bf16.mxu0 %v3961_v50  ;;  %v1257_v49 = vld [vmem:[#allocation8 + $0x1270] sm:$0xff]  ;;  %v1264_v50 = vld [vmem:[#allocation8 + $0x12a8] sm:$0xff]  ;;  %v3755_v56 = vpack.c.bf16 %v1262_v46, %v1255_v44  ;;  %v1299_v29 = vld [vmem:[#allocation8 + $0x13c0] sm:$0xff] }
 0x1fc   :  { %v3979_v57 = vpack.c.bf16 %v1264_v50, %v1257_v49  ;;  %v1311_v44 = vld [vmem:[#allocation8 + $0x1420] sm:$0xff]  ;;  %v1318_v46 = vld [vmem:[#allocation8 + $0x1458] sm:$0xff]  ;;  %v1313_v49 = vld [vmem:[#allocation8 + $0x1430] sm:$0xff]  ;;  %4658 = vtanh.f32 %v586_v37 }
 0x1fd   :  { %v1320_v50 = vld [vmem:[#allocation8 + $0x1468] sm:$0xff]  ;;  %v1335_v27 = vld [vmem:[#allocation8 + $0x14e0] sm:$0xff]  ;;  %v3771_v54 = vpack.c.bf16 %v1318_v46, %v1311_v44  ;;  %v1342_v3 = vld [vmem:[#allocation8 + $0x1518] sm:$0xff] }
 0x1fe   :  { %3740 = vmatpush1.bf16.msra.mxu1 %v3739_v58  ;;  %3964 = vmatpush1.bf16.msra.mxu0 %v3963_v59  ;;  %v1269_v58 = vld [vmem:[#allocation8 + $0x12d0] sm:$0xff]  ;;  %v1276_v59 = vld [vmem:[#allocation8 + $0x1308] sm:$0xff]  ;;  %v1370_v37 = vld [vmem:[#allocation8 + $0x15f8] sm:$0xff] }
 0x1ff   :  { %3742 = vmatprep.subr.bf16.mxu1 %v3741_v63  ;;  %3966 = vmatprep.subr.bf16.mxu0 %v3965_v0  ;;  %v1271_v63 = vld [vmem:[#allocation8 + $0x12e0] sm:$0xff]  ;;  %v1278_v0 = vld [vmem:[#allocation8 + $0x1318] sm:$0xff]  ;;  %v3759_v6 = vpack.c.bf16 %v1276_v59, %v1269_v58  ;;  %v1332_v58 = vld [vmem:[#allocation8 + $0x14c8] sm:$0xff]  ;;  %v3773_v59 = vpack.c.bf16 %v1333_v51, %v1326_v41 }
 0x200   :  { %v1384_v41 = vld [vmem:[#allocation8 + $0x1668] sm:$0xff]  ;;  %v1391_v51 = vld [vmem:[#allocation8 + $0x16a0] sm:$0xff] }
 0x202   :  { %3744 = vmatpush1.bf16.msra.mxu1 %v3743_v28  ;;  %3968 = vmatpush1.bf16.msra.mxu0 %v3967_v7  ;;  %v3983_v28 = vpack.c.bf16 %v1278_v0, %v1271_v63  ;;  %v1283_v7 = vld [vmem:[#allocation8 + $0x1340] sm:$0xff]  ;;  %v1334_v63 = vld [vmem:[#allocation8 + $0x14d8] sm:$0xff]  ;;  %v1340_v0 = vld [vmem:[#allocation8 + $0x1508] sm:$0xff] }
 0x203   :  { %3746 = vmatprep.subr.bf16.mxu1 %v3745_v11  ;;  %3970 = vmatprep.subr.bf16.mxu0 %v3969_v13  ;;  %v3985_v11 = vpack.c.bf16 %v1293_v5, %v1286_v4  ;;  %v1285_v13 = vld [vmem:[#allocation8 + $0x1350] sm:$0xff] }
 0x204   :  { %v1349_v4 = vld [vmem:[#allocation8 + $0x1550] sm:$0xff] }
 0x206   :  { %3748 = vmatpush1.bf16.msra.mxu1 %v3747_v21  ;;  %3972 = vmatpush1.bf16.msra.mxu0 %v3971_v22  ;;  %v3763_v21 = vpack.c.bf16 %v1290_v8, %v1283_v7  ;;  %v3987_v22 = vpack.c.bf16 %v1292_v15, %v1285_v13  ;;  %v1346_v7 = vld [vmem:[#allocation8 + $0x1538] sm:$0xff]  ;;  %v3777_v8 = vpack.c.bf16 %v1347_v1, %v1340_v0  ;;  %v1348_v13 = vld [vmem:[#allocation8 + $0x1548] sm:$0xff]  ;;  %v368_v0 = vsub.s32 6, %v5014_v33  ;;  %v1403_v1 = vld [vmem:[#allocation8 + $0x1700] sm:$0xff] }
 0x207   :  { %3750 = vmatprep.subr.bf16.mxu1 %v3749_v25  ;;  %3974 = vmatprep.subr.bf16.mxu0 %v3973_v26  ;;  %v3765_v25 = vpack.c.bf16 %v1305_v17, %v1298_v14  ;;  %v3989_v26 = vpack.c.bf16 %v1307_v20, %v1300_v19  ;;  %v1354_v15 = vld [vmem:[#allocation8 + $0x1578] sm:$0xff]  ;;  %v1361_v14 = vld [vmem:[#allocation8 + $0x15b0] sm:$0xff]  ;;  %v1363_v17 = vld [vmem:[#allocation8 + $0x15c0] sm:$0xff]  ;;  %v5072_v19 = vpop.eup %4658 }
 0x208   :  { %v2828_v33 = vld [vmem:[#allocation11 + $0x648] sm:$0xff] }
 0x20a   :  { %3752 = vmatpush1.bf16.msra.mxu1 %v3751_v42  ;;  %3976 = vmatpush1.bf16.msra.mxu0 %v3975_v43  ;;  %v3767_v42 = vpack.c.bf16 %v1304_v24, %v1297_v23  ;;  %v3991_v43 = vpack.c.bf16 %v1306_v31, %v1299_v29  ;;  %v1360_v23 = vld [vmem:[#allocation8 + $0x15a8] sm:$0xff]  ;;  %v3781_v24 = vpack.c.bf16 %v1361_v14, %v1354_v15  ;;  %v1362_v29 = vld [vmem:[#allocation8 + $0x15b8] sm:$0xff] }
 0x20b   :  { %3754 = vmatprep.subr.bf16.mxu1 %v3753_v47  ;;  %3978 = vmatprep.subr.bf16.mxu0 %v3977_v48  ;;  %v3769_v47 = vpack.c.bf16 %v1319_v38, %v1312_v32  ;;  %v3993_v48 = vpack.c.bf16 %v1321_v39, %v1314_v35  ;;  %v1368_v31 = vld [vmem:[#allocation8 + $0x15e8] sm:$0xff]  ;;  %v1375_v32 = vld [vmem:[#allocation8 + $0x1620] sm:$0xff]  ;;  %v1377_v38 = vld [vmem:[#allocation8 + $0x1630] sm:$0xff] }
 0x20c   :  { %v3785_v44 = vpack.c.bf16 %v1375_v32, %v1368_v31  ;;  %v4009_v46 = vpack.c.bf16 %v1377_v38, %v1370_v37  ;;  %v1410_v15 = vld [vmem:[#allocation8 + $0x1738] sm:$0xff]  ;;  %v1411_v31 = vld [vmem:[#allocation8 + $0x1740] sm:$0xff]  ;;  %v1424_v37 = vld [vmem:[#allocation8 + $0x17a8] sm:$0xff] }
 0x20d   :  { %v4676_v14 = vld [vmem:[#allocation7] sm:$0xff] }
 0x20e   :  { %3756 = vmatpush1.bf16.msra.mxu1 %v3755_v56  ;;  %3980 = vmatpush1.bf16.msra.mxu0 %v3979_v57  ;;  %v3995_v56 = vpack.c.bf16 %v1320_v50, %v1313_v49  ;;  %v1325_v57 = vld [vmem:[#allocation8 + $0x1490] sm:$0xff]  ;;  %v1382_v49 = vld [vmem:[#allocation8 + $0x1658] sm:$0xff] }
 0x20f   :  { %3758 = vmatprep.subr.bf16.mxu1 %v3757_v60  ;;  %3982 = vmatprep.subr.bf16.mxu0 %v3981_v62  ;;  %v3997_v60 = vpack.c.bf16 %v1335_v27, %v1328_v52  ;;  %v1327_v62 = vld [vmem:[#allocation8 + $0x14a0] sm:$0xff]  ;;  %v3775_v5 = vpack.c.bf16 %v1332_v58, %v1325_v57  ;;  %v1389_v50 = vld [vmem:[#allocation8 + $0x1690] sm:$0xff]  ;;  %v4874_v52 = vmov 0.0   ;;  %v1388_v57 = vld [vmem:[#allocation8 + $0x1688] sm:$0xff] }
 0x210   :  { %v3789_v58 = vpack.c.bf16 %v1389_v50, %v1382_v49  ;;  %v1418_v32 = vld [vmem:[#allocation8 + $0x1778] sm:$0xff]  ;;  %v1425_v50 = vld [vmem:[#allocation8 + $0x17b0] sm:$0xff] }
 0x212   :  { %3760 = vmatpush1.bf16.msra.mxu1 %v3759_v6  ;;  %3984 = vmatpush1.bf16.msra.mxu0 %v3983_v28  ;;  %v3999_v6 = vpack.c.bf16 %v1334_v63, %v1327_v62  ;;  %v1339_v28 = vld [vmem:[#allocation8 + $0x1500] sm:$0xff]  ;;  %v1390_v62 = vld [vmem:[#allocation8 + $0x1698] sm:$0xff]  ;;  %v1396_v63 = vld [vmem:[#allocation8 + $0x16c8] sm:$0xff] }
 0x213   :  { %3762 = vmatprep.subr.bf16.mxu1 %v3761_v10  ;;  %3986 = vmatprep.subr.bf16.mxu0 %v3985_v11  ;;  %v4001_v10 = vpack.c.bf16 %v1349_v4, %v1342_v3  ;;  %v1341_v11 = vld [vmem:[#allocation8 + $0x1510] sm:$0xff]  ;;  %v3779_v20 = vpack.c.bf16 %v1346_v7, %v1339_v28  ;;  %v1398_v3 = vld [vmem:[#allocation8 + $0x16d8] sm:$0xff]  ;;  %v1395_v28 = vld [vmem:[#allocation8 + $0x16c0] sm:$0xff] }
 0x214   :  { %v1405_v4 = vld [vmem:[#allocation8 + $0x1710] sm:$0xff]  ;;  %v1402_v7 = vld [vmem:[#allocation8 + $0x16f8] sm:$0xff] }
 0x216   :  { %3764 = vmatpush1.bf16.msra.mxu1 %v3763_v21  ;;  %3988 = vmatpush1.bf16.msra.mxu0 %v3987_v22  ;;  %v4003_v21 = vpack.c.bf16 %v1348_v13, %v1341_v11  ;;  %v1353_v22 = vld [vmem:[#allocation8 + $0x1570] sm:$0xff]  ;;  %v1404_v13 = vld [vmem:[#allocation8 + $0x1708] sm:$0xff] }
 0x217   :  { %3766 = vmatprep.subr.bf16.mxu1 %v3765_v25  ;;  %3990 = vmatprep.subr.bf16.mxu0 %v3989_v26  ;;  %v4005_v25 = vpack.c.bf16 %v1363_v17, %v1356_v16  ;;  %v1355_v26 = vld [vmem:[#allocation8 + $0x1580] sm:$0xff]  ;;  %v3783_v35 = vpack.c.bf16 %v1360_v23, %v1353_v22  ;;  %v1397_v11 = vld [vmem:[#allocation8 + $0x16d0] sm:$0xff]  ;;  %v369_v16 = vrot.slane %v4676_v14, %v368_v0  ;;  %v680_v14 = vld [vmem:[#allocation8 + $0x68] sm:$0xff] }
 0x218   :  { %v4007_v39 = vpack.c.bf16 %v1362_v29, %v1355_v26  ;;  %v1417_v17 = vld [vmem:[#allocation8 + $0x1770] sm:$0xff]  ;;  %v3795_v22 = vpack.c.bf16 %v1402_v7, %v1395_v28  ;;  %v4019_v23 = vpack.c.bf16 %v1404_v13, %v1397_v11  ;;  %v671_v11 = vld [vmem:[#allocation8 + $0x20] sm:$0xff]  ;;  %v678_v13 = vld [vmem:[#allocation8 + $0x58] sm:$0xff] }
 0x219   :  { %v3797_v26 = vpack.c.bf16 %v1417_v17, %v1410_v15  ;;  %v657_v38 = vadd.f32 %v5065_v53, %v369_v16  ;;  %v1447_v53 = vld [vmem:[#allocation8 + $0x1860] sm:$0xff]  ;;  %v673_v15 = vld [vmem:[#allocation8 + $0x30] sm:$0xff]  ;;  %v686_v16 = vld [vmem:[#allocation8 + $0x98] sm:$0xff] }
 0x21a   :  { %3768 = vmatpush1.bf16.msra.mxu1 %v3767_v42  ;;  %3992 = vmatpush1.bf16.msra.mxu0 %v3991_v43  ;;  %v1367_v42 = vld [vmem:[#allocation8 + $0x15e0] sm:$0xff]  ;;  %v1374_v43 = vld [vmem:[#allocation8 + $0x1618] sm:$0xff]  ;;  %v693_v17 = vld [vmem:[#allocation8 + $0xd0] sm:$0xff] }
 0x21b   :  { %3770 = vmatprep.subr.bf16.mxu1 %v3769_v47  ;;  %3994 = vmatprep.subr.bf16.mxu0 %v3993_v48  ;;  %v1369_v47 = vld [vmem:[#allocation8 + $0x15f0] sm:$0xff]  ;;  %v1376_v48 = vld [vmem:[#allocation8 + $0x1628] sm:$0xff]  ;;  %v3787_v27 = vpack.c.bf16 %v1374_v43, %v1367_v42  ;;  %4660 = vtanh.f32 %v657_v38 }
 0x21c   :  { %v1433_v42 = vld [vmem:[#allocation8 + $0x17f0] sm:$0xff]  ;;  %v700_v38 = vld [vmem:[#allocation8 + $0x108] sm:$0xff] }
 0x21e   :  { %3772 = vmatpush1.bf16.msra.mxu1 %v3771_v54  ;;  %3996 = vmatpush1.bf16.msra.mxu0 %v3995_v56  ;;  %v4011_v54 = vpack.c.bf16 %v1376_v48, %v1369_v47  ;;  %v1381_v56 = vld [vmem:[#allocation8 + $0x1650] sm:$0xff]  ;;  %v1430_v47 = vld [vmem:[#allocation8 + $0x17d8] sm:$0xff] }
 0x21f   :  { %3774 = vmatprep.subr.bf16.mxu1 %v3773_v59  ;;  %3998 = vmatprep.subr.bf16.mxu0 %v3997_v60  ;;  %v4013_v59 = vpack.c.bf16 %v1391_v51, %v1384_v41  ;;  %v1383_v60 = vld [vmem:[#allocation8 + $0x1660] sm:$0xff]  ;;  %v1432_v41 = vld [vmem:[#allocation8 + $0x17e8] sm:$0xff]  ;;  %v1438_v51 = vld [vmem:[#allocation8 + $0x1818] sm:$0xff] }
 0x222   :  { %3776 = vmatpush1.bf16.msra.mxu1 %v3775_v5  ;;  %4000 = vmatpush1.bf16.msra.mxu0 %v3999_v6  ;;  %v3791_v5 = vpack.c.bf16 %v1388_v57, %v1381_v56  ;;  %v4015_v6 = vpack.c.bf16 %v1390_v62, %v1383_v60  ;;  %v4027_v57 = vpack.c.bf16 %v1432_v41, %v1425_v50  ;;  %v708_v41 = vld [vmem:[#allocation8 + $0x148] sm:$0xff] }
 0x223   :  { %3778 = vmatprep.subr.bf16.mxu1 %v3777_v8  ;;  %4002 = vmatprep.subr.bf16.mxu0 %v4001_v10  ;;  %v3793_v8 = vpack.c.bf16 %v1403_v1, %v1396_v63  ;;  %v4017_v10 = vpack.c.bf16 %v1405_v4, %v1398_v3  ;;  %v1439_v63 = vld [vmem:[#allocation8 + $0x1820] sm:$0xff]  ;;  %v1446_v1 = vld [vmem:[#allocation8 + $0x1858] sm:$0xff]  ;;  %v672_v3 = vld [vmem:[#allocation8 + $0x28] sm:$0xff] }
 0x224   :  { %v679_v4 = vld [vmem:[#allocation8 + $0x60] sm:$0xff]  ;;  %v4031_v7 = vpack.c.bf16 %v1446_v1, %v1439_v63  ;;  %v722_v63 = vld [vmem:[#allocation8 + $0x1b8] sm:$0xff]  ;;  %v728_v1 = vld [vmem:[#allocation8 + $0x1e8] sm:$0xff] }
 0x225   :  { %1695 = vmatmul.mubr.f32.vlgmr.msra.gmra.mrb[6].mxu1 %v5072_v19  ;;  %1979 = vmatmul.mubr.f32.vlgmr.msra.gmra.mrb[2].mxu0 %v5072_v19 }
 0x226   :  { %3780 = vmatpush1.bf16.msra.mxu1 %v3779_v20  ;;  %4004 = vmatpush1.bf16.msra.mxu0 %v4003_v21  ;;  %v1412_v20 = vld [vmem:[#allocation8 + $0x1748] sm:$0xff]  ;;  %v1419_v21 = vld [vmem:[#allocation8 + $0x1780] sm:$0xff] }
 0x227   :  { %3782 = vmatprep.subr.bf16.mxu1 %v3781_v24  ;;  %4006 = vmatprep.subr.bf16.mxu0 %v4005_v25  ;;  %v1409_v24 = vld [vmem:[#allocation8 + $0x1730] sm:$0xff]  ;;  %v1416_v25 = vld [vmem:[#allocation8 + $0x1768] sm:$0xff]  ;;  %v4021_v29 = vpack.c.bf16 %v1419_v21, %v1412_v20  ;;  %v799_v20 = vld [vmem:[#allocation8 + $0x420] sm:$0xff] }
 0x228   :  { %1765 = vmatprep.mubr.f32.mxu1 %v4874_v52  ;;  %2049 = vmatprep.mubr.f32.mxu0 %v4874_v52  ;;  %v3799_v43 = vpack.c.bf16 %v1416_v25, %v1409_v24  ;;  %v806_v21 = vld [vmem:[#allocation8 + $0x458] sm:$0xff]  ;;  %v4259_v24 = vpack.c.bf16 %v680_v14, %v673_v15  ;;  %v685_v25 = vld [vmem:[#allocation8 + $0x90] sm:$0xff]  ;;  %v736_v15 = vld [vmem:[#allocation8 + $0x228] sm:$0xff] }
 0x229   :  { %v742_v14 = vld [vmem:[#allocation8 + $0x258] sm:$0xff] }
 0x22a   :  { %3784 = vmatpush1.bf16.msra.mxu1 %v3783_v35  ;;  %4008 = vmatpush1.bf16.msra.mxu0 %v4007_v39  ;;  %v1431_v35 = vld [vmem:[#allocation8 + $0x17e0] sm:$0xff]  ;;  %v1426_v39 = vld [vmem:[#allocation8 + $0x17b8] sm:$0xff] }
 0x22b   :  { %3786 = vmatprep.subr.bf16.mxu1 %v3785_v44  ;;  %4010 = vmatprep.subr.bf16.mxu0 %v4009_v46  ;;  %v4023_v44 = vpack.c.bf16 %v1418_v32, %v1411_v31  ;;  %v1423_v46 = vld [vmem:[#allocation8 + $0x17a0] sm:$0xff]  ;;  %v3801_v48 = vpack.c.bf16 %v1431_v35, %v1424_v37  ;;  %v4025_v49 = vpack.c.bf16 %v1433_v42, %v1426_v39  ;;  %v694_v37 = vld [vmem:[#allocation8 + $0xd8] sm:$0xff]  ;;  %v813_v39 = vld [vmem:[#allocation8 + $0x490] sm:$0xff] }
 0x22c   :  { %v3803_v56 = vpack.c.bf16 %v1430_v47, %v1423_v46  ;;  %v4037_v31 = vpack.c.bf16 %v693_v17, %v686_v16  ;;  %v4261_v32 = vpack.c.bf16 %v806_v21, %v799_v20  ;;  %v707_v35 = vld [vmem:[#allocation8 + $0x140] sm:$0xff]  ;;  %v820_v42 = vld [vmem:[#allocation8 + $0x4c8] sm:$0xff]  ;;  %v749_v16 = vld [vmem:[#allocation8 + $0x290] sm:$0xff] }
 0x22d   :  { %v4041_v46 = vpack.c.bf16 %v707_v35, %v700_v38  ;;  %v699_v47 = vld [vmem:[#allocation8 + $0x100] sm:$0xff]  ;;  %v4265_v50 = vpack.c.bf16 %v820_v42, %v813_v39  ;;  %v862_v20 = vld [vmem:[#allocation8 + $0x618] sm:$0xff]  ;;  %v869_v35 = vld [vmem:[#allocation8 + $0x650] sm:$0xff] }
 0x22e   :  { %3788 = vmatpush1.bf16.msra.mxu1 %v3787_v27  ;;  %4012 = vmatpush1.bf16.msra.mxu0 %v4011_v54  ;;  %v1445_v27 = vld [vmem:[#allocation8 + $0x1850] sm:$0xff]  ;;  %v1440_v54 = vld [vmem:[#allocation8 + $0x1828] sm:$0xff]  ;;  %v855_v17 = vld [vmem:[#allocation8 + $0x5e0] sm:$0xff] }
 0x22f   :  { %3790 = vmatprep.subr.bf16.mxu1 %v3789_v58  ;;  %4014 = vmatprep.subr.bf16.mxu0 %v4013_v59  ;;  %v1437_v58 = vld [vmem:[#allocation8 + $0x1810] sm:$0xff]  ;;  %v1444_v59 = vld [vmem:[#allocation8 + $0x1848] sm:$0xff]  ;;  %v3805_v60 = vpack.c.bf16 %v1445_v27, %v1438_v51  ;;  %v4029_v62 = vpack.c.bf16 %v1447_v53, %v1440_v54  ;;  %v714_v51 = vld [vmem:[#allocation8 + $0x178] sm:$0xff] }
 0x230   :  { %v3807_v28 = vpack.c.bf16 %v1444_v59, %v1437_v58  ;;  %v721_v27 = vld [vmem:[#allocation8 + $0x1b0] sm:$0xff]  ;;  %v827_v54 = vld [vmem:[#allocation8 + $0x500] sm:$0xff]  ;;  %v834_v53 = vld [vmem:[#allocation8 + $0x538] sm:$0xff] }
 0x231   :  { %v4045_v58 = vpack.c.bf16 %v721_v27, %v714_v51  ;;  %v720_v59 = vld [vmem:[#allocation8 + $0x1a8] sm:$0xff]  ;;  %v763_v38 = vld [vmem:[#allocation8 + $0x300] sm:$0xff]  ;;  %v777_v51 = vld [vmem:[#allocation8 + $0x370] sm:$0xff] }
 0x232   :  { %3792 = vmatpush1.bf16.msra.mxu1 %v3791_v5  ;;  %4016 = vmatpush1.bf16.msra.mxu0 %v4015_v6  ;;  %v785_v5 = vld [vmem:[#allocation8 + $0x3b0] sm:$0xff]  ;;  %v792_v6 = vld [vmem:[#allocation8 + $0x3e8] sm:$0xff]  ;;  %v883_v27 = vld [vmem:[#allocation8 + $0x6c0] sm:$0xff] }
 0x233   :  { %3794 = vmatprep.subr.bf16.mxu1 %v3793_v8  ;;  %4018 = vmatprep.subr.bf16.mxu0 %v4017_v10  ;;  %v4033_v8 = vpack.c.bf16 %v679_v4, %v672_v3  ;;  %v4257_v10 = vpack.c.bf16 %v792_v6, %v785_v5  ;;  %v735_v3 = vld [vmem:[#allocation8 + $0x220] sm:$0xff]  ;;  %v841_v4 = vld [vmem:[#allocation8 + $0x570] sm:$0xff]  ;;  %v848_v5 = vld [vmem:[#allocation8 + $0x5a8] sm:$0xff] }
 0x234   :  { %v876_v39 = vld [vmem:[#allocation8 + $0x688] sm:$0xff] }
 0x236   :  { %3796 = vmatpush1.bf16.msra.mxu1 %v3795_v22  ;;  %4020 = vmatpush1.bf16.msra.mxu0 %v4019_v23  ;;  %v5082_v22 = vpop.eup %4660  ;;  %v4035_v23 = vpack.c.bf16 %v678_v13, %v671_v11  ;;  %v729_v11 = vld [vmem:[#allocation8 + $0x1f0] sm:$0xff]  ;;  %v4273_v13 = vpack.c.bf16 %v848_v5, %v841_v4  ;;  %v1016_v4 = vld [vmem:[#allocation8 + $0xae8] sm:$0xff] }
 0x237   :  { %3798 = vmatprep.subr.bf16.mxu1 %v3797_v26  ;;  %4022 = vmatprep.subr.bf16.mxu0 %v4021_v29  ;;  %v692_v26 = vld [vmem:[#allocation8 + $0xc8] sm:$0xff]  ;;  %v687_v29 = vld [vmem:[#allocation8 + $0xa0] sm:$0xff] }
 0x23a   :  { %3800 = vmatpush1.bf16.msra.mxu1 %v3799_v43  ;;  %4024 = vmatpush1.bf16.msra.mxu0 %v4023_v44  ;;  %v4039_v43 = vpack.c.bf16 %v692_v26, %v685_v25  ;;  %v4263_v44 = vpack.c.bf16 %v694_v37, %v687_v29  ;;  %v741_v25 = vld [vmem:[#allocation8 + $0x250] sm:$0xff]  ;;  %v748_v26 = vld [vmem:[#allocation8 + $0x288] sm:$0xff]  ;;  %v743_v29 = vld [vmem:[#allocation8 + $0x260] sm:$0xff] }
 0x23b   :  { %3802 = vmatprep.subr.bf16.mxu1 %v3801_v48  ;;  %4026 = vmatprep.subr.bf16.mxu0 %v4025_v49  ;;  %v706_v48 = vld [vmem:[#allocation8 + $0x138] sm:$0xff]  ;;  %v701_v49 = vld [vmem:[#allocation8 + $0x110] sm:$0xff]  ;;  %v756_v37 = vld [vmem:[#allocation8 + $0x2c8] sm:$0xff]  ;;  %v4055_v42 = vpack.c.bf16 %v748_v26, %v741_v25 }
 0x23c   :  { %v911_v25 = vld [vmem:[#allocation8 + $0x7a0] sm:$0xff] }
 0x23e   :  { %3804 = vmatpush1.bf16.msra.mxu1 %v3803_v56  ;;  %4028 = vmatpush1.bf16.msra.mxu0 %v4027_v57  ;;  %v4043_v56 = vpack.c.bf16 %v706_v48, %v699_v47  ;;  %v4267_v57 = vpack.c.bf16 %v708_v41, %v701_v49  ;;  %v762_v47 = vld [vmem:[#allocation8 + $0x2f8] sm:$0xff]  ;;  %v757_v48 = vld [vmem:[#allocation8 + $0x2d0] sm:$0xff]  ;;  %v4281_v49 = vpack.c.bf16 %v876_v39, %v869_v35  ;;  %v1044_v35 = vld [vmem:[#allocation8 + $0xbc8] sm:$0xff] }
 0x23f   :  { %3806 = vmatprep.subr.bf16.mxu1 %v3805_v60  ;;  %4030 = vmatprep.subr.bf16.mxu0 %v4029_v62  ;;  %v715_v60 = vld [vmem:[#allocation8 + $0x180] sm:$0xff]  ;;  %v4269_v62 = vpack.c.bf16 %v834_v53, %v827_v54  ;;  %v770_v41 = vld [vmem:[#allocation8 + $0x338] sm:$0xff] }
 0x240   :  { %v890_v54 = vld [vmem:[#allocation8 + $0x6f8] sm:$0xff] }
 0x242   :  { %3808 = vmatpush1.bf16.msra.mxu1 %v3807_v28  ;;  %4032 = vmatpush1.bf16.msra.mxu0 %v4031_v7  ;;  %v4271_v28 = vpack.c.bf16 %v722_v63, %v715_v60  ;;  %v4049_v7 = vpack.c.bf16 %v735_v3, %v728_v1  ;;  %v4285_v60 = vpack.c.bf16 %v890_v54, %v883_v27  ;;  %v784_v63 = vld [vmem:[#allocation8 + $0x3a8] sm:$0xff]  ;;  %v791_v1 = vld [vmem:[#allocation8 + $0x3e0] sm:$0xff]  ;;  %v1009_v3 = vld [vmem:[#allocation8 + $0xab0] sm:$0xff] }
 0x243   :  { %4034 = vmatprep.subr.bf16.mxu1 %v4033_v8  ;;  %4258 = vmatprep.subr.bf16.mxu0 %v4257_v10  ;;  %v727_v8 = vld [vmem:[#allocation8 + $0x1e0] sm:$0xff]  ;;  %v734_v10 = vld [vmem:[#allocation8 + $0x218] sm:$0xff] }
 0x244   :  { %v4051_v21 = vpack.c.bf16 %v734_v10, %v727_v8  ;;  %v790_v8 = vld [vmem:[#allocation8 + $0x3d8] sm:$0xff]  ;;  %v4289_v10 = vpack.c.bf16 %v1016_v4, %v1009_v3  ;;  %v1072_v3 = vld [vmem:[#allocation8 + $0xca8] sm:$0xff] }
 0x245   :  { %1766 = vmatmul.mubr.f32.vlgmr.msra.gmra.mrb[6].mxu1 %v5082_v22  ;;  %2050 = vmatmul.mubr.f32.vlgmr.msra.gmra.mrb[2].mxu0 %v5082_v22  ;;  %v1058_v27 = vld [vmem:[#allocation8 + $0xc38] sm:$0xff] }
 0x246   :  { %4036 = vmatpush1.bf16.msra.mxu1 %v4035_v23  ;;  %2120 = vmatprep.mubr.f32.mxu1 %v5028_v55  ;;  %v4275_v23 = vpack.c.bf16 %v736_v15, %v729_v11  ;;  %v897_v11 = vld [vmem:[#allocation8 + $0x730] sm:$0xff]  ;;  %v798_v15 = vld [vmem:[#allocation8 + $0x418] sm:$0xff] }
 0x247   :  { %4260 = vmatpush3.bf16.msra.mxu0 %v4259_v24  ;;  %2404 = vmatprep.mubr.f32.mxu0 %v5028_v55  ;;  %v713_v55 = vld [vmem:[#allocation8 + $0x170] sm:$0xff]  ;;  %v4053_v24 = vpack.c.bf16 %v749_v16, %v742_v14  ;;  %v1023_v16 = vld [vmem:[#allocation8 + $0xb20] sm:$0xff] }
 0x248   :  { %4038 = vmatprep.subr.bf16.mxu1 %v4037_v31  ;;  %4262 = vmatprep.subr.bf16.mxu0 %v4261_v32  ;;  %v4047_v6 = vpack.c.bf16 %v720_v59, %v713_v55  ;;  %v4277_v31 = vpack.c.bf16 %v862_v20, %v855_v17  ;;  %v750_v32 = vld [vmem:[#allocation8 + $0x298] sm:$0xff]  ;;  %v776_v55 = vld [vmem:[#allocation8 + $0x368] sm:$0xff]  ;;  %v771_v59 = vld [vmem:[#allocation8 + $0x340] sm:$0xff] }
 0x249   :  { %v805_v14 = vld [vmem:[#allocation8 + $0x450] sm:$0xff]  ;;  %v1030_v17 = vld [vmem:[#allocation8 + $0xb58] sm:$0xff] }
 0x24a   :  { %4040 = vmatpush1.bf16.msra.mxu1 %v4039_v43  ;;  %v4279_v43 = vpack.c.bf16 %v750_v32, %v743_v29  ;;  %v4069_v26 = vpack.c.bf16 %v805_v14, %v798_v15  ;;  %v4293_v29 = vpack.c.bf16 %v1030_v17, %v1023_v16  ;;  %v812_v32 = vld [vmem:[#allocation8 + $0x488] sm:$0xff]  ;;  %v861_v15 = vld [vmem:[#allocation8 + $0x610] sm:$0xff]  ;;  %v1079_v14 = vld [vmem:[#allocation8 + $0xce0] sm:$0xff] }
 0x24b   :  { %4264 = vmatpush3.bf16.msra.mxu0 %v4263_v44  ;;  %4042 = vmatprep.subr.bf16.mxu1 %v4041_v46  ;;  %v4057_v44 = vpack.c.bf16 %v763_v38, %v756_v37  ;;  %v755_v46 = vld [vmem:[#allocation8 + $0x2c0] sm:$0xff]  ;;  %v1037_v38 = vld [vmem:[#allocation8 + $0xb90] sm:$0xff]  ;;  %v1086_v16 = vld [vmem:[#allocation8 + $0xd18] sm:$0xff] }
 0x24c   :  { %4266 = vmatprep.subr.bf16.mxu0 %v4265_v50  ;;  %v764_v50 = vld [vmem:[#allocation8 + $0x308] sm:$0xff]  ;;  %v4059_v53 = vpack.c.bf16 %v762_v47, %v755_v46  ;;  %v819_v37 = vld [vmem:[#allocation8 + $0x4c0] sm:$0xff]  ;;  %v818_v46 = vld [vmem:[#allocation8 + $0x4b8] sm:$0xff] }
 0x24d   :  { %v925_v47 = vld [vmem:[#allocation8 + $0x810] sm:$0xff] }
 0x24e   :  { %4044 = vmatpush1.bf16.msra.mxu1 %v4043_v56  ;;  %v4283_v56 = vpack.c.bf16 %v764_v50, %v757_v48  ;;  %v4297_v48 = vpack.c.bf16 %v1044_v35, %v1037_v38  ;;  %v826_v50 = vld [vmem:[#allocation8 + $0x4f8] sm:$0xff]  ;;  %v1100_v38 = vld [vmem:[#allocation8 + $0xd88] sm:$0xff] }
 0x24f   :  { %4268 = vmatpush3.bf16.msra.mxu0 %v4267_v57  ;;  %4046 = vmatprep.subr.bf16.mxu1 %v4045_v58  ;;  %v4061_v57 = vpack.c.bf16 %v777_v51, %v770_v41  ;;  %v769_v58 = vld [vmem:[#allocation8 + $0x330] sm:$0xff]  ;;  %v1051_v51 = vld [vmem:[#allocation8 + $0xc00] sm:$0xff] }
 0x250   :  { %4270 = vmatprep.subr.bf16.mxu0 %v4269_v62  ;;  %v778_v62 = vld [vmem:[#allocation8 + $0x378] sm:$0xff]  ;;  %v4063_v5 = vpack.c.bf16 %v776_v55, %v769_v58  ;;  %v833_v41 = vld [vmem:[#allocation8 + $0x530] sm:$0xff]  ;;  %v832_v58 = vld [vmem:[#allocation8 + $0x528] sm:$0xff] }
 0x251   :  { %v939_v55 = vld [vmem:[#allocation8 + $0x880] sm:$0xff] }
 0x252   :  { %4048 = vmatpush1.bf16.msra.mxu1 %v4047_v6  ;;  %v4287_v6 = vpack.c.bf16 %v778_v62, %v771_v59  ;;  %v4301_v59 = vpack.c.bf16 %v1058_v27, %v1051_v51  ;;  %v840_v62 = vld [vmem:[#allocation8 + $0x568] sm:$0xff]  ;;  %v1114_v51 = vld [vmem:[#allocation8 + $0xdf8] sm:$0xff] }
 0x253   :  { %4272 = vmatpush3.bf16.msra.mxu0 %v4271_v28  ;;  %4050 = vmatprep.subr.bf16.mxu1 %v4049_v7  ;;  %v4065_v28 = vpack.c.bf16 %v791_v1, %v784_v63  ;;  %v783_v7 = vld [vmem:[#allocation8 + $0x3a0] sm:$0xff]  ;;  %v1065_v1 = vld [vmem:[#allocation8 + $0xc70] sm:$0xff] }
 0x254   :  { %4274 = vmatprep.subr.bf16.mxu0 %v4273_v13  ;;  %v904_v13 = vld [vmem:[#allocation8 + $0x768] sm:$0xff]  ;;  %v4067_v20 = vpack.c.bf16 %v790_v8, %v783_v7  ;;  %v847_v63 = vld [vmem:[#allocation8 + $0x5a0] sm:$0xff]  ;;  %v846_v7 = vld [vmem:[#allocation8 + $0x598] sm:$0xff] }
 0x255   :  { %v953_v8 = vld [vmem:[#allocation8 + $0x8f0] sm:$0xff] }
 0x256   :  { %4052 = vmatpush1.bf16.msra.mxu1 %v4051_v21  ;;  %v4291_v21 = vpack.c.bf16 %v904_v13, %v897_v11  ;;  %v960_v11 = vld [vmem:[#allocation8 + $0x928] sm:$0xff]  ;;  %v854_v13 = vld [vmem:[#allocation8 + $0x5d8] sm:$0xff] }
 0x257   :  { %4276 = vmatpush3.bf16.msra.mxu0 %v4275_v23  ;;  %4054 = vmatprep.subr.bf16.mxu1 %v4053_v24  ;;  %v797_v23 = vld [vmem:[#allocation8 + $0x410] sm:$0xff]  ;;  %v804_v24 = vld [vmem:[#allocation8 + $0x448] sm:$0xff] }
 0x258   :  { %4278 = vmatprep.subr.bf16.mxu0 %v4277_v31  ;;  %v918_v31 = vld [vmem:[#allocation8 + $0x7d8] sm:$0xff]  ;;  %v4071_v39 = vpack.c.bf16 %v804_v24, %v797_v23  ;;  %v853_v23 = vld [vmem:[#allocation8 + $0x5d0] sm:$0xff]  ;;  %v860_v24 = vld [vmem:[#allocation8 + $0x608] sm:$0xff] }
 0x259   :  { %v4087_v35 = vpack.c.bf16 %v860_v24, %v853_v23  ;;  %v1135_v23 = vld [vmem:[#allocation8 + $0xea0] sm:$0xff] }
 0x25a   :  { %4056 = vmatpush1.bf16.msra.mxu1 %v4055_v42  ;;  %v4295_v42 = vpack.c.bf16 %v918_v31, %v911_v25  ;;  %v967_v25 = vld [vmem:[#allocation8 + $0x960] sm:$0xff]  ;;  %v868_v31 = vld [vmem:[#allocation8 + $0x648] sm:$0xff] }
 0x25b   :  { %4280 = vmatpush3.bf16.msra.mxu0 %v4279_v43  ;;  %4058 = vmatprep.subr.bf16.mxu1 %v4057_v44  ;;  %v4073_v43 = vpack.c.bf16 %v819_v37, %v812_v32  ;;  %v811_v44 = vld [vmem:[#allocation8 + $0x480] sm:$0xff]  ;;  %v1093_v37 = vld [vmem:[#allocation8 + $0xd50] sm:$0xff] }
 0x25c   :  { %4282 = vmatprep.subr.bf16.mxu0 %v4281_v49  ;;  %v932_v49 = vld [vmem:[#allocation8 + $0x848] sm:$0xff]  ;;  %v4075_v54 = vpack.c.bf16 %v818_v46, %v811_v44  ;;  %v875_v32 = vld [vmem:[#allocation8 + $0x680] sm:$0xff]  ;;  %v874_v44 = vld [vmem:[#allocation8 + $0x678] sm:$0xff] }
 0x25d   :  { %v981_v46 = vld [vmem:[#allocation8 + $0x9d0] sm:$0xff] }
 0x25e   :  { %4060 = vmatpush1.bf16.msra.mxu1 %v4059_v53  ;;  %v4299_v53 = vpack.c.bf16 %v932_v49, %v925_v47  ;;  %v4313_v47 = vpack.c.bf16 %v1100_v38, %v1093_v37  ;;  %v882_v49 = vld [vmem:[#allocation8 + $0x6b8] sm:$0xff]  ;;  %v1268_v37 = vld [vmem:[#allocation8 + $0x12c8] sm:$0xff] }
 0x25f   :  { %4284 = vmatpush3.bf16.msra.mxu0 %v4283_v56  ;;  %4062 = vmatprep.subr.bf16.mxu1 %v4061_v57  ;;  %v4077_v56 = vpack.c.bf16 %v833_v41, %v826_v50  ;;  %v825_v57 = vld [vmem:[#allocation8 + $0x4f0] sm:$0xff]  ;;  %v1107_v41 = vld [vmem:[#allocation8 + $0xdc0] sm:$0xff] }
 0x260   :  { %4286 = vmatprep.subr.bf16.mxu0 %v4285_v60  ;;  %v946_v60 = vld [vmem:[#allocation8 + $0x8b8] sm:$0xff]  ;;  %v4079_v4 = vpack.c.bf16 %v832_v58, %v825_v57  ;;  %v889_v50 = vld [vmem:[#allocation8 + $0x6f0] sm:$0xff]  ;;  %v888_v57 = vld [vmem:[#allocation8 + $0x6e8] sm:$0xff] }
 0x261   :  { %v995_v58 = vld [vmem:[#allocation8 + $0xa40] sm:$0xff] }
 0x262   :  { %4064 = vmatpush1.bf16.msra.mxu1 %v4063_v5  ;;  %v4303_v5 = vpack.c.bf16 %v946_v60, %v939_v55  ;;  %v4317_v55 = vpack.c.bf16 %v1114_v51, %v1107_v41  ;;  %v896_v60 = vld [vmem:[#allocation8 + $0x728] sm:$0xff] }
 0x263   :  { %4288 = vmatpush3.bf16.msra.mxu0 %v4287_v6  ;;  %4066 = vmatprep.subr.bf16.mxu1 %v4065_v28  ;;  %v4081_v6 = vpack.c.bf16 %v847_v63, %v840_v62  ;;  %v839_v28 = vld [vmem:[#allocation8 + $0x560] sm:$0xff]  ;;  %v1233_v63 = vld [vmem:[#allocation8 + $0x11b0] sm:$0xff] }
 0x264   :  { %4290 = vmatprep.subr.bf16.mxu0 %v4289_v10  ;;  %v4305_v10 = vpack.c.bf16 %v1072_v3, %v1065_v1  ;;  %v4083_v17 = vpack.c.bf16 %v846_v7, %v839_v28  ;;  %v903_v62 = vld [vmem:[#allocation8 + $0x760] sm:$0xff]  ;;  %v1240_v1 = vld [vmem:[#allocation8 + $0x11e8] sm:$0xff]  ;;  %v902_v28 = vld [vmem:[#allocation8 + $0x758] sm:$0xff] }
 0x265   :  { %v4321_v7 = vpack.c.bf16 %v1240_v1, %v1233_v63 }
 0x266   :  { %2405 = vmatmul.mubr.f32.vlgmr.msra.gmra.mrb[4].mxu0 %v5030_v61  ;;  %4068 = vmatpush1.bf16.msra.mxu1 %v4067_v20  ;;  %v4307_v20 = vpack.c.bf16 %v960_v11, %v953_v8  ;;  %v1121_v8 = vld [vmem:[#allocation8 + $0xe30] sm:$0xff]  ;;  %v910_v11 = vld [vmem:[#allocation8 + $0x798] sm:$0xff] }
 0x267   :  { %4292 = vmatpush3.bf16.msra.mxu0 %v4291_v21  ;;  %2474 = vmatprep.mubr.f32.mxu0 %v5053_v30  ;;  %v4085_v21 = vpack.c.bf16 %v861_v15, %v854_v13  ;;  %v917_v13 = vld [vmem:[#allocation8 + $0x7d0] sm:$0xff] }
 0x268   :  { %4070 = vmatprep.subr.bf16.mxu1 %v4069_v26  ;;  %4294 = vmatprep.subr.bf16.mxu0 %v4293_v29  ;;  %v4309_v26 = vpack.c.bf16 %v1086_v16, %v1079_v14  ;;  %v974_v29 = vld [vmem:[#allocation8 + $0x998] sm:$0xff]  ;;  %v1247_v14 = vld [vmem:[#allocation8 + $0x1220] sm:$0xff]  ;;  %v4101_v24 = vpack.c.bf16 %v917_v13, %v910_v11 }
 0x269   :  { %v1254_v16 = vld [vmem:[#allocation8 + $0x1258] sm:$0xff] }
 0x26a   :  { %4072 = vmatpush1.bf16.msra.mxu1 %v4071_v39  ;;  %v4311_v39 = vpack.c.bf16 %v974_v29, %v967_v25  ;;  %v1142_v25 = vld [vmem:[#allocation8 + $0xed8] sm:$0xff]  ;;  %v931_v29 = vld [vmem:[#allocation8 + $0x840] sm:$0xff] }
 0x26b   :  { %4296 = vmatpush3.bf16.msra.mxu0 %v4295_v42  ;;  %4074 = vmatprep.subr.bf16.mxu1 %v4073_v43  ;;  %v4089_v42 = vpack.c.bf16 %v875_v32, %v868_v31  ;;  %v867_v43 = vld [vmem:[#allocation8 + $0x640] sm:$0xff]  ;;  %v4325_v31 = vpack.c.bf16 %v1254_v16, %v1247_v14  ;;  %v1261_v32 = vld [vmem:[#allocation8 + $0x1290] sm:$0xff]  ;;  %v1310_v11 = vld [vmem:[#allocation8 + $0x1418] sm:$0xff] }
 0x26c   :  { %4298 = vmatprep.subr.bf16.mxu0 %v4297_v48  ;;  %v988_v48 = vld [vmem:[#allocation8 + $0xa08] sm:$0xff]  ;;  %v4091_v27 = vpack.c.bf16 %v874_v44, %v867_v43  ;;  %v930_v43 = vld [vmem:[#allocation8 + $0x838] sm:$0xff]  ;;  %v1149_v44 = vld [vmem:[#allocation8 + $0xf10] sm:$0xff] }
 0x26d   :  { %v965_v16 = vld [vmem:[#allocation8 + $0x950] sm:$0xff] }
 0x26e   :  { %4076 = vmatpush1.bf16.msra.mxu1 %v4075_v54  ;;  %v4315_v54 = vpack.c.bf16 %v988_v48, %v981_v46  ;;  %v4329_v46 = vpack.c.bf16 %v1268_v37, %v1261_v32  ;;  %v945_v48 = vld [vmem:[#allocation8 + $0x8b0] sm:$0xff] }
 0x26f   :  { %4300 = vmatpush3.bf16.msra.mxu0 %v4299_v53  ;;  %4078 = vmatprep.subr.bf16.mxu1 %v4077_v56  ;;  %v4093_v53 = vpack.c.bf16 %v889_v50, %v882_v49  ;;  %v881_v56 = vld [vmem:[#allocation8 + $0x6b0] sm:$0xff]  ;;  %v1275_v49 = vld [vmem:[#allocation8 + $0x1300] sm:$0xff]  ;;  %v1282_v50 = vld [vmem:[#allocation8 + $0x1338] sm:$0xff] }
 0x270   :  { %4302 = vmatprep.subr.bf16.mxu0 %v4301_v59  ;;  %v1002_v59 = vld [vmem:[#allocation8 + $0xa78] sm:$0xff]  ;;  %v4095_v3 = vpack.c.bf16 %v888_v57, %v881_v56  ;;  %v4333_v56 = vpack.c.bf16 %v1282_v50, %v1275_v49 }
 0x271   :  { %v1170_v57 = vld [vmem:[#allocation8 + $0xfb8] sm:$0xff] }
 0x272   :  { %4080 = vmatpush1.bf16.msra.mxu1 %v4079_v4  ;;  %v4319_v4 = vpack.c.bf16 %v1002_v59, %v995_v58  ;;  %v952_v58 = vld [vmem:[#allocation8 + $0x8e8] sm:$0xff]  ;;  %v1289_v59 = vld [vmem:[#allocation8 + $0x1370] sm:$0xff] }
 0x273   :  { %4304 = vmatpush3.bf16.msra.mxu0 %v4303_v5  ;;  %4082 = vmatprep.subr.bf16.mxu1 %v4081_v6  ;;  %v4097_v5 = vpack.c.bf16 %v903_v62, %v896_v60  ;;  %v895_v6 = vld [vmem:[#allocation8 + $0x720] sm:$0xff]  ;;  %v1296_v60 = vld [vmem:[#allocation8 + $0x13a8] sm:$0xff] }
 0x274   :  { %4306 = vmatprep.subr.bf16.mxu0 %v4305_v10  ;;  %v1128_v10 = vld [vmem:[#allocation8 + $0xe68] sm:$0xff]  ;;  %v4099_v15 = vpack.c.bf16 %v902_v28, %v895_v6  ;;  %v4337_v6 = vpack.c.bf16 %v1296_v60, %v1289_v59  ;;  %v1007_v59 = vld [vmem:[#allocation8 + $0xaa0] sm:$0xff]  ;;  %v1014_v60 = vld [vmem:[#allocation8 + $0xad8] sm:$0xff] }
 0x275   :  { %v1184_v28 = vld [vmem:[#allocation8 + $0x1028] sm:$0xff] }
 0x276   :  { %4084 = vmatpush1.bf16.msra.mxu1 %v4083_v17  ;;  %v4323_v17 = vpack.c.bf16 %v1128_v10, %v1121_v8  ;;  %v973_v8 = vld [vmem:[#allocation8 + $0x990] sm:$0xff]  ;;  %v1303_v10 = vld [vmem:[#allocation8 + $0x13e0] sm:$0xff] }
 0x277   :  { %4308 = vmatpush3.bf16.msra.mxu0 %v4307_v20  ;;  %4086 = vmatprep.subr.bf16.mxu1 %v4085_v21  ;;  %v909_v20 = vld [vmem:[#allocation8 + $0x790] sm:$0xff]  ;;  %v916_v21 = vld [vmem:[#allocation8 + $0x7c8] sm:$0xff] }
 0x278   :  { %4310 = vmatprep.subr.bf16.mxu0 %v4309_v26  ;;  %v924_v26 = vld [vmem:[#allocation8 + $0x808] sm:$0xff]  ;;  %v4103_v38 = vpack.c.bf16 %v916_v21, %v909_v20  ;;  %v1191_v20 = vld [vmem:[#allocation8 + $0x1060] sm:$0xff]  ;;  %v4341_v21 = vpack.c.bf16 %v1310_v11, %v1303_v10  ;;  %v4875_v10 = vmov 0.0|0.0   ;;  %v1366_v11 = vld [vmem:[#allocation8 + $0x15d8] sm:$0xff] }
 0x27a   :  { %4088 = vmatpush1.bf16.msra.mxu1 %v4087_v35  ;;  %v4327_v35 = vpack.c.bf16 %v1142_v25, %v1135_v23  ;;  %v1198_v23 = vld [vmem:[#allocation8 + $0x1098] sm:$0xff]  ;;  %v987_v25 = vld [vmem:[#allocation8 + $0xa00] sm:$0xff] }
 0x27b   :  { %4312 = vmatpush3.bf16.msra.mxu0 %v4311_v39  ;;  %4090 = vmatprep.subr.bf16.mxu1 %v4089_v42  ;;  %v4105_v39 = vpack.c.bf16 %v931_v29, %v924_v26  ;;  %v923_v42 = vld [vmem:[#allocation8 + $0x800] sm:$0xff]  ;;  %v1317_v26 = vld [vmem:[#allocation8 + $0x1450] sm:$0xff]  ;;  %v1324_v29 = vld [vmem:[#allocation8 + $0x1488] sm:$0xff]  ;;  %v4343_v32 = vpack.c.bf16 %v1198_v23, %v1191_v20 }
 0x27c   :  { %4314 = vmatprep.subr.bf16.mxu0 %v4313_v47  ;;  %v938_v47 = vld [vmem:[#allocation8 + $0x878] sm:$0xff]  ;;  %v4107_v41 = vpack.c.bf16 %v930_v43, %v923_v42  ;;  %v4345_v42 = vpack.c.bf16 %v1324_v29, %v1317_v26  ;;  %v1212_v43 = vld [vmem:[#allocation8 + $0x1108] sm:$0xff]  ;;  %v1035_v20 = vld [vmem:[#allocation8 + $0xb80] sm:$0xff] }
 0x27d   :  { %v4109_v51 = vpack.c.bf16 %v945_v48, %v938_v47  ;;  %v1338_v47 = vld [vmem:[#allocation8 + $0x14f8] sm:$0xff]  ;;  %v1373_v23 = vld [vmem:[#allocation8 + $0x1610] sm:$0xff] }
 0x27e   :  { %4092 = vmatpush1.bf16.msra.mxu1 %v4091_v27  ;;  %v937_v27 = vld [vmem:[#allocation8 + $0x870] sm:$0xff] }
 0x27f   :  { %4316 = vmatpush3.bf16.msra.mxu0 %v4315_v54  ;;  %4094 = vmatprep.subr.bf16.mxu1 %v4093_v53  ;;  %v944_v54 = vld [vmem:[#allocation8 + $0x8a8] sm:$0xff]  ;;  %v1163_v53 = vld [vmem:[#allocation8 + $0xf80] sm:$0xff]  ;;  %v1057_v26 = vld [vmem:[#allocation8 + $0xc30] sm:$0xff] }
 0x280   :  { %4318 = vmatprep.subr.bf16.mxu0 %v4317_v55  ;;  %v959_v55 = vld [vmem:[#allocation8 + $0x920] sm:$0xff]  ;;  %v4111_v62 = vpack.c.bf16 %v944_v54, %v937_v27  ;;  %v4335_v63 = vpack.c.bf16 %v1170_v57, %v1163_v53  ;;  %v1226_v54 = vld [vmem:[#allocation8 + $0x1178] sm:$0xff]  ;;  %v1008_v53 = vld [vmem:[#allocation8 + $0xaa8] sm:$0xff] }
 0x281   :  { %v4113_v1 = vpack.c.bf16 %v959_v55, %v952_v58 }
 0x282   :  { %4096 = vmatpush1.bf16.msra.mxu1 %v4095_v3  ;;  %v951_v3 = vld [vmem:[#allocation8 + $0x8e0] sm:$0xff] }
 0x283   :  { %4320 = vmatpush3.bf16.msra.mxu0 %v4319_v4  ;;  %4098 = vmatprep.subr.bf16.mxu1 %v4097_v5  ;;  %v958_v4 = vld [vmem:[#allocation8 + $0x918] sm:$0xff]  ;;  %v1177_v5 = vld [vmem:[#allocation8 + $0xff0] sm:$0xff] }
 0x284   :  { %4322 = vmatprep.subr.bf16.mxu0 %v4321_v7  ;;  %v966_v7 = vld [vmem:[#allocation8 + $0x958] sm:$0xff]  ;;  %v4115_v13 = vpack.c.bf16 %v958_v4, %v951_v3  ;;  %v1029_v3 = vld [vmem:[#allocation8 + $0xb50] sm:$0xff]  ;;  %v4131_v4 = vpack.c.bf16 %v1014_v60, %v1007_v59  ;;  %v1099_v59 = vld [vmem:[#allocation8 + $0xd80] sm:$0xff] }
 0x285   :  { %2121 = vmatmul.mubr.f32.vlgmr.msra.gmra.mrb[8].mxu1 %v5030_v61  ;;  %v1156_v61 = vld [vmem:[#allocation8 + $0xf48] sm:$0xff]  ;;  %v4117_v14 = vpack.c.bf16 %v973_v8, %v966_v7  ;;  %v1359_v8 = vld [vmem:[#allocation8 + $0x15a0] sm:$0xff] }
 0x286   :  { %2475 = vmatmul.mubr.f32.vlgmr.msra.gmra.mrb[6].mxu0 %v5055_v40  ;;  %4100 = vmatpush1.bf16.msra.mxu1 %v4099_v15  ;;  %v4339_v15 = vpack.c.bf16 %v1184_v28, %v1177_v5  ;;  %v1021_v28 = vld [vmem:[#allocation8 + $0xb10] sm:$0xff]  ;;  %v1028_v7 = vld [vmem:[#allocation8 + $0xb48] sm:$0xff] }
 0x287   :  { %2191 = vmatprep.mubr.f32.mxu1 %v5053_v30  ;;  %4324 = vmatpush3.bf16.msra.mxu0 %v4323_v17  ;;  %v4331_v30 = vpack.c.bf16 %v1156_v61, %v1149_v44  ;;  %v972_v17 = vld [vmem:[#allocation8 + $0x988] sm:$0xff]  ;;  %v994_v44 = vld [vmem:[#allocation8 + $0xa38] sm:$0xff]  ;;  %v1331_v61 = vld [vmem:[#allocation8 + $0x14c0] sm:$0xff] }
 0x288   :  { %2544 = vmatprep.mubr.f32.mxu0 %v5059_v45  ;;  %4102 = vmatprep.subr.bf16.mxu1 %v4101_v24  ;;  %v980_v24 = vld [vmem:[#allocation8 + $0x9c8] sm:$0xff]  ;;  %v4349_v27 = vpack.c.bf16 %v1338_v47, %v1331_v61  ;;  %v1063_v47 = vld [vmem:[#allocation8 + $0xc60] sm:$0xff] }
 0x289   :  { %4326 = vmatprep.subr.bf16.mxu0 %v4325_v31  ;;  %v4119_v31 = vpack.c.bf16 %v972_v17, %v965_v16  ;;  %v4121_v37 = vpack.c.bf16 %v987_v25, %v980_v24  ;;  %v4357_v16 = vpack.c.bf16 %v1366_v11, %v1359_v8  ;;  %v1380_v24 = vld [vmem:[#allocation8 + $0x1648] sm:$0xff]  ;;  %v1050_v25 = vld [vmem:[#allocation8 + $0xbf8] sm:$0xff] }
 0x28a   :  { %4104 = vmatpush1.bf16.msra.mxu1 %v4103_v38  ;;  %v979_v38 = vld [vmem:[#allocation8 + $0x9c0] sm:$0xff] }
 0x28b   :  { %4328 = vmatpush3.bf16.msra.mxu0 %v4327_v35  ;;  %4106 = vmatprep.subr.bf16.mxu1 %v4105_v39  ;;  %v986_v35 = vld [vmem:[#allocation8 + $0x9f8] sm:$0xff]  ;;  %v1205_v39 = vld [vmem:[#allocation8 + $0x10d0] sm:$0xff] }
 0x28c   :  { %4330 = vmatprep.subr.bf16.mxu0 %v4329_v46  ;;  %v1001_v46 = vld [vmem:[#allocation8 + $0xa70] sm:$0xff]  ;;  %v4123_v48 = vpack.c.bf16 %v986_v35, %v979_v38  ;;  %v4347_v49 = vpack.c.bf16 %v1212_v43, %v1205_v39  ;;  %v1056_v38 = vld [vmem:[#allocation8 + $0xc28] sm:$0xff]  ;;  %v1387_v35 = vld [vmem:[#allocation8 + $0x1680] sm:$0xff] }
 0x28d   :  { %v4125_v50 = vpack.c.bf16 %v1001_v46, %v994_v44  ;;  %v1394_v39 = vld [vmem:[#allocation8 + $0x16b8] sm:$0xff]  ;;  %v1071_v43 = vld [vmem:[#allocation8 + $0xca0] sm:$0xff] }
 0x28e   :  { %4108 = vmatpush1.bf16.msra.mxu1 %v4107_v41  ;;  %v993_v41 = vld [vmem:[#allocation8 + $0xa30] sm:$0xff]  ;;  %v4363_v46 = vpack.c.bf16 %v1394_v39, %v1387_v35  ;;  %v2627_v35 = vld [vmem:[#allocation11] sm:$0xff]  ;;  %v2629_v39 = vld [vmem:[#allocation11 + $0x10] sm:$0xff] }
 0x28f   :  { %4332 = vmatpush3.bf16.msra.mxu0 %v4331_v30  ;;  %4110 = vmatprep.subr.bf16.mxu1 %v4109_v51  ;;  %v1000_v30 = vld [vmem:[#allocation8 + $0xa68] sm:$0xff]  ;;  %v1219_v51 = vld [vmem:[#allocation8 + $0x1140] sm:$0xff] }
 0x290   :  { %4334 = vmatprep.subr.bf16.mxu0 %v4333_v56  ;;  %v1015_v56 = vld [vmem:[#allocation8 + $0xae0] sm:$0xff]  ;;  %v4127_v57 = vpack.c.bf16 %v1000_v30, %v993_v41  ;;  %v4351_v58 = vpack.c.bf16 %v1226_v54, %v1219_v51  ;;  %v1078_v41 = vld [vmem:[#allocation8 + $0xcd8] sm:$0xff]  ;;  %v1085_v30 = vld [vmem:[#allocation8 + $0xd10] sm:$0xff] }
 0x291   :  { %v4129_v55 = vpack.c.bf16 %v1015_v56, %v1008_v53  ;;  %v4149_v54 = vpack.c.bf16 %v1085_v30, %v1078_v41  ;;  %v1077_v53 = vld [vmem:[#allocation8 + $0xcd0] sm:$0xff]  ;;  %v1084_v56 = vld [vmem:[#allocation8 + $0xd08] sm:$0xff]  ;;  %v2633_v30 = vld [vmem:[#allocation11 + $0x30] sm:$0xff] }
 0x292   :  { %4112 = vmatpush1.bf16.msra.mxu1 %v4111_v62  ;;  %v1345_v62 = vld [vmem:[#allocation8 + $0x1530] sm:$0xff]  ;;  %v4151_v60 = vpack.c.bf16 %v1084_v56, %v1077_v53  ;;  %v2631_v41 = vld [vmem:[#allocation11 + $0x20] sm:$0xff]  ;;  %v1147_v56 = vld [vmem:[#allocation8 + $0xf00] sm:$0xff] }
 0x293   :  { %4336 = vmatpush3.bf16.msra.mxu0 %v4335_v63  ;;  %4114 = vmatprep.subr.bf16.mxu1 %v4113_v1  ;;  %v1352_v63 = vld [vmem:[#allocation8 + $0x1568] sm:$0xff]  ;;  %v1022_v1 = vld [vmem:[#allocation8 + $0xb18] sm:$0xff] }
 0x294   :  { %4338 = vmatprep.subr.bf16.mxu0 %v4337_v6  ;;  %v4354_v5 = vpack.c.bf16 %v1352_v63, %v1345_v62  ;;  %v4133_v6 = vpack.c.bf16 %v1029_v3, %v1022_v1  ;;  %v1091_v1 = vld [vmem:[#allocation8 + $0xd40] sm:$0xff]  ;;  %v1098_v3 = vld [vmem:[#allocation8 + $0xd78] sm:$0xff] }
 0x296   :  { %4116 = vmatpush1.bf16.msra.mxu1 %v4115_v13  ;;  %v1036_v13 = vld [vmem:[#allocation8 + $0xb88] sm:$0xff] }
 0x297   :  { %4340 = vmatpush3.bf16.msra.mxu0 %v4339_v15  ;;  %4118 = vmatprep.subr.bf16.mxu1 %v4117_v14  ;;  %v1043_v15 = vld [vmem:[#allocation8 + $0xbc0] sm:$0xff]  ;;  %v4135_v14 = vpack.c.bf16 %v1028_v7, %v1021_v28  ;;  %v1113_v28 = vld [vmem:[#allocation8 + $0xdf0] sm:$0xff]  ;;  %v4155_v7 = vpack.c.bf16 %v1098_v3, %v1091_v1 }
 0x298   :  { %4342 = vmatprep.subr.bf16.mxu0 %v4341_v21  ;;  %v4137_v17 = vpack.c.bf16 %v1043_v15, %v1036_v13  ;;  %v1042_v21 = vld [vmem:[#allocation8 + $0xbb8] sm:$0xff]  ;;  %v1105_v13 = vld [vmem:[#allocation8 + $0xdb0] sm:$0xff]  ;;  %v1112_v15 = vld [vmem:[#allocation8 + $0xde8] sm:$0xff] }
 0x299   :  { %v4139_v29 = vpack.c.bf16 %v1042_v21, %v1035_v20  ;;  %v1127_v20 = vld [vmem:[#allocation8 + $0xe60] sm:$0xff]  ;;  %v2628_v21 = vld [vmem:[#allocation11 + $0x8] sm:$0xff] }
 0x29a   :  { %4120 = vmatpush1.bf16.msra.mxu1 %v4119_v31  ;;  %v4360_v31 = vpack.c.bf16 %v1380_v24, %v1373_v23  ;;  %v2630_v23 = vld [vmem:[#allocation11 + $0x18] sm:$0xff]  ;;  %v4159_v24 = vpack.c.bf16 %v1112_v15, %v1105_v13  ;;  %v2640_v1 = vld [vmem:[#allocation11 + $0x68] sm:$0xff]  ;;  %v2641_v13 = vld [vmem:[#allocation11 + $0x70] sm:$0xff] }
 0x29b   :  { %4344 = vmatpush3.bf16.msra.mxu0 %v4343_v32  ;;  %4122 = vmatprep.subr.bf16.mxu1 %v4121_v37  ;;  %v4141_v32 = vpack.c.bf16 %v1057_v26, %v1050_v25  ;;  %v1049_v37 = vld [vmem:[#allocation8 + $0xbf0] sm:$0xff]  ;;  %v2642_v3 = vld [vmem:[#allocation11 + $0x78] sm:$0xff] }
 0x29c   :  { %4346 = vmatprep.subr.bf16.mxu0 %v4345_v42  ;;  %v1064_v42 = vld [vmem:[#allocation8 + $0xc68] sm:$0xff]  ;;  %v4143_v44 = vpack.c.bf16 %v1056_v38, %v1049_v37  ;;  %v1141_v37 = vld [vmem:[#allocation8 + $0xed0] sm:$0xff]  ;;  %v4377_v38 = vpack.c.bf16 %v2630_v23, %v2628_v21  ;;  %v1182_v21 = vld [vmem:[#allocation8 + $0x1018] sm:$0xff] }
 0x29d   :  { %v4145_v61 = vpack.c.bf16 %v1071_v43, %v1064_v42  ;;  %v2632_v43 = vld [vmem:[#allocation11 + $0x28] sm:$0xff]  ;;  %v1190_v23 = vld [vmem:[#allocation8 + $0x1058] sm:$0xff] }
 0x29e   :  { %4124 = vmatpush1.bf16.msra.mxu1 %v4123_v48  ;;  %v1070_v48 = vld [vmem:[#allocation8 + $0xc98] sm:$0xff] }
 0x29f   :  { %4348 = vmatpush3.bf16.msra.mxu0 %v4347_v49  ;;  %4126 = vmatprep.subr.bf16.mxu1 %v4125_v50  ;;  %v1401_v49 = vld [vmem:[#allocation8 + $0x16f0] sm:$0xff]  ;;  %v1408_v50 = vld [vmem:[#allocation8 + $0x1728] sm:$0xff]  ;;  %v4147_v51 = vpack.c.bf16 %v1070_v48, %v1063_v47 }
 0x2a0   :  { %4350 = vmatprep.subr.bf16.mxu0 %v4349_v27  ;;  %v4366_v27 = vpack.c.bf16 %v1408_v50, %v1401_v49  ;;  %v1140_v47 = vld [vmem:[#allocation8 + $0xec8] sm:$0xff]  ;;  %v1155_v49 = vld [vmem:[#allocation8 + $0xf40] sm:$0xff]  ;;  %v4379_v50 = vpack.c.bf16 %v2629_v39, %v2627_v35  ;;  %v1189_v39 = vld [vmem:[#allocation8 + $0x1050] sm:$0xff] }
 0x2a1   :  { %v1148_v48 = vld [vmem:[#allocation8 + $0xf08] sm:$0xff] }
 0x2a2   :  { %4128 = vmatpush1.bf16.msra.mxu1 %v4127_v57  ;;  %v1415_v57 = vld [vmem:[#allocation8 + $0x1760] sm:$0xff]  ;;  %v4169_v53 = vpack.c.bf16 %v1155_v49, %v1148_v48  ;;  %v2649_v48 = vld [vmem:[#allocation11 + $0xb0] sm:$0xff] }
 0x2a3   :  { %4352 = vmatpush3.bf16.msra.mxu0 %v4351_v58  ;;  %4130 = vmatprep.subr.bf16.mxu1 %v4129_v55  ;;  %v1422_v58 = vld [vmem:[#allocation8 + $0x1798] sm:$0xff]  ;;  %v1092_v55 = vld [vmem:[#allocation8 + $0xd48] sm:$0xff] }
 0x2a4   :  { %4353 = vmatprep.subr.bf16.mxu0 %v4875_v10  ;;  %v4369_v62 = vpack.c.bf16 %v1422_v58, %v1415_v57  ;;  %v4153_v63 = vpack.c.bf16 %v1099_v59, %v1092_v55  ;;  %v1154_v57 = vld [vmem:[#allocation8 + $0xf38] sm:$0xff]  ;;  %v1169_v55 = vld [vmem:[#allocation8 + $0xfb0] sm:$0xff]  ;;  %v4383_v59 = vpack.c.bf16 %v2633_v30, %v2631_v41  ;;  %v1203_v30 = vld [vmem:[#allocation8 + $0x10c0] sm:$0xff] }
 0x2a5   :  { %v1162_v58 = vld [vmem:[#allocation8 + $0xf78] sm:$0xff] }
 0x2a6   :  { %2545 = vmatmul.mubr.f32.vlgmr.msra.gmra.mrb[8].mxu0 %v5072_v19  ;;  %4132 = vmatpush1.bf16.msra.mxu1 %v4131_v4  ;;  %v1429_v4 = vld [vmem:[#allocation8 + $0x17d0] sm:$0xff] }
 0x2a7   :  { %4355 = vmatpush3.bf16.msra.mxu0 %v4354_v5  ;;  %4134 = vmatprep.subr.bf16.mxu1 %v4133_v6  ;;  %v1436_v5 = vld [vmem:[#allocation8 + $0x1808] sm:$0xff]  ;;  %v1106_v6 = vld [vmem:[#allocation8 + $0xdb8] sm:$0xff] }
 0x2a8   :  { %4356 = vmatprep.subr.bf16.mxu0 %v4875_v10  ;;  %3358 = vmatprep.mubr.msk.f32.mxu0 %vm4876_vm0, %v4874_v52  ;;  %v4372_v8 = vpack.c.bf16 %v1436_v5, %v1429_v4  ;;  %v4157_v11 = vpack.c.bf16 %v1113_v28, %v1106_v6  ;;  %v4173_v4 = vpack.c.bf16 %v1169_v55, %v1162_v58  ;;  %v1161_v5 = vld [vmem:[#allocation8 + $0xf70] sm:$0xff]  ;;  %v1176_v6 = vld [vmem:[#allocation8 + $0xfe8] sm:$0xff]  ;;  %v1183_v28 = vld [vmem:[#allocation8 + $0x1020] sm:$0xff] }
 0x2a9   :  { %v2653_v58 = vld [vmem:[#allocation11 + $0xd0] sm:$0xff] }
 0x2aa   :  { %4136 = vmatpush1.bf16.msra.mxu1 %v4135_v14  ;;  %v1443_v14 = vld [vmem:[#allocation8 + $0x1840] sm:$0xff] }
 0x2ab   :  { %4358 = vmatpush3.bf16.msra.mxu0 %v4357_v16  ;;  %4138 = vmatprep.subr.bf16.mxu1 %v4137_v17  ;;  %v1450_v16 = vld [vmem:[#allocation8 + $0x1878] sm:$0xff]  ;;  %v1120_v17 = vld [vmem:[#allocation8 + $0xe28] sm:$0xff] }
 0x2ac   :  { %4359 = vmatprep.subr.bf16.mxu0 %v4875_v10  ;;  %v4375_v25 = vpack.c.bf16 %v1450_v16, %v1443_v14  ;;  %v4161_v26 = vpack.c.bf16 %v1127_v20, %v1120_v17  ;;  %v2644_v14 = vld [vmem:[#allocation11 + $0x88] sm:$0xff]  ;;  %v2646_v16 = vld [vmem:[#allocation11 + $0x98] sm:$0xff]  ;;  %v4177_v17 = vpack.c.bf16 %v1183_v28, %v1176_v6  ;;  %v2657_v6 = vld [vmem:[#allocation11 + $0xf0] sm:$0xff] }
 0x2ad   :  { %v1175_v20 = vld [vmem:[#allocation8 + $0xfe0] sm:$0xff] }
 0x2ae   :  { %4140 = vmatpush1.bf16.msra.mxu1 %v4139_v29  ;;  %v1119_v29 = vld [vmem:[#allocation8 + $0xe20] sm:$0xff] }
 0x2af   :  { %4361 = vmatpush3.bf16.msra.mxu0 %v4360_v31  ;;  %4142 = vmatprep.subr.bf16.mxu1 %v4141_v32  ;;  %v1126_v31 = vld [vmem:[#allocation8 + $0xe58] sm:$0xff] }
 0x2b0   :  { %4362 = vmatprep.subr.bf16.mxu0 %v4875_v10  ;;  %v1134_v32 = vld [vmem:[#allocation8 + $0xe98] sm:$0xff]  ;;  %v4163_v42 = vpack.c.bf16 %v1126_v31, %v1119_v29  ;;  %v2643_v29 = vld [vmem:[#allocation11 + $0x80] sm:$0xff] }
 0x2b1   :  { %v2645_v31 = vld [vmem:[#allocation11 + $0x90] sm:$0xff] }
 0x2b2   :  { %4144 = vmatpush1.bf16.msra.mxu1 %v4143_v44  ;;  %v2634_v44 = vld [vmem:[#allocation11 + $0x38] sm:$0xff] }
 0x2b3   :  { %4364 = vmatpush3.bf16.msra.mxu0 %v4363_v46  ;;  %4146 = vmatprep.subr.bf16.mxu1 %v4145_v61  ;;  %v4165_v46 = vpack.c.bf16 %v1141_v37, %v1134_v32  ;;  %v1133_v61 = vld [vmem:[#allocation8 + $0xe90] sm:$0xff]  ;;  %v4179_v32 = vpack.c.bf16 %v1182_v21, %v1175_v20  ;;  %v2659_v21 = vld [vmem:[#allocation11 + $0x100] sm:$0xff] }
 0x2b4   :  { %4365 = vmatprep.subr.bf16.mxu0 %v4875_v10  ;;  %v2648_v37 = vld [vmem:[#allocation11 + $0xa8] sm:$0xff] }
 0x2b6   :  { %4148 = vmatpush1.bf16.msra.mxu1 %v4147_v51  ;;  %v4167_v51 = vpack.c.bf16 %v1140_v47, %v1133_v61  ;;  %v2647_v47 = vld [vmem:[#allocation11 + $0xa0] sm:$0xff] }
 0x2b7   :  { %4367 = vmatpush3.bf16.msra.mxu0 %v4366_v27  ;;  %4150 = vmatprep.subr.bf16.mxu1 %v4149_v54  ;;  %v2636_v27 = vld [vmem:[#allocation11 + $0x48] sm:$0xff]  ;;  %v2638_v54 = vld [vmem:[#allocation11 + $0x58] sm:$0xff] }
 0x2b8   :  { %4368 = vmatprep.subr.bf16.mxu0 %v4875_v10 }
 0x2ba   :  { %4152 = vmatpush1.bf16.msra.mxu1 %v4151_v60  ;;  %v2635_v60 = vld [vmem:[#allocation11 + $0x40] sm:$0xff] }
 0x2bb   :  { %4370 = vmatpush3.bf16.msra.mxu0 %v4369_v62  ;;  %4154 = vmatprep.subr.bf16.mxu1 %v4153_v63  ;;  %v2637_v62 = vld [vmem:[#allocation11 + $0x50] sm:$0xff]  ;;  %v4171_v63 = vpack.c.bf16 %v1154_v57, %v1147_v56  ;;  %v2651_v57 = vld [vmem:[#allocation11 + $0xc0] sm:$0xff] }
 0x2bc   :  { %4371 = vmatprep.subr.bf16.mxu0 %v4875_v10 }
 0x2be   :  { %4156 = vmatpush1.bf16.msra.mxu1 %v4155_v7  ;;  %v4387_v7 = vpack.c.bf16 %v2637_v62, %v2635_v60  ;;  %v1217_v62 = vld [vmem:[#allocation8 + $0x1130] sm:$0xff] }
 0x2bf   :  { %4373 = vmatpush3.bf16.msra.mxu0 %v4372_v8  ;;  %4158 = vmatprep.subr.bf16.mxu1 %v4157_v11  ;;  %v4389_v8 = vpack.c.bf16 %v2642_v3, %v2640_v1  ;;  %v2639_v11 = vld [vmem:[#allocation11 + $0x60] sm:$0xff]  ;;  %v1239_v3 = vld [vmem:[#allocation8 + $0x11e0] sm:$0xff] }
 0x2c0   :  { %4374 = vmatprep.subr.bf16.mxu0 %v4875_v10  ;;  %v4381_v10 = vpack.c.bf16 %v2634_v44, %v2632_v43  ;;  %v1204_v43 = vld [vmem:[#allocation8 + $0x10c8] sm:$0xff]  ;;  %v1211_v44 = vld [vmem:[#allocation8 + $0x1100] sm:$0xff] }
 0x2c1   :  { %v4185_v41 = vpack.c.bf16 %v1211_v44, %v1204_v43  ;;  %v1232_v1 = vld [vmem:[#allocation8 + $0x11a8] sm:$0xff]  ;;  %v2665_v43 = vld [vmem:[#allocation11 + $0x130] sm:$0xff] }
 0x2c2   :  { %4160 = vmatpush1.bf16.msra.mxu1 %v4159_v24  ;;  %v1197_v24 = vld [vmem:[#allocation8 + $0x1090] sm:$0xff] }
 0x2c3   :  { %4376 = vmatpush3.bf16.msra.mxu0 %v4375_v25  ;;  %4162 = vmatprep.subr.bf16.mxu1 %v4161_v26  ;;  %v4391_v25 = vpack.c.bf16 %v2641_v13, %v2639_v11  ;;  %v4393_v26 = vpack.c.bf16 %v2646_v16, %v2644_v14  ;;  %v4181_v35 = vpack.c.bf16 %v1197_v24, %v1190_v23  ;;  %v1231_v13 = vld [vmem:[#allocation8 + $0x11a0] sm:$0xff]  ;;  %v1246_v14 = vld [vmem:[#allocation8 + $0x1218] sm:$0xff]  ;;  %v1253_v16 = vld [vmem:[#allocation8 + $0x1250] sm:$0xff] }
 0x2c4   :  { %4378 = vmatprep.subr.bf16.mxu0 %v4377_v38  ;;  %v2650_v38 = vld [vmem:[#allocation11 + $0xb8] sm:$0xff]  ;;  %v4193_v11 = vpack.c.bf16 %v1239_v3, %v1232_v1  ;;  %v2661_v23 = vld [vmem:[#allocation11 + $0x110] sm:$0xff] }
 0x2c5   :  { %2192 = vmatmul.mubr.f32.vlgmr.msra.gmra.mrb[8].mxu1 %v5055_v40  ;;  %v4385_v40 = vpack.c.bf16 %v2638_v54, %v2636_v27  ;;  %v4397_v61 = vpack.c.bf16 %v2650_v38, %v2648_v37  ;;  %v1218_v27 = vld [vmem:[#allocation8 + $0x1138] sm:$0xff]  ;;  %v1225_v54 = vld [vmem:[#allocation8 + $0x1170] sm:$0xff]  ;;  %v1260_v37 = vld [vmem:[#allocation8 + $0x1288] sm:$0xff] }
 0x2c6   :  { %3359 = vmatmul.mubr.f32.vlgmr.msra.gmra.mrb[10].mxu0 %v5082_v22  ;;  %4164 = vmatpush1.bf16.msra.mxu1 %v4163_v42  ;;  %v1196_v42 = vld [vmem:[#allocation8 + $0x1088] sm:$0xff]  ;;  %v4189_v60 = vpack.c.bf16 %v1225_v54, %v1218_v27  ;;  %v1267_v38 = vld [vmem:[#allocation8 + $0x12c0] sm:$0xff]  ;;  %v2669_v27 = vld [vmem:[#allocation11 + $0x150] sm:$0xff] }
 0x2c7   :  { %2262 = vmatprep.mubr.f32.mxu1 %v5059_v45  ;;  %4166 = vmatprep.subr.bf16.mxu1 %v4165_v46  ;;  %v1168_v45 = vld [vmem:[#allocation8 + $0xfa8] sm:$0xff]  ;;  %v4395_v46 = vpack.c.bf16 %v2645_v31, %v2643_v29  ;;  %v4183_v49 = vpack.c.bf16 %v1196_v42, %v1189_v39  ;;  %v4197_v29 = vpack.c.bf16 %v1253_v16, %v1246_v14  ;;  %v1245_v31 = vld [vmem:[#allocation8 + $0x1210] sm:$0xff]  ;;  %v2673_v1 = vld [vmem:[#allocation11 + $0x170] sm:$0xff] }
 0x2c8   :  { %4380 = vmatpush1.bf16.msra.mxu0 %v4379_v50  ;;  %v4175_v15 = vpack.c.bf16 %v1168_v45, %v1161_v5  ;;  %v2652_v50 = vld [vmem:[#allocation11 + $0xc8] sm:$0xff]  ;;  %v2655_v45 = vld [vmem:[#allocation11 + $0xe0] sm:$0xff]  ;;  %v2677_v14 = vld [vmem:[#allocation11 + $0x190] sm:$0xff] }
 0x2c9   :  { %4382 = vmatprep.subr.bf16.mxu0 %v4381_v10  ;;  %v2654_v10 = vld [vmem:[#allocation11 + $0xd8] sm:$0xff]  ;;  %v2663_v42 = vld [vmem:[#allocation11 + $0x120] sm:$0xff] }
 0x2ca   :  { %4168 = vmatpush1.bf16.msra.mxu1 %v4167_v51  ;;  %v1210_v51 = vld [vmem:[#allocation8 + $0x10f8] sm:$0xff]  ;;  %v4401_v56 = vpack.c.bf16 %v2654_v10, %v2652_v50  ;;  %v1281_v10 = vld [vmem:[#allocation8 + $0x1330] sm:$0xff] }
 0x2cb   :  { %4170 = vmatprep.subr.bf16.mxu1 %v4169_v53  ;;  %v4399_v53 = vpack.c.bf16 %v2649_v48, %v2647_v47  ;;  %v4187_v55 = vpack.c.bf16 %v1210_v51, %v1203_v30  ;;  %v4201_v47 = vpack.c.bf16 %v1267_v38, %v1260_v37  ;;  %v1259_v48 = vld [vmem:[#allocation8 + $0x1280] sm:$0xff]  ;;  %v1274_v50 = vld [vmem:[#allocation8 + $0x12f8] sm:$0xff]  ;;  %v2667_v51 = vld [vmem:[#allocation11 + $0x140] sm:$0xff] }
 0x2cc   :  { %4384 = vmatpush1.bf16.msra.mxu0 %v4383_v59  ;;  %v2656_v59 = vld [vmem:[#allocation11 + $0xe8] sm:$0xff]  ;;  %v2681_v37 = vld [vmem:[#allocation11 + $0x1b0] sm:$0xff] }
 0x2cd   :  { %4386 = vmatprep.subr.bf16.mxu0 %v4385_v40  ;;  %v2658_v40 = vld [vmem:[#allocation11 + $0xf8] sm:$0xff] }
 0x2ce   :  { %4172 = vmatpush1.bf16.msra.mxu1 %v4171_v63  ;;  %v1224_v63 = vld [vmem:[#allocation8 + $0x1168] sm:$0xff]  ;;  %v4405_v5 = vpack.c.bf16 %v2658_v40, %v2656_v59  ;;  %v1295_v40 = vld [vmem:[#allocation8 + $0x13a0] sm:$0xff] }
 0x2cf   :  { %4174 = vmatprep.subr.bf16.mxu1 %v4173_v4  ;;  %v4403_v4 = vpack.c.bf16 %v2653_v58, %v2651_v57  ;;  %v4191_v28 = vpack.c.bf16 %v1224_v63, %v1217_v62  ;;  %v4205_v57 = vpack.c.bf16 %v1281_v10, %v1274_v50  ;;  %v1273_v58 = vld [vmem:[#allocation8 + $0x12f0] sm:$0xff]  ;;  %v1288_v59 = vld [vmem:[#allocation8 + $0x1368] sm:$0xff]  ;;  %v2685_v50 = vld [vmem:[#allocation11 + $0x1d0] sm:$0xff] }
 0x2d0   :  { %4388 = vmatpush1.bf16.msra.mxu0 %v4387_v7  ;;  %v2660_v7 = vld [vmem:[#allocation11 + $0x108] sm:$0xff]  ;;  %v2671_v63 = vld [vmem:[#allocation11 + $0x160] sm:$0xff] }
 0x2d1   :  { %4390 = vmatprep.subr.bf16.mxu0 %v4389_v8  ;;  %v2662_v8 = vld [vmem:[#allocation11 + $0x118] sm:$0xff] }
 0x2d2   :  { %4176 = vmatpush1.bf16.msra.mxu1 %v4175_v15  ;;  %v1238_v15 = vld [vmem:[#allocation8 + $0x11d8] sm:$0xff]  ;;  %v4409_v20 = vpack.c.bf16 %v2662_v8, %v2660_v7  ;;  %v1309_v8 = vld [vmem:[#allocation8 + $0x1410] sm:$0xff] }
 0x2d3   :  { %4178 = vmatprep.subr.bf16.mxu1 %v4177_v17  ;;  %v4407_v17 = vpack.c.bf16 %v2657_v6, %v2655_v45  ;;  %v4195_v24 = vpack.c.bf16 %v1238_v15, %v1231_v13  ;;  %v4209_v45 = vpack.c.bf16 %v1295_v40, %v1288_v59  ;;  %v1287_v6 = vld [vmem:[#allocation8 + $0x1360] sm:$0xff]  ;;  %v1302_v7 = vld [vmem:[#allocation8 + $0x13d8] sm:$0xff]  ;;  %v2675_v15 = vld [vmem:[#allocation11 + $0x180] sm:$0xff] }
 0x2d4   :  { %4392 = vmatpush1.bf16.msra.mxu0 %v4391_v25  ;;  %v2664_v25 = vld [vmem:[#allocation11 + $0x128] sm:$0xff]  ;;  %v2689_v59 = vld [vmem:[#allocation11 + $0x1f0] sm:$0xff] }
 0x2d5   :  { %4394 = vmatprep.subr.bf16.mxu0 %v4393_v26  ;;  %v2666_v26 = vld [vmem:[#allocation11 + $0x138] sm:$0xff] }
 0x2d6   :  { %4180 = vmatpush1.bf16.msra.mxu1 %v4179_v32  ;;  %v1252_v32 = vld [vmem:[#allocation8 + $0x1248] sm:$0xff]  ;;  %v4413_v39 = vpack.c.bf16 %v2666_v26, %v2664_v25  ;;  %v1323_v26 = vld [vmem:[#allocation8 + $0x1480] sm:$0xff] }
 0x2d7   :  { %4182 = vmatprep.subr.bf16.mxu1 %v4181_v35  ;;  %v4411_v35 = vpack.c.bf16 %v2661_v23, %v2659_v21  ;;  %v4199_v44 = vpack.c.bf16 %v1252_v32, %v1245_v31  ;;  %v4213_v21 = vpack.c.bf16 %v1309_v8, %v1302_v7  ;;  %v1301_v23 = vld [vmem:[#allocation8 + $0x13d0] sm:$0xff]  ;;  %v1316_v25 = vld [vmem:[#allocation8 + $0x1448] sm:$0xff] }
 0x2d8   :  { %4396 = vmatpush1.bf16.msra.mxu0 %v4395_v46  ;;  %v2668_v46 = vld [vmem:[#allocation11 + $0x148] sm:$0xff]  ;;  %v2679_v32 = vld [vmem:[#allocation11 + $0x1a0] sm:$0xff] }
 0x2d9   :  { %4398 = vmatprep.subr.bf16.mxu0 %v4397_v61  ;;  %v2670_v61 = vld [vmem:[#allocation11 + $0x158] sm:$0xff]  ;;  %v1357_v8 = vld [vmem:[#allocation8 + $0x1590] sm:$0xff] }
 0x2da   :  { %4184 = vmatpush1.bf16.msra.mxu1 %v4183_v49  ;;  %v1266_v49 = vld [vmem:[#allocation8 + $0x12b8] sm:$0xff]  ;;  %v4417_v30 = vpack.c.bf16 %v2670_v61, %v2668_v46  ;;  %v1337_v61 = vld [vmem:[#allocation8 + $0x14f0] sm:$0xff] }
 0x2db   :  { %4186 = vmatprep.subr.bf16.mxu1 %v4185_v41  ;;  %v4415_v41 = vpack.c.bf16 %v2665_v43, %v2663_v42  ;;  %v4203_v54 = vpack.c.bf16 %v1266_v49, %v1259_v48  ;;  %v4217_v42 = vpack.c.bf16 %v1323_v26, %v1316_v25  ;;  %v1315_v43 = vld [vmem:[#allocation8 + $0x1440] sm:$0xff]  ;;  %v1330_v46 = vld [vmem:[#allocation8 + $0x14b8] sm:$0xff]  ;;  %v2683_v49 = vld [vmem:[#allocation11 + $0x1c0] sm:$0xff] }
 0x2dc   :  { %4400 = vmatpush1.bf16.msra.mxu0 %v4399_v53  ;;  %v2672_v53 = vld [vmem:[#allocation11 + $0x168] sm:$0xff] }
 0x2dd   :  { %4402 = vmatprep.subr.bf16.mxu0 %v4401_v56  ;;  %v2674_v56 = vld [vmem:[#allocation11 + $0x178] sm:$0xff]  ;;  %v1385_v26 = vld [vmem:[#allocation8 + $0x1670] sm:$0xff] }
 0x2de   :  { %4188 = vmatpush1.bf16.msra.mxu1 %v4187_v55  ;;  %v1280_v55 = vld [vmem:[#allocation8 + $0x1328] sm:$0xff]  ;;  %v4421_v62 = vpack.c.bf16 %v2674_v56, %v2672_v53  ;;  %v1351_v56 = vld [vmem:[#allocation8 + $0x1560] sm:$0xff] }
 0x2df   :  { %4190 = vmatprep.subr.bf16.mxu1 %v4189_v60  ;;  %v4419_v60 = vpack.c.bf16 %v2669_v27, %v2667_v51  ;;  %v4207_v3 = vpack.c.bf16 %v1280_v55, %v1273_v58  ;;  %v4221_v51 = vpack.c.bf16 %v1337_v61, %v1330_v46  ;;  %v1329_v27 = vld [vmem:[#allocation8 + $0x14b0] sm:$0xff]  ;;  %v1344_v53 = vld [vmem:[#allocation8 + $0x1528] sm:$0xff] }
 0x2e0   :  { %4404 = vmatpush1.bf16.msra.mxu0 %v4403_v4  ;;  %v2676_v4 = vld [vmem:[#allocation11 + $0x188] sm:$0xff]  ;;  %v2687_v55 = vld [vmem:[#allocation11 + $0x1e0] sm:$0xff] }
 0x2e1   :  { %4406 = vmatprep.subr.bf16.mxu0 %v4405_v5  ;;  %v2678_v5 = vld [vmem:[#allocation11 + $0x198] sm:$0xff]  ;;  %v1413_v61 = vld [vmem:[#allocation8 + $0x1750] sm:$0xff] }
 0x2e2   :  { %4192 = vmatpush1.bf16.msra.mxu1 %v4191_v28  ;;  %v1294_v28 = vld [vmem:[#allocation8 + $0x1398] sm:$0xff]  ;;  %v4425_v13 = vpack.c.bf16 %v2678_v5, %v2676_v4  ;;  %v1365_v5 = vld [vmem:[#allocation8 + $0x15d0] sm:$0xff] }
 0x2e3   :  { %4194 = vmatprep.subr.bf16.mxu1 %v4193_v11  ;;  %v4423_v11 = vpack.c.bf16 %v2673_v1, %v2671_v63  ;;  %v4211_v16 = vpack.c.bf16 %v1294_v28, %v1287_v6  ;;  %v4225_v63 = vpack.c.bf16 %v1351_v56, %v1344_v53  ;;  %v1343_v1 = vld [vmem:[#allocation8 + $0x1520] sm:$0xff]  ;;  %v1358_v4 = vld [vmem:[#allocation8 + $0x1598] sm:$0xff] }
 0x2e4   :  { %4408 = vmatpush1.bf16.msra.mxu0 %v4407_v17  ;;  %v2680_v17 = vld [vmem:[#allocation11 + $0x1a8] sm:$0xff]  ;;  %v4229_v7 = vpack.c.bf16 %v1365_v5, %v1358_v4  ;;  %v2691_v5 = vld [vmem:[#allocation11 + $0x200] sm:$0xff] }
 0x2e5   :  { %4410 = vmatprep.subr.bf16.mxu0 %v4409_v20  ;;  %v2682_v20 = vld [vmem:[#allocation11 + $0x1b8] sm:$0xff] }
 0x2e6   :  { %4196 = vmatpush1.bf16.msra.mxu1 %v4195_v24  ;;  %v1308_v24 = vld [vmem:[#allocation8 + $0x1408] sm:$0xff]  ;;  %v4429_v31 = vpack.c.bf16 %v2682_v20, %v2680_v17  ;;  %v1371_v17 = vld [vmem:[#allocation8 + $0x1600] sm:$0xff]  ;;  %v1378_v20 = vld [vmem:[#allocation8 + $0x1638] sm:$0xff] }
 0x2e7   :  { %4198 = vmatprep.subr.bf16.mxu1 %v4197_v29  ;;  %v4427_v29 = vpack.c.bf16 %v2677_v14, %v2675_v15  ;;  %v4215_v38 = vpack.c.bf16 %v1308_v24, %v1301_v23  ;;  %v1379_v15 = vld [vmem:[#allocation8 + $0x1640] sm:$0xff]  ;;  %v1393_v23 = vld [vmem:[#allocation8 + $0x16b0] sm:$0xff]  ;;  %v4235_v24 = vpack.c.bf16 %v1378_v20, %v1371_v17 }
 0x2e8   :  { %4412 = vmatpush1.bf16.msra.mxu0 %v4411_v35  ;;  %v2684_v35 = vld [vmem:[#allocation11 + $0x1c8] sm:$0xff]  ;;  %v2702_v17 = vld [vmem:[#allocation11 + $0x258] sm:$0xff] }
 0x2e9   :  { %4414 = vmatprep.subr.bf16.mxu0 %v4413_v39  ;;  %v2686_v39 = vld [vmem:[#allocation11 + $0x1d8] sm:$0xff] }
 0x2ea   :  { %4200 = vmatpush1.bf16.msra.mxu1 %v4199_v44  ;;  %v1322_v44 = vld [vmem:[#allocation8 + $0x1478] sm:$0xff]  ;;  %v4433_v48 = vpack.c.bf16 %v2686_v39, %v2684_v35 }
 0x2eb   :  { %4202 = vmatprep.subr.bf16.mxu1 %v4201_v47  ;;  %v4431_v47 = vpack.c.bf16 %v2681_v37, %v2679_v32  ;;  %v4219_v10 = vpack.c.bf16 %v1322_v44, %v1315_v43  ;;  %v1407_v32 = vld [vmem:[#allocation8 + $0x1720] sm:$0xff]  ;;  %v1406_v35 = vld [vmem:[#allocation8 + $0x1718] sm:$0xff] }
 0x2ec   :  { %4416 = vmatpush1.bf16.msra.mxu0 %v4415_v41  ;;  %v2688_v41 = vld [vmem:[#allocation11 + $0x1e8] sm:$0xff]  ;;  %v1414_v39 = vld [vmem:[#allocation8 + $0x1758] sm:$0xff]  ;;  %v5109_v44 = vld [vmem:[#allocation10] sm:$0xff] }
 0x2ed   :  { %4418 = vmatprep.subr.bf16.mxu0 %v4417_v30  ;;  %v2690_v30 = vld [vmem:[#allocation11 + $0x1f8] sm:$0xff] }
 0x2ee   :  { %4204 = vmatpush1.bf16.msra.mxu1 %v4203_v54  ;;  %v1336_v54 = vld [vmem:[#allocation8 + $0x14e8] sm:$0xff]  ;;  %v4437_v58 = vpack.c.bf16 %v2690_v30, %v2688_v41  ;;  %v1468_v30 = vrot.slane %v5109_v44, %v356_v12 }
 0x2ef   :  { %4206 = vmatprep.subr.bf16.mxu1 %v4205_v57  ;;  %v4435_v57 = vpack.c.bf16 %v2685_v50, %v2683_v49  ;;  %v4223_v40 = vpack.c.bf16 %v1336_v54, %v1329_v27  ;;  %v1435_v49 = vld [vmem:[#allocation8 + $0x1800] sm:$0xff]  ;;  %v1456_v50 = vrot.slane %v5109_v44, %v5017_v34  ;;  %v1434_v54 = vld [vmem:[#allocation8 + $0x17f8] sm:$0xff]  ;;  %v1448_v12 = vld [vmem:[#allocation8 + $0x1868] sm:$0xff] }
 0x2f0   :  { %4420 = vmatpush1.bf16.msra.mxu0 %v4419_v60  ;;  %v2692_v60 = vld [vmem:[#allocation11 + $0x208] sm:$0xff]  ;;  %v1427_v27 = vld [vmem:[#allocation8 + $0x17c0] sm:$0xff] }
 0x2f1   :  { %4422 = vmatprep.subr.bf16.mxu0 %v4421_v62  ;;  %v2694_v62 = vld [vmem:[#allocation11 + $0x218] sm:$0xff] }
 0x2f2   :  { %4208 = vmatpush1.bf16.msra.mxu1 %v4207_v3  ;;  %v1350_v3 = vld [vmem:[#allocation8 + $0x1558] sm:$0xff]  ;;  %v4441_v6 = vpack.c.bf16 %v2694_v62, %v2692_v60  ;;  %v4251_v62 = vpack.c.bf16 %v1434_v54, %v1427_v27 }
 0x2f3   :  { %4210 = vmatprep.subr.bf16.mxu1 %v4209_v45  ;;  %v4439_v45 = vpack.c.bf16 %v2689_v59, %v2687_v55  ;;  %v4227_v28 = vpack.c.bf16 %v1350_v3, %v1343_v1  ;;  %v1441_v3 = vld [vmem:[#allocation8 + $0x1830] sm:$0xff] }
 0x2f4   :  { %4424 = vmatpush1.bf16.msra.mxu0 %v4423_v11  ;;  %v1364_v11 = vld [vmem:[#allocation8 + $0x15c8] sm:$0xff]  ;;  %v4255_v4 = vpack.c.bf16 %v1448_v12, %v1441_v3  ;;  %v2726_v3 = vld [vmem:[#allocation11 + $0x318] sm:$0xff] }
 0x2f5   :  { %4426 = vmatprep.subr.bf16.mxu0 %v4425_v13  ;;  %v1372_v13 = vld [vmem:[#allocation8 + $0x1608] sm:$0xff]  ;;  %v4231_v14 = vpack.c.bf16 %v1364_v11, %v1357_v8 }
 0x2f6   :  { %4212 = vmatpush1.bf16.msra.mxu1 %v4211_v16  ;;  %v4233_v16 = vpack.c.bf16 %v1379_v15, %v1372_v13  ;;  %v2695_v13 = vld [vmem:[#allocation11 + $0x220] sm:$0xff]  ;;  %v2697_v15 = vld [vmem:[#allocation11 + $0x230] sm:$0xff] }
 0x2f7   :  { %4214 = vmatprep.subr.bf16.mxu1 %v4213_v21  ;;  %v1386_v21 = vld [vmem:[#allocation8 + $0x1678] sm:$0xff] }
 0x2f8   :  { %4428 = vmatpush1.bf16.msra.mxu0 %v4427_v29  ;;  %v4237_v25 = vpack.c.bf16 %v1393_v23, %v1386_v21  ;;  %v1392_v29 = vld [vmem:[#allocation8 + $0x16a8] sm:$0xff]  ;;  %v4447_v21 = vpack.c.bf16 %v2697_v15, %v2695_v13  ;;  %v2729_v13 = vld [vmem:[#allocation11 + $0x330] sm:$0xff]  ;;  %v2732_v15 = vld [vmem:[#allocation11 + $0x348] sm:$0xff] }
 0x2f9   :  { %4430 = vmatprep.subr.bf16.mxu0 %v4429_v31  ;;  %v1400_v31 = vld [vmem:[#allocation8 + $0x16e8] sm:$0xff] }
 0x2fa   :  { %4216 = vmatpush1.bf16.msra.mxu1 %v4215_v38  ;;  %v4241_v37 = vpack.c.bf16 %v1407_v32, %v1400_v31  ;;  %v1399_v38 = vld [vmem:[#allocation8 + $0x16e0] sm:$0xff]  ;;  %v2703_v32 = vld [vmem:[#allocation11 + $0x260] sm:$0xff] }
 0x2fb   :  { %4218 = vmatprep.subr.bf16.mxu1 %v4217_v42  ;;  %v1421_v42 = vld [vmem:[#allocation8 + $0x1790] sm:$0xff]  ;;  %v4243_v43 = vpack.c.bf16 %v1406_v35, %v1399_v38  ;;  %v2710_v38 = vld [vmem:[#allocation11 + $0x298] sm:$0xff] }
 0x2fc   :  { %4432 = vmatpush1.bf16.msra.mxu0 %v4431_v47  ;;  %v4245_v46 = vpack.c.bf16 %v1421_v42, %v1414_v39  ;;  %v1420_v47 = vld [vmem:[#allocation8 + $0x1788] sm:$0xff] }
 0x2fd   :  { %4434 = vmatprep.subr.bf16.mxu0 %v4433_v48  ;;  %v1428_v48 = vld [vmem:[#allocation8 + $0x17c8] sm:$0xff]  ;;  %v4247_v41 = vpack.c.bf16 %v1420_v47, %v1413_v61  ;;  %v2714_v61 = vld [vmem:[#allocation11 + $0x2b8] sm:$0xff] }
 0x2fe   :  { %4220 = vmatpush1.bf16.msra.mxu1 %v4219_v10  ;;  %v1460_v10 = vrot.slane %v5109_v44, %v5022_v36  ;;  %v2707_v42 = vld [vmem:[#allocation11 + $0x280] sm:$0xff] }
 0x2ff   :  { %4222 = vmatprep.subr.bf16.mxu1 %v4221_v51  ;;  %v4249_v51 = vpack.c.bf16 %v1435_v49, %v1428_v48  ;;  %v2711_v49 = vld [vmem:[#allocation11 + $0x2a0] sm:$0xff] }
 0x300   :  { %4436 = vmatpush1.bf16.msra.mxu0 %v4435_v57  ;;  %v1442_v57 = vld [vmem:[#allocation8 + $0x1838] sm:$0xff] }
 0x301   :  { %4438 = vmatprep.subr.bf16.mxu0 %v4437_v58  ;;  %v1449_v58 = vld [vmem:[#allocation8 + $0x1870] sm:$0xff] }
 0x302   :  { %4224 = vmatpush1.bf16.msra.mxu1 %v4223_v40  ;;  %v4253_v1 = vpack.c.bf16 %v1449_v58, %v1442_v57  ;;  %v2715_v57 = vld [vmem:[#allocation11 + $0x2c0] sm:$0xff]  ;;  %v2717_v58 = vld [vmem:[#allocation11 + $0x2d0] sm:$0xff] }
 0x303   :  { %4226 = vmatprep.subr.bf16.mxu1 %v4225_v63 }
 0x304   :  { %4440 = vmatpush1.bf16.msra.mxu0 %v4439_v45  ;;  %v2693_v45 = vld [vmem:[#allocation11 + $0x210] sm:$0xff] }
 0x305   :  { %2263 = vmatmul.mubr.f32.vlgmr.msra.gmra.mrb[8].mxu1 %v5072_v19  ;;  %4442 = vmatprep.subr.bf16.mxu0 %v4441_v6  ;;  %v4239_v19 = vpack.c.bf16 %v1392_v29, %v1385_v26  ;;  %v2696_v6 = vld [vmem:[#allocation11 + $0x228] sm:$0xff] }
 0x306   :  { %4228 = vmatpush1.bf16.msra.mxu1 %v4227_v28  ;;  %2333 = vmatprep.mubr.f32.mxu1 %v4874_v52  ;;  %v2698_v28 = vld [vmem:[#allocation11 + $0x238] sm:$0xff]  ;;  %v2704_v26 = vld [vmem:[#allocation11 + $0x268] sm:$0xff] }
 0x307   :  { %4230 = vmatprep.subr.bf16.mxu1 %v4229_v7  ;;  %v4443_v7 = vpack.c.bf16 %v2693_v45, %v2691_v5  ;;  %v4445_v11 = vpack.c.bf16 %v2698_v28, %v2696_v6  ;;  %v2723_v5 = vld [vmem:[#allocation11 + $0x300] sm:$0xff]  ;;  %v2725_v45 = vld [vmem:[#allocation11 + $0x310] sm:$0xff]  ;;  %v2728_v6 = vld [vmem:[#allocation11 + $0x328] sm:$0xff] }
 0x308   :  { %v2730_v28 = vld [vmem:[#allocation11 + $0x338] sm:$0xff] }
 0x30a   :  { %4232 = vmatpush1.bf16.msra.mxu1 %v4231_v14 }
 0x30b   :  { %4234 = vmatprep.subr.bf16.mxu1 %v4233_v16  ;;  %v2700_v16 = vld [vmem:[#allocation11 + $0x248] sm:$0xff] }
 0x30c   :  { %v4449_v23 = vpack.c.bf16 %v2702_v17, %v2700_v16 }
 0x30e   :  { %4236 = vmatpush1.bf16.msra.mxu1 %v4235_v24  ;;  %v2699_v24 = vld [vmem:[#allocation11 + $0x240] sm:$0xff] }
 0x30f   :  { %4238 = vmatprep.subr.bf16.mxu1 %v4237_v25  ;;  %v2701_v25 = vld [vmem:[#allocation11 + $0x250] sm:$0xff] }
 0x310   :  { %v4451_v29 = vpack.c.bf16 %v2701_v25, %v2699_v24  ;;  %v2738_v24 = vld [vmem:[#allocation11 + $0x378] sm:$0xff] }
 0x312   :  { %4240 = vmatpush1.bf16.msra.mxu1 %v4239_v19  ;;  %v2705_v19 = vld [vmem:[#allocation11 + $0x270] sm:$0xff] }
 0x313   :  { %4242 = vmatprep.subr.bf16.mxu1 %v4241_v37  ;;  %v2708_v37 = vld [vmem:[#allocation11 + $0x288] sm:$0xff]  ;;  %v4455_v35 = vpack.c.bf16 %v2705_v19, %v2703_v32  ;;  %v2742_v32 = vld [vmem:[#allocation11 + $0x398] sm:$0xff] }
 0x314   :  { %v4457_v39 = vpack.c.bf16 %v2710_v38, %v2708_v37  ;;  %v2739_v38 = vld [vmem:[#allocation11 + $0x380] sm:$0xff] }
 0x316   :  { %4244 = vmatpush1.bf16.msra.mxu1 %v4243_v43  ;;  %v2709_v43 = vld [vmem:[#allocation11 + $0x290] sm:$0xff] }
 0x317   :  { %4246 = vmatprep.subr.bf16.mxu1 %v4245_v46  ;;  %v2712_v46 = vld [vmem:[#allocation11 + $0x2a8] sm:$0xff]  ;;  %v4459_v47 = vpack.c.bf16 %v2709_v43, %v2707_v42  ;;  %v2746_v42 = vld [vmem:[#allocation11 + $0x3b8] sm:$0xff]  ;;  %v1464_v43 = vrot.slane %v5109_v44, %v352_v9 }
 0x318   :  { %v1767_v53 = vpop.f32.mrb[6].mxu1  ;;  %v5118_v56 = vpop.f32.mrb[2].mxu0  ;;  %v4461_v48 = vpack.c.bf16 %v2714_v61, %v2712_v46  ;;  %v1480_v61 = vrot.slane %v5109_v44, %v368_v0  ;;  %v2752_v0 = vld [vmem:[#allocation11 + $0x3e8] sm:$0xff] }
 0x319   :  { %v1769_v55 = vpop.f32.mrb[7].mxu1  ;;  %v2053_v59 = vpop.f32.mrb[3].mxu0  ;;  %v4601_v40 = vadd.f32 %v1767_v53, %v1456_v50  ;;  %v2713_v50 = vld [vmem:[#allocation11 + $0x2b0] sm:$0xff] }
 0x31a   :  { %v4602_v60 = vadd.f32 %v1769_v55, %v1460_v10  ;;  %4248 = vmatpush1.bf16.msra.mxu1 %v4247_v41  ;;  %v4604_v63 = vadd.f32 %v2053_v59, %v1468_v30  ;;  %v2716_v10 = vld [vmem:[#allocation11 + $0x2c8] sm:$0xff]  ;;  %v2718_v41 = vld [vmem:[#allocation11 + $0x2d8] sm:$0xff]  ;;  %v4463_v27 = vpack.c.bf16 %v2713_v50, %v2711_v49  ;;  %v2745_v49 = vld [vmem:[#allocation11 + $0x3b0] sm:$0xff] }
 0x31b   :  { %4250 = vmatprep.subr.bf16.mxu1 %v4249_v51  ;;  %v4465_v53 = vpack.c.bf16 %v2718_v41, %v2716_v10  ;;  %v2720_v55 = vld [vmem:[#allocation11 + $0x2e8] sm:$0xff]  ;;  %v2722_v59 = vld [vmem:[#allocation11 + $0x2f8] sm:$0xff] }
 0x31c   :  { %4662 = vtanh.f32 %v4602_v60  ;;  %v4469_v60 = vpack.c.bf16 %v2722_v59, %v2720_v55  ;;  %v2748_v50 = vld [vmem:[#allocation11 + $0x3c8] sm:$0xff]  ;;  %v2750_v10 = vld [vmem:[#allocation11 + $0x3d8] sm:$0xff]  ;;  %v2749_v55 = vld [vmem:[#allocation11 + $0x3d0] sm:$0xff] }
 0x31d   :  { %4664 = vtanh.f32 %v4601_v40  ;;  %v4467_v40 = vpack.c.bf16 %v2717_v58, %v2715_v57  ;;  %v4497_v57 = vpack.c.bf16 %v2750_v10, %v2748_v50  ;;  %v2747_v58 = vld [vmem:[#allocation11 + $0x3c0] sm:$0xff]  ;;  %v2754_v59 = vld [vmem:[#allocation11 + $0x3f8] sm:$0xff] }
 0x31e   :  { %4252 = vmatpush1.bf16.msra.mxu1 %v4251_v62  ;;  %4666 = vtanh.f32 %v4604_v63  ;;  %v2719_v62 = vld [vmem:[#allocation11 + $0x2e0] sm:$0xff]  ;;  %v2721_v63 = vld [vmem:[#allocation11 + $0x2f0] sm:$0xff] }
 0x31f   :  { %4254 = vmatprep.subr.bf16.mxu1 %v4253_v1  ;;  %v2724_v1 = vld [vmem:[#allocation11 + $0x308] sm:$0xff]  ;;  %v4471_v12 = vpack.c.bf16 %v2721_v63, %v2719_v62  ;;  %v4501_v62 = vpack.c.bf16 %v2754_v59, %v2752_v0  ;;  %v2753_v63 = vld [vmem:[#allocation11 + $0x3f0] sm:$0xff]  ;;  %v2783_v59 = vld [vmem:[#allocation11 + $0x4e0] sm:$0xff] }
 0x322   :  { %4256 = vmatpush1.bf16.msra.mxu1 %v4255_v4  ;;  %v4473_v4 = vpack.c.bf16 %v2726_v3, %v2724_v1  ;;  %v2756_v1 = vld [vmem:[#allocation11 + $0x408] sm:$0xff]  ;;  %v2758_v3 = vld [vmem:[#allocation11 + $0x418] sm:$0xff] }
 0x325   :  { %2334 = vmatmul.mubr.f32.vlgmr.msra.gmra.mrb[8].mxu1 %v5082_v22  ;;  %v2706_v22 = vld [vmem:[#allocation11 + $0x278] sm:$0xff] }
 0x326   :  { %v4663_v8 = vpop.eup %4662  ;;  %v4453_v31 = vpack.c.bf16 %v2706_v22, %v2704_v26  ;;  %v2735_v22 = vld [vmem:[#allocation11 + $0x360] sm:$0xff] }
 0x327   :  { %v4665_v14 = vpop.eup %4664  ;;  %2927 = vmatprep.mubr.f32.mxu0 %v4663_v8  ;;  %v4477_v8 = vpack.c.bf16 %v2730_v28, %v2728_v6  ;;  %v2762_v6 = vld [vmem:[#allocation11 + $0x438] sm:$0xff] }
 0x328   :  { %v4667_v20 = vpop.eup %4666  ;;  %2928 = vmatmul.mubr.f32.vlgmr.msra.gmra.mrb[12].mxu0 %v4665_v14  ;;  %v2734_v14 = vld [vmem:[#allocation11 + $0x358] sm:$0xff] }
 0x329   :  { %4444 = vmatpush1.bf16.msra.mxu0 %v4443_v7  ;;  %2998 = vmatprep.mubr.f32.mxu0 %v4667_v20  ;;  %v4475_v7 = vpack.c.bf16 %v2725_v45, %v2723_v5  ;;  %v4481_v17 = vpack.c.bf16 %v2734_v14, %v2732_v15  ;;  %v2731_v20 = vld [vmem:[#allocation11 + $0x340] sm:$0xff]  ;;  %v2757_v5 = vld [vmem:[#allocation11 + $0x410] sm:$0xff]  ;;  %v2760_v45 = vld [vmem:[#allocation11 + $0x428] sm:$0xff] }
 0x32a   :  { %4446 = vmatprep.subr.bf16.mxu0 %v4445_v11  ;;  %v2727_v11 = vld [vmem:[#allocation11 + $0x320] sm:$0xff]  ;;  %v2764_v15 = vld [vmem:[#allocation11 + $0x448] sm:$0xff]  ;;  %v2766_v14 = vld [vmem:[#allocation11 + $0x458] sm:$0xff] }
 0x32b   :  { %v4479_v16 = vpack.c.bf16 %v2729_v13, %v2727_v11  ;;  %v2761_v11 = vld [vmem:[#allocation11 + $0x430] sm:$0xff] }
 0x32d   :  { %4448 = vmatpush1.bf16.msra.mxu0 %v4447_v21  ;;  %v2733_v21 = vld [vmem:[#allocation11 + $0x350] sm:$0xff] }
 0x32e   :  { %4450 = vmatprep.subr.bf16.mxu0 %v4449_v23  ;;  %v2736_v23 = vld [vmem:[#allocation11 + $0x368] sm:$0xff]  ;;  %v4483_v25 = vpack.c.bf16 %v2733_v21, %v2731_v20  ;;  %v2763_v20 = vld [vmem:[#allocation11 + $0x440] sm:$0xff]  ;;  %v2765_v21 = vld [vmem:[#allocation11 + $0x450] sm:$0xff] }
 0x32f   :  { %v4485_v26 = vpack.c.bf16 %v2738_v24, %v2736_v23  ;;  %v2768_v23 = vld [vmem:[#allocation11 + $0x468] sm:$0xff]  ;;  %v2770_v24 = vld [vmem:[#allocation11 + $0x478] sm:$0xff] }
 0x331   :  { %4452 = vmatpush1.bf16.msra.mxu0 %v4451_v29  ;;  %v2737_v29 = vld [vmem:[#allocation11 + $0x370] sm:$0xff] }
 0x332   :  { %4454 = vmatprep.subr.bf16.mxu0 %v4453_v31  ;;  %v2740_v31 = vld [vmem:[#allocation11 + $0x388] sm:$0xff]  ;;  %v4487_v19 = vpack.c.bf16 %v2737_v29, %v2735_v22  ;;  %v2767_v22 = vld [vmem:[#allocation11 + $0x460] sm:$0xff]  ;;  %v2769_v29 = vld [vmem:[#allocation11 + $0x470] sm:$0xff] }
 0x333   :  { %v4489_v37 = vpack.c.bf16 %v2742_v32, %v2740_v31  ;;  %v2772_v31 = vld [vmem:[#allocation11 + $0x488] sm:$0xff]  ;;  %v2774_v32 = vld [vmem:[#allocation11 + $0x498] sm:$0xff] }
 0x335   :  { %4456 = vmatpush1.bf16.msra.mxu0 %v4455_v35  ;;  %v2741_v35 = vld [vmem:[#allocation11 + $0x390] sm:$0xff] }
 0x336   :  { %4458 = vmatprep.subr.bf16.mxu0 %v4457_v39  ;;  %v2744_v39 = vld [vmem:[#allocation11 + $0x3a8] sm:$0xff]  ;;  %v4491_v46 = vpack.c.bf16 %v2741_v35, %v2739_v38  ;;  %v2771_v38 = vld [vmem:[#allocation11 + $0x480] sm:$0xff]  ;;  %v2773_v35 = vld [vmem:[#allocation11 + $0x490] sm:$0xff] }
 0x339   :  { %v3236_v30 = vpop.f32.mrb[4].mxu0  ;;  %4460 = vmatpush1.bf16.msra.mxu0 %v4459_v47  ;;  %v4493_v47 = vpack.c.bf16 %v2746_v42, %v2744_v39  ;;  %v2776_v39 = vld [vmem:[#allocation11 + $0x4a8] sm:$0xff]  ;;  %v2778_v42 = vld [vmem:[#allocation11 + $0x4b8] sm:$0xff] }
 0x33a   :  { %v3237_v51 = vpop.f32.mrb[5].mxu0  ;;  %4462 = vmatprep.subr.bf16.mxu0 %v4461_v48  ;;  %v2743_v48 = vld [vmem:[#allocation11 + $0x3a0] sm:$0xff] }
 0x33b   :  { %v5121_v54 = vadd.f32 %v3237_v51, %v3236_v30  ;;  %v4603_v30 = vadd.f32 %v5118_v56, %v1464_v43  ;;  %v2751_v56 = vld [vmem:[#allocation11 + $0x3e0] sm:$0xff]  ;;  %v4523_v43 = vpack.c.bf16 %v2773_v35, %v2771_v38 }
 0x33c   :  { %v2807_v35 = vld [vmem:[#allocation11 + $0x5a0] sm:$0xff] }
 0x33d   :  { %4464 = vmatpush1.bf16.msra.mxu0 %v4463_v27  ;;  %v4495_v27 = vpack.c.bf16 %v2745_v49, %v2743_v48  ;;  %v2407_v9 = vadd.f32 %v5121_v54, %v1480_v61  ;;  %4668 = vtanh.f32 %v4603_v30  ;;  %v4503_v54 = vpack.c.bf16 %v2753_v63, %v2751_v56  ;;  %v2775_v61 = vld [vmem:[#allocation11 + $0x4a0] sm:$0xff]  ;;  %v2780_v48 = vld [vmem:[#allocation11 + $0x4c8] sm:$0xff]  ;;  %v2782_v49 = vld [vmem:[#allocation11 + $0x4d8] sm:$0xff] }
 0x33e   :  { %4466 = vmatprep.subr.bf16.mxu0 %v4465_v53  ;;  %v2790_v56 = vld [vmem:[#allocation11 + $0x518] sm:$0xff] }
 0x341   :  { %4468 = vmatpush1.bf16.msra.mxu0 %v4467_v40 }
 0x342   :  { %4470 = vmatprep.subr.bf16.mxu0 %v4469_v60  ;;  %v4499_v60 = vpack.c.bf16 %v2749_v55, %v2747_v58 }
 0x345   :  { %4472 = vmatpush1.bf16.msra.mxu0 %v4471_v12  ;;  %v4505_v12 = vpack.c.bf16 %v2758_v3, %v2756_v1  ;;  %v2787_v3 = vld [vmem:[#allocation11 + $0x500] sm:$0xff] }
 0x346   :  { %4474 = vmatprep.subr.bf16.mxu0 %v4473_v4  ;;  %v2755_v4 = vld [vmem:[#allocation11 + $0x400] sm:$0xff] }
 0x347   :  { %v4507_v28 = vpack.c.bf16 %v2757_v5, %v2755_v4  ;;  %v4669_v13 = vpop.eup %4668  ;;  %v2794_v4 = vld [vmem:[#allocation11 + $0x538] sm:$0xff] }
 0x349   :  { %4476 = vmatpush1.bf16.msra.mxu0 %v4475_v7  ;;  %v4509_v7 = vpack.c.bf16 %v2762_v6, %v2760_v45  ;;  %v2791_v45 = vld [vmem:[#allocation11 + $0x520] sm:$0xff]  ;;  %v2793_v6 = vld [vmem:[#allocation11 + $0x530] sm:$0xff] }
 0x34a   :  { %4478 = vmatprep.subr.bf16.mxu0 %v4477_v8  ;;  %v2759_v8 = vld [vmem:[#allocation11 + $0x420] sm:$0xff] }
 0x34d   :  { %4480 = vmatpush1.bf16.msra.mxu0 %v4479_v16  ;;  %v4511_v16 = vpack.c.bf16 %v2761_v11, %v2759_v8  ;;  %v4543_v8 = vpack.c.bf16 %v2793_v6, %v2791_v45  ;;  %v2823_v6 = vld [vmem:[#allocation11 + $0x620] sm:$0xff] }
 0x34e   :  { %4482 = vmatprep.subr.bf16.mxu0 %v4481_v17  ;;  %v4513_v17 = vpack.c.bf16 %v2766_v14, %v2764_v15  ;;  %v2797_v15 = vld [vmem:[#allocation11 + $0x550] sm:$0xff]  ;;  %v2800_v14 = vld [vmem:[#allocation11 + $0x568] sm:$0xff] }
 0x351   :  { %4484 = vmatpush1.bf16.msra.mxu0 %v4483_v25  ;;  %v4515_v25 = vpack.c.bf16 %v2765_v21, %v2763_v20  ;;  %v2799_v21 = vld [vmem:[#allocation11 + $0x560] sm:$0xff] }
 0x352   :  { %4486 = vmatprep.subr.bf16.mxu0 %v4485_v26  ;;  %v4517_v26 = vpack.c.bf16 %v2770_v24, %v2768_v23  ;;  %v2801_v23 = vld [vmem:[#allocation11 + $0x570] sm:$0xff]  ;;  %v2804_v24 = vld [vmem:[#allocation11 + $0x588] sm:$0xff] }
 0x355   :  { %4488 = vmatpush1.bf16.msra.mxu0 %v4487_v19  ;;  %v4519_v19 = vpack.c.bf16 %v2769_v29, %v2767_v22  ;;  %v2803_v29 = vld [vmem:[#allocation11 + $0x580] sm:$0xff] }
 0x356   :  { %4490 = vmatprep.subr.bf16.mxu0 %v4489_v37  ;;  %v4521_v37 = vpack.c.bf16 %v2774_v32, %v2772_v31  ;;  %v2805_v31 = vld [vmem:[#allocation11 + $0x590] sm:$0xff]  ;;  %v2808_v32 = vld [vmem:[#allocation11 + $0x5a8] sm:$0xff] }
 0x359   :  { %v3271_v41 = vpop.f32.mrb[6].mxu0  ;;  %4492 = vmatpush1.bf16.msra.mxu0 %v4491_v46  ;;  %v4525_v46 = vpack.c.bf16 %v2778_v42, %v2776_v39  ;;  %v2809_v39 = vld [vmem:[#allocation11 + $0x5b0] sm:$0xff]  ;;  %v2812_v42 = vld [vmem:[#allocation11 + $0x5c8] sm:$0xff] }
 0x35a   :  { %v3272_v51 = vpop.f32.mrb[7].mxu0  ;;  %4494 = vmatprep.subr.bf16.mxu0 %v4493_v47  ;;  %v2777_v47 = vld [vmem:[#allocation11 + $0x4b0] sm:$0xff] }
 0x35b   :  { %v3273_v53 = vadd.f32 %v3272_v51, %v3271_v41  ;;  %v4527_v41 = vpack.c.bf16 %v2777_v47, %v2775_v61  ;;  %v4529_v51 = vpack.c.bf16 %v2782_v49, %v2780_v48  ;;  %v4559_v48 = vpack.c.bf16 %v2809_v39, %v2807_v35  ;;  %v2846_v35 = vld [vmem:[#allocation11 + $0x6d8] sm:$0xff] }
 0x35d   :  { %v5131_v40 = vadd.f32 %v3273_v53, %v2407_v9  ;;  %4496 = vmatpush1.bf16.msra.mxu0 %v4495_v27  ;;  %v2779_v27 = vld [vmem:[#allocation11 + $0x4c0] sm:$0xff]  ;;  %v2781_v9 = vld [vmem:[#allocation11 + $0x4d0] sm:$0xff]  ;;  %v2784_v53 = vld [vmem:[#allocation11 + $0x4e8] sm:$0xff] }
 0x35e   :  { %4498 = vmatprep.subr.bf16.mxu0 %v4497_v57  ;;  %v2786_v57 = vld [vmem:[#allocation11 + $0x4f8] sm:$0xff]  ;;  %v4531_v55 = vpack.c.bf16 %v2781_v9, %v2779_v27  ;;  %v2815_v9 = vld [vmem:[#allocation11 + $0x5e0] sm:$0xff] }
 0x35f   :  { %v4533_v0 = vpack.c.bf16 %v2786_v57, %v2784_v53  ;;  %v2817_v53 = vld [vmem:[#allocation11 + $0x5f0] sm:$0xff]  ;;  %v2820_v57 = vld [vmem:[#allocation11 + $0x608] sm:$0xff] }
 0x361   :  { %4500 = vmatpush1.bf16.msra.mxu0 %v4499_v60  ;;  %v2785_v60 = vld [vmem:[#allocation11 + $0x4f0] sm:$0xff] }
 0x362   :  { %4502 = vmatprep.subr.bf16.mxu0 %v4501_v62  ;;  %v2788_v62 = vld [vmem:[#allocation11 + $0x508] sm:$0xff]  ;;  %v4535_v63 = vpack.c.bf16 %v2785_v60, %v2783_v59  ;;  %v1472_v59 = vrot.slane %v5109_v44, %v360_v2  ;;  %v1476_v60 = vrot.slane %v5109_v44, %v364_v18 }
 0x363   :  { %v4537_v1 = vpack.c.bf16 %v2790_v56, %v2788_v62 }
 0x365   :  { %4504 = vmatpush1.bf16.msra.mxu0 %v4503_v54  ;;  %v2789_v54 = vld [vmem:[#allocation11 + $0x510] sm:$0xff] }
 0x366   :  { %4506 = vmatprep.subr.bf16.mxu0 %v4505_v12  ;;  %v2792_v12 = vld [vmem:[#allocation11 + $0x528] sm:$0xff]  ;;  %v4539_v5 = vpack.c.bf16 %v2789_v54, %v2787_v3  ;;  %v2819_v3 = vld [vmem:[#allocation11 + $0x600] sm:$0xff]  ;;  %v2821_v54 = vld [vmem:[#allocation11 + $0x610] sm:$0xff] }
 0x368   :  { %2999 = vmatmul.mubr.f32.vlgmr.msra.gmra.mrb[12].mxu0 %v4669_v13  ;;  %v2795_v13 = vld [vmem:[#allocation11 + $0x540] sm:$0xff] }
 0x369   :  { %4508 = vmatpush1.bf16.msra.mxu0 %v4507_v28  ;;  %v2796_v28 = vld [vmem:[#allocation11 + $0x548] sm:$0xff] }
 0x36a   :  { %4510 = vmatprep.subr.bf16.mxu0 %v4509_v7  ;;  %v2798_v7 = vld [vmem:[#allocation11 + $0x558] sm:$0xff] }
 0x36b   :  { %v4545_v11 = vpack.c.bf16 %v2798_v7, %v2796_v28  ;;  %v2825_v28 = vld [vmem:[#allocation11 + $0x630] sm:$0xff]  ;;  %v2830_v7 = vld [vmem:[#allocation11 + $0x658] sm:$0xff] }
 0x36c   :  { %v4575_v18 = vpack.c.bf16 %v2825_v28, %v2823_v6  ;;  %v4577_v44 = vpack.c.bf16 %v2830_v7, %v2828_v33 }
 0x36d   :  { %4512 = vmatpush1.bf16.msra.mxu0 %v4511_v16  ;;  %v2802_v16 = vld [vmem:[#allocation11 + $0x578] sm:$0xff] }
 0x36e   :  { %4514 = vmatprep.subr.bf16.mxu0 %v4513_v17  ;;  %v4547_v17 = vpack.c.bf16 %v2797_v15, %v2795_v13  ;;  %v4549_v20 = vpack.c.bf16 %v2802_v16, %v2800_v14  ;;  %v2832_v13 = vld [vmem:[#allocation11 + $0x668] sm:$0xff]  ;;  %v2834_v15 = vld [vmem:[#allocation11 + $0x678] sm:$0xff] }
 0x36f   :  { %v4581_v16 = vpack.c.bf16 %v2834_v15, %v2832_v13 }
 0x371   :  { %4516 = vmatpush1.bf16.msra.mxu0 %v4515_v25  ;;  %v2806_v25 = vld [vmem:[#allocation11 + $0x598] sm:$0xff] }
 0x372   :  { %4518 = vmatprep.subr.bf16.mxu0 %v4517_v26  ;;  %v4551_v26 = vpack.c.bf16 %v2801_v23, %v2799_v21  ;;  %v4553_v22 = vpack.c.bf16 %v2806_v25, %v2804_v24  ;;  %v2836_v21 = vld [vmem:[#allocation11 + $0x688] sm:$0xff]  ;;  %v2838_v23 = vld [vmem:[#allocation11 + $0x698] sm:$0xff] }
 0x373   :  { %v4585_v25 = vpack.c.bf16 %v2838_v23, %v2836_v21 }
 0x375   :  { %4520 = vmatpush1.bf16.msra.mxu0 %v4519_v19  ;;  %v2810_v19 = vld [vmem:[#allocation11 + $0x5b8] sm:$0xff] }
 0x376   :  { %4522 = vmatprep.subr.bf16.mxu0 %v4521_v37  ;;  %v4555_v37 = vpack.c.bf16 %v2805_v31, %v2803_v29  ;;  %v4557_v38 = vpack.c.bf16 %v2810_v19, %v2808_v32  ;;  %v2842_v29 = vld [vmem:[#allocation11 + $0x6b8] sm:$0xff]  ;;  %v2839_v19 = vld [vmem:[#allocation11 + $0x6a0] sm:$0xff] }
 0x379   :  { %v3306_v50 = vpop.f32.mrb[8].mxu0  ;;  %4524 = vmatpush1.bf16.msra.mxu0 %v4523_v43  ;;  %v2814_v43 = vld [vmem:[#allocation11 + $0x5d8] sm:$0xff] }
 0x37a   :  { %v3307_v10 = vpop.f32.mrb[9].mxu0  ;;  %4526 = vmatprep.subr.bf16.mxu0 %v4525_v46  ;;  %v4561_v49 = vpack.c.bf16 %v2814_v43, %v2812_v42  ;;  %v2843_v43 = vld [vmem:[#allocation11 + $0x6c0] sm:$0xff] }
 0x37b   :  { %v3308_v30 = vadd.f32 %v3307_v10, %v3306_v50  ;;  %v2811_v50 = vld [vmem:[#allocation11 + $0x5c0] sm:$0xff]  ;;  %v2813_v10 = vld [vmem:[#allocation11 + $0x5d0] sm:$0xff] }
 0x37d   :  { %v2547_v58 = vadd.f32 %v3308_v30, %v5131_v40  ;;  %4528 = vmatpush1.bf16.msra.mxu0 %v4527_v41  ;;  %v4541_v40 = vpack.c.bf16 %v2794_v4, %v2792_v12  ;;  %v2816_v41 = vld [vmem:[#allocation11 + $0x5e8] sm:$0xff]  ;;  %v2818_v30 = vld [vmem:[#allocation11 + $0x5f8] sm:$0xff] }
 0x37e   :  { %4530 = vmatprep.subr.bf16.mxu0 %v4529_v51  ;;  %v4563_v51 = vpack.c.bf16 %v2813_v10, %v2811_v50  ;;  %v4565_v27 = vpack.c.bf16 %v2818_v30, %v2816_v41  ;;  %v2824_v12 = vld [vmem:[#allocation11 + $0x628] sm:$0xff]  ;;  %v2826_v4 = vld [vmem:[#allocation11 + $0x638] sm:$0xff]  ;;  %v2847_v10 = vld [vmem:[#allocation11 + $0x6e0] sm:$0xff] }
 0x37f   :  { %v4573_v45 = vpack.c.bf16 %v2826_v4, %v2824_v12  ;;  %v2849_v41 = vld [vmem:[#allocation11 + $0x6f0] sm:$0xff] }
 0x380   :  { %v4599_v30 = vpack.c.bf16 %v2849_v41, %v2847_v10 }
 0x381   :  { %4532 = vmatpush1.bf16.msra.mxu0 %v4531_v55  ;;  %v2822_v55 = vld [vmem:[#allocation11 + $0x618] sm:$0xff] }
 0x382   :  { %4534 = vmatprep.subr.bf16.mxu0 %v4533_v0  ;;  %v4569_v0 = vpack.c.bf16 %v2822_v55, %v2820_v57 }
 0x385   :  { %4536 = vmatpush1.bf16.msra.mxu0 %v4535_v63 }
 0x386   :  { %4538 = vmatprep.subr.bf16.mxu0 %v4537_v1 }
 0x389   :  { %4540 = vmatpush1.bf16.msra.mxu0 %v4539_v5  ;;  %v4571_v5 = vpack.c.bf16 %v2821_v54, %v2819_v3 }
 0x38a   :  { %4542 = vmatprep.subr.bf16.mxu0 %v4541_v40 }
 0x38d   :  { %4544 = vmatpush1.bf16.msra.mxu0 %v4543_v8  ;;  %v2827_v8 = vld [vmem:[#allocation11 + $0x640] sm:$0xff] }
 0x38e   :  { %4546 = vmatprep.subr.bf16.mxu0 %v4545_v11  ;;  %v2829_v11 = vld [vmem:[#allocation11 + $0x650] sm:$0xff] }
 0x38f   :  { %v4579_v14 = vpack.c.bf16 %v2829_v11, %v2827_v8 }
 0x391   :  { %4548 = vmatpush1.bf16.msra.mxu0 %v4547_v17  ;;  %v2831_v17 = vld [vmem:[#allocation11 + $0x660] sm:$0xff] }
 0x392   :  { %4550 = vmatprep.subr.bf16.mxu0 %v4549_v20  ;;  %v2833_v20 = vld [vmem:[#allocation11 + $0x670] sm:$0xff] }
 0x393   :  { %v4583_v24 = vpack.c.bf16 %v2833_v20, %v2831_v17 }
 0x395   :  { %4552 = vmatpush1.bf16.msra.mxu0 %v4551_v26  ;;  %v2835_v26 = vld [vmem:[#allocation11 + $0x680] sm:$0xff] }
 0x396   :  { %4554 = vmatprep.subr.bf16.mxu0 %v4553_v22  ;;  %v2840_v22 = vld [vmem:[#allocation11 + $0x6a8] sm:$0xff] }
 0x397   :  { %v4589_v32 = vpack.c.bf16 %v2842_v29, %v2840_v22 }
 0x399   :  { %v2616_v46 = vpop.f32.mrb[10].mxu0  ;;  %4556 = vmatpush1.bf16.msra.mxu0 %v4555_v37  ;;  %v2841_v37 = vld [vmem:[#allocation11 + $0x6b0] sm:$0xff] }
 0x39a   :  { %v5134_v61 = vadd.f32 %v2616_v46, %v2547_v58  ;;  %v3360_v47 = vpop.f32.mrb[11].mxu0  ;;  %4558 = vmatprep.subr.bf16.mxu0 %v4557_v38  ;;  %v4567_v58 = vpack.c.bf16 %v2817_v53, %v2815_v9  ;;  %v2844_v38 = vld [vmem:[#allocation11 + $0x6c8] sm:$0xff]  ;;  %v4591_v39 = vpack.c.bf16 %v2841_v37, %v2839_v19  ;;  %v2845_v46 = vld [vmem:[#allocation11 + $0x6d0] sm:$0xff] }
 0x39b   :  { %v4593_v42 = vpack.c.bf16 %v2846_v35, %v2844_v38  ;;  %v2848_v47 = vld [vmem:[#allocation11 + $0x6e8] sm:$0xff] }
 0x39d   :  { %4560 = vmatpush1.bf16.msra.mxu0 %v4559_v48  ;;  %v2850_v48 = vld [vmem:[#allocation11 + $0x6f8] sm:$0xff] }
 0x39e   :  { %4562 = vmatprep.subr.bf16.mxu0 %v4561_v49  ;;  %v4595_v49 = vpack.c.bf16 %v2845_v46, %v2843_v43  ;;  %v4597_v50 = vpack.c.bf16 %v2850_v48, %v2848_v47 }
 0x3a1   :  { %4564 = vmatpush1.bf16.msra.mxu0 %v4563_v51 }
 0x3a2   :  { %4566 = vmatprep.subr.bf16.mxu0 %v4565_v27  ;;  %v2851_v27 = vld [vmem:[#allocation13] sm:$0x3] }
 0x3a3   :  { %v2856_v9 = vrot.slane %v2851_v27, %v5017_v34  ;;  %v2860_v53 = vrot.slane %v2851_v27, %v5022_v36 }
 0x3a5   :  { %4568 = vmatpush1.bf16.msra.mxu0 %v4567_v58 }
 0x3a6   :  { %4570 = vmatprep.subr.bf16.mxu0 %v4569_v0 }
 0x3f8   :  { %v2335_v62 = vpop.f32.mrb[8].mxu1 }
 0x3f9   :  { %v4605_v56 = vadd.f32 %v2335_v62, %v1472_v59  ;;  %v2337_v63 = vpop.f32.mrb[9].mxu1 }
 0x3fa   :  { %v4606_v1 = vadd.f32 %v2337_v63, %v1476_v60 }
 0x3fc   :  { %4670 = vtanh.f32 %v4606_v1 }
 0x3fd   :  { %4672 = vtanh.f32 %v4605_v56 }
 0x3fe   :  { %4674 = vtanh.f32 %v5134_v61 }
 0x406   :  { %v4671_v40 = vpop.eup %4670 }
 0x407   :  { %v4673_v2 = vpop.eup %4672  ;;  %3069 = vmatprep.mubr.f32.mxu0 %v4671_v40 }
 0x408   :  { %3070 = vmatmul.mubr.f32.vlgmr.msra.gmra.mrb[12].mxu0 %v4673_v2  ;;  %v4675_v51 = vpop.eup %4674 }
 0x409   :  { %4572 = vmatpush1.bf16.msra.mxu0 %v4571_v5  ;;  %3140 = vmatprep.mubr.f32.mxu0 %v4874_v52  ;;  %v2837_v52 = vld [vmem:[#allocation11 + $0x690] sm:$0xff] }
 0x40a   :  { %4574 = vmatprep.subr.bf16.mxu0 %v4573_v45  ;;  %v4587_v31 = vpack.c.bf16 %v2837_v52, %v2835_v26 }
 0x40d   :  { %4576 = vmatpush1.bf16.msra.mxu0 %v4575_v18 }
 0x40e   :  { %4578 = vmatprep.subr.bf16.mxu0 %v4577_v44 }
 0x411   :  { %4580 = vmatpush1.bf16.msra.mxu0 %v4579_v14 }
 0x412   :  { %4582 = vmatprep.subr.bf16.mxu0 %v4581_v16 }
 0x415   :  { %4584 = vmatpush1.bf16.msra.mxu0 %v4583_v24 }
 0x416   :  { %4586 = vmatprep.subr.bf16.mxu0 %v4585_v25 }
 0x419   :  { %4588 = vmatpush1.bf16.msra.mxu0 %v4587_v31 }
 0x41a   :  { %4590 = vmatprep.subr.bf16.mxu0 %v4589_v32 }
 0x41d   :  { %4592 = vmatpush1.bf16.msra.mxu0 %v4591_v39 }
 0x41e   :  { %4594 = vmatprep.subr.bf16.mxu0 %v4593_v42 }
 0x421   :  { %4596 = vmatpush1.bf16.msra.mxu0 %v4595_v49 }
 0x422   :  { %4598 = vmatprep.subr.bf16.mxu0 %v4597_v50 }
 0x425   :  { %4600 = vmatpush1.bf16.msra.mxu0 %v4599_v30 }
 0x428   :  { %3141 = vmatmul.mubr.f32.vlgmr.msra.gmra.mrb[12].mxu0 %v4675_v51 }
 0x4fb   :  { %v3142_v57 = vpop.f32.mrb[12].mxu0 }
 0x4fc   :  { %v4607_v55 = vadd.f32 %v3142_v57, %v2856_v9  ;;  %v3144_v61 = vpop.f32.mrb[13].mxu0 }
 0x4fd   :  { %v4608_v58 = vadd.f32 %v3144_v61, %v2860_v53 }
 0x4fe   :  { %v3147_v0 = vmax.f32 %v4607_v55, 0.0 }
 0x4ff   :  { %v3148_v59 = vmax.f32 %v4608_v58, 0.0 }
 0x500   :  { %3149 = vst [vmem:[#allocation14] sm:$0xff] %v3147_v0 }
 0x501   :  { %3150 = vst [vmem:[#allocation14 + $0x8] sm:$0xff] %v3148_v59 }
 0x502   :  { %4842 = shalt.err (!%p4839_p4)
}
 0x503   :  { %s4843_s12 = scalar_lea.hbm %s5165_s7, 256 }
 0x504   :  { %p4844_p5 = scmp.ne.s32.totalorder %s5165_s7, %s4843_s12  ;;  %p4847_p6 = scmp.lt.u32.totalorder %s4843_s12, %s5165_s7 }
 0x506   :  { %p4849_p7 = pnand %p4847_p6, %p4844_p5 }
 0x508   :  { %4852 = shalt.err (!%p4849_p7)
}
 0x509   :  { %3160 = dma.vmem_to_hbm [thread:$0]  %s3158_s14, 256, %s5165_s7, [#allocation4]  }
 0x50a   :  { %4861 = dma.done.wait [#allocation4], 256  }
 0x50b   :  { %4862 = vsyncadd [#allocation4], 4294967040 }
 0x50c   :  { %3164 = vsyncpa [#allocation3], 1 }
 0x50d   :  { %3165 = vsyncpa [#allocation6], 1 }
 0x50e   :  { %3166 = vsyncpa [#allocation9], 1 }
 0x50f   :  { %3167 = vsyncpa [#allocation12], 1 }
 0x510   :  { %3168 = vsyncpa [#allocation4], 1 }

</bundles_post_ra>
